<compile_context>
chip_gen: v7x
topology: tpu7x:2x2x1
jax: 0.10.0
libtpu: 0.0.40
codegen_flags: <defaults>
</compile_context>

<pallas_src>
import jax
import jax.numpy as jnp
from jax.experimental import pallas as pl
from jax.experimental.pallas import tpu as pltpu

DROPOUT_P = 0.01   # TODO(synk): nn.Dropout(p=0.01) treated as identity (eval mode).
MAX_LENGTH = 8
SOS_token = 0


def attn_decoder_kernel(enc_out_ref, enc_hid_ref, w_ref, b_ref, out_ref):
    B, S, H = enc_out_ref.shape
    V = w_ref.shape[0] - H
    f32 = jnp.float32

    # ---- hoisted loads: each VMEM slab read exactly once ----
    keys = enc_out_ref[...].astype(f32)                       # (B, S, H)
    h = enc_hid_ref[0].astype(f32)                            # (B, H) decoder hidden

    w_h     = w_ref[0:H, 0:4 * H]                             # (H,4H): [Wa | W_hr | W_hz | W_hn]
    w_kproj = w_ref[0:H, 4 * H:8 * H]                         # (H,4H): [Ua | W_cr | W_cz | W_cn]
    out_w   = w_ref[0:H, 8 * H:8 * H + V]                     # (H,V)
    w_emb   = w_ref[H:H + V, 0:3 * H]                         # (V,3H): emb@W_i* + folded biases

    # bias slab rows: 0=[wa_b|0|0|b_hhn]  1=[ua_b|0|0|0]  2=[va|0]  3=[out_b|0]
    hb      = jnp.broadcast_to(b_ref[0:1, 0:4 * H], (B, 4 * H))
    kproj_b = b_ref[1:2, 0:4 * H]                             # (1,4H)
    va      = jnp.broadcast_to(b_ref[2:3, 0:H].reshape(1, 1, H), (B, S, H))
    out_b   = jnp.broadcast_to(b_ref[3:4, 0:V], (B, V))

    # ---- step-invariant key projections: ONE (B*S,H)@(H,4H) matmul ----
    #   lanes 0:H   -> Ua(keys) + ua_b            (attention energies)
    #   lanes H:4H  -> keys @ [W_cr|W_cz|W_cn]    (context@W_c == weighted sum of
    #                                              these rows, by linearity)
    kproj = (jnp.dot(keys.reshape(B * S, H), w_kproj, preferred_element_type=f32)
             + kproj_b).reshape(B, S, 4 * H)
    ua_keys   = kproj[:, :, 0:H]                              # (B,S,H)
    ctx_kproj = kproj[:, :, H:4 * H]                          # (B,S,3H)

    iota_v = jax.lax.broadcasted_iota(jnp.int32, (B, V), 1)
    onehot = (iota_v == SOS_token).astype(f32)                # one-hot SOS start token

    logp_steps = []
    attn_steps = []
    for _ in range(MAX_LENGTH):
        # -- one matmul: attention query + all three hidden-gate pre-activations --
        h_g = jnp.dot(h, w_h, preferred_element_type=f32) + hb          # (B,4H)

        # -- Bahdanau attention (Va bias dropped: softmax shift-invariant) --
        t = jnp.tanh(h_g[:, None, 0:H] + ua_keys)                       # (B,S,H)
        scores = jnp.sum(t * va, axis=-1, keepdims=True)                # (B,S,1)
        m = jnp.max(scores, axis=1, keepdims=True)
        e = jnp.exp(scores - m)
        weights = e * pl.reciprocal(jnp.sum(e, axis=1, keepdims=True),
                                    approx=True)                        # (B,S,1)

        # -- weighted key sum directly in gate space: VPU mul + sublane reduce --
        ctx_g = jnp.sum(weights * ctx_kproj, axis=1)                    # (B,3H)

        # -- input-gate terms: one (B,V)@(V,3H) matmul (embedding+biases folded) --
        in_g = jnp.dot(onehot, w_emb, preferred_element_type=f32) + ctx_g   # (B,3H)

        # -- GRU cell (PyTorch gate order r, z, n) --
        r = jax.nn.sigmoid(in_g[:, 0:H] + h_g[:, H:2 * H])
        z = jax.nn.sigmoid(in_g[:, H:2 * H] + h_g[:, 2 * H:3 * H])
        n = jnp.tanh(in_g[:, 2 * H:3 * H] + r * h_g[:, 3 * H:4 * H])
        h = (1.0 - z) * n + z * h                                       # (B,H)

        # -- output projection + log_softmax --
        logits = jnp.dot(h, out_w, preferred_element_type=f32) + out_b  # (B,V)
        lmax = jnp.max(logits, axis=-1, keepdims=True)
        lse = jnp.log(jnp.sum(jnp.exp(logits - lmax), axis=-1,
                              keepdims=True)) + lmax
        logp_steps.append(logits - lse)
        attn_steps.append(weights.reshape(B, S))

        # -- greedy feedback: argmax(logits) -> next one-hot (ties -> lowest idx) --
        cand = jnp.where(logits == lmax, iota_v, V)
        top_idx = jnp.min(cand, axis=-1, keepdims=True)                 # (B,1)
        onehot = (iota_v == top_idx).astype(f32)

    # ---- single lane-dense store: [logp T*V | attn T*S | h_final | pad] ----
    pieces = logp_steps + attn_steps + [h]
    pad = out_ref.shape[1] - (MAX_LENGTH * (V + S) + H)
    if pad:
        pieces.append(jnp.zeros((B, pad), f32))
    out_ref[...] = jnp.concatenate(pieces, axis=-1).astype(out_ref.dtype)


def prepare_params(params):
    """One-time parameter packing (call at parameter-load time, not per forward)."""
    H = params["wa_w"].shape[0]
    V = params["emb"].shape[0]
    w_ih, w_hh = params["w_ih"], params["w_hh"]          # (2H,3H), (H,3H)
    b_ih, b_hh = params["b_ih"][0], params["b_hh"][0]    # (3H,)

    g = lambda w, i: w[:, i * H:(i + 1) * H]
    # hidden slab: [Wa | W_hr | W_hz | W_hn]                           (H, 4H)
    w_h = jnp.concatenate([params["wa_w"], g(w_hh, 0), g(w_hh, 1), g(w_hh, 2)], axis=1)
    # key-projection slab: [Ua | W_cr | W_cz | W_cn]                   (H, 4H)
    w_kp = jnp.concatenate([params["ua_w"], g(w_ih[H:], 0), g(w_ih[H:], 1),
                            g(w_ih[H:], 2)], axis=1)
    # one-hot slab: emb @ [W_ir|W_iz|W_in] with (b_ir+b_hr), (b_iz+b_hz), b_in
    # folded into the rows — exact because the GRU input row is always one-hot.
    fold_b = jnp.concatenate([b_ih[0:H] + b_hh[0:H],
                              b_ih[H:2 * H] + b_hh[H:2 * H],
                              b_ih[2 * H:3 * H]])[None, :]             # (1, 3H)
    w_emb = params["emb"] @ w_ih[:H, :] + fold_b                       # (V, 3H)

    top = jnp.concatenate([w_h, w_kp, params["out_w"]], axis=1)        # (H, 8H+V)
    bot = jnp.pad(w_emb, ((0, 0), (0, top.shape[1] - 3 * H)))          # (V, 8H+V)
    w_slab = jnp.concatenate([top, bot], axis=0)                       # (H+V, 8H+V)

    zH = jnp.zeros((H,), jnp.float32)
    b_slab = jnp.stack([
        jnp.concatenate([params["wa_b"][0], zH, zH, b_hh[2 * H:3 * H]]),
        jnp.concatenate([params["ua_b"][0], zH, zH, zH]),
        jnp.concatenate([params["va_w"][0], zH, zH, zH]),
        jnp.concatenate([params["out_b"][0], jnp.zeros((4 * H - V,), jnp.float32)]),
    ])                                                                 # (4, 4H)
    # params["va_b"] is intentionally unused: a constant score shift cancels
    # exactly under softmax, so attention weights/outputs are unchanged.
    return w_slab, b_slab


@jax.jit
def attn_decoder_forward(encoder_outputs, encoder_hidden, w_slab, b_slab):
    B, S, H = encoder_outputs.shape
    V = w_slab.shape[0] - H
    used = MAX_LENGTH * (V + S) + H
    out_lanes = pl.cdiv(used, 128) * 128                    # lane-dense output slab

    vmem = pl.BlockSpec(memory_space=pltpu.MemorySpace.VMEM)
    packed = pl.pallas_call(
        attn_decoder_kernel,
        out_shape=jax.ShapeDtypeStruct((B, out_lanes), jnp.float32),
        in_specs=[vmem, vmem, vmem, vmem],
        out_specs=vmem,
    )(encoder_outputs, encoder_hidden, w_slab, b_slab)

    tv, ts = MAX_LENGTH * V, MAX_LENGTH * S
    dec_out = packed[:, :tv].reshape(B, MAX_LENGTH, V)       # log-probs
    attn = packed[:, tv:tv + ts].reshape(B, MAX_LENGTH, S)   # attention weights
    dec_hid = packed[:, tv + ts:tv + ts + H].reshape(1, B, H)
    return dec_out, dec_hid, attn


if __name__ == "__main__":
    B, S, H, V = 2, MAX_LENGTH, 32, 16   # batch, enc seq len, hidden, vocab
    key = jax.random.PRNGKey(0)
    ks = jax.random.split(key, 16)

    def init(k, shape, scale=0.1):
        return jax.random.normal(k, shape, jnp.float32) * scale

    params = {
        "emb":   init(ks[0], (V, H)),
        # BahdanauAttention (weights stored as (in, out))
        "wa_w":  init(ks[1], (H, H)),  "wa_b": init(ks[2], (1, H)),
        "ua_w":  init(ks[3], (H, H)),  "ua_b": init(ks[4], (1, H)),
        "va_w":  init(ks[5], (1, H)),  "va_b": init(ks[6], (1, 1)),  # va_b: softmax no-op
        # GRU (input size 2H, hidden H); gate order r, z, n
        "w_ih":  init(ks[7], (2 * H, 3 * H)),
        "w_hh":  init(ks[8], (H, 3 * H)),
        "b_ih":  init(ks[9], (1, 3 * H)),
        "b_hh":  init(ks[10], (1, 3 * H)),
        # output projection
        "out_w": init(ks[11], (H, V)), "out_b": init(ks[12], (1, V)),
    }
    encoder_outputs = init(ks[13], (B, S, H), 1.0)
    encoder_hidden = init(ks[14], (1, B, H), 1.0)

    # one-time parameter packing, kept out of the per-call path
    w_slab, b_slab = prepare_params(params)

    dec_out, dec_hid, attn = attn_decoder_forward(
        encoder_outputs, encoder_hidden, w_slab, b_slab)
    jax.block_until_ready((dec_out, dec_hid, attn))

    assert dec_out.shape == (B, MAX_LENGTH, V)
    assert dec_hid.shape == (1, B, H)
    assert attn.shape == (B, MAX_LENGTH, S)
    # log_softmax rows must (approximately) sum to 1 in prob space
    assert bool(jnp.all(jnp.abs(jnp.sum(jnp.exp(dec_out), axis=-1) - 1.0) < 1e-4))
    # attention rows sum to ~1 (approx-reciprocal softmax)
    assert bool(jnp.all(jnp.abs(jnp.sum(attn, axis=-1) - 1.0) < 1e-2))
    print("KERNEL_OK")
</pallas_src>

<mosaic_0001>
module attributes {stable_mosaic.version = 11 : i64} {
  func.func @attn_decoder_kernel(%arg0: memref<2x8x32xf32, #tpu.memory_space<vmem>>, %arg1: memref<1x2x32xf32, #tpu.memory_space<vmem>>, %arg2: memref<48x272xf32, #tpu.memory_space<vmem>>, %arg3: memref<4x128xf32, #tpu.memory_space<vmem>>, %arg4: memref<2x256xf32, #tpu.memory_space<vmem>>) attributes {dimension_semantics = [], scalar_prefetch = 0 : i64, scratch_operands = 0 : i64, tpu.core_type = #tpu.core_type<tc>} {
    %c0 = arith.constant 0 : index
    %c0_0 = arith.constant 0 : index
    %c0_1 = arith.constant 0 : index
    %0 = vector.load %arg0[%c0, %c0_0, %c0_1] : memref<2x8x32xf32, #tpu.memory_space<vmem>>, vector<2x8x32xf32>
    %c0_2 = arith.constant 0 : index
    %c0_3 = arith.constant 0 : index
    %c0_4 = arith.constant 0 : index
    %1 = vector.load %arg1[%c0_2, %c0_3, %c0_4] : memref<1x2x32xf32, #tpu.memory_space<vmem>>, vector<1x2x32xf32>
    %2 = vector.shape_cast %1 : vector<1x2x32xf32> to vector<2x32xf32>
    %c0_5 = arith.constant 0 : index
    %c0_6 = arith.constant 0 : index
    %3 = vector.load %arg2[%c0_5, %c0_6] : memref<48x272xf32, #tpu.memory_space<vmem>>, vector<32x128xf32>
    %c0_7 = arith.constant 0 : index
    %c128 = arith.constant 128 : index
    %4 = vector.load %arg2[%c0_7, %c128] : memref<48x272xf32, #tpu.memory_space<vmem>>, vector<32x128xf32>
    %c0_8 = arith.constant 0 : index
    %c256 = arith.constant 256 : index
    %5 = vector.load %arg2[%c0_8, %c256] : memref<48x272xf32, #tpu.memory_space<vmem>>, vector<32x16xf32>
    %c32 = arith.constant 32 : index
    %c0_9 = arith.constant 0 : index
    %6 = vector.load %arg2[%c32, %c0_9] : memref<48x272xf32, #tpu.memory_space<vmem>>, vector<16x96xf32>
    %c0_10 = arith.constant 0 : index
    %c0_11 = arith.constant 0 : index
    %7 = vector.load %arg3[%c0_10, %c0_11] : memref<4x128xf32, #tpu.memory_space<vmem>>, vector<1x128xf32>
    %8 = vector.shape_cast %7 : vector<1x128xf32> to vector<1x128xf32>
    %9 = vector.broadcast %8 : vector<1x128xf32> to vector<2x128xf32>
    %c1 = arith.constant 1 : index
    %c0_12 = arith.constant 0 : index
    %10 = vector.load %arg3[%c1, %c0_12] : memref<4x128xf32, #tpu.memory_space<vmem>>, vector<1x128xf32>
    %c2 = arith.constant 2 : index
    %c0_13 = arith.constant 0 : index
    %11 = vector.load %arg3[%c2, %c0_13] : memref<4x128xf32, #tpu.memory_space<vmem>>, vector<1x32xf32>
    %12 = vector.shape_cast %11 : vector<1x32xf32> to vector<1x1x32xf32>
    %13 = vector.shape_cast %12 : vector<1x1x32xf32> to vector<1x1x32xf32>
    %14 = vector.broadcast %13 : vector<1x1x32xf32> to vector<2x8x32xf32>
    %c3 = arith.constant 3 : index
    %c0_14 = arith.constant 0 : index
    %15 = vector.load %arg3[%c3, %c0_14] : memref<4x128xf32, #tpu.memory_space<vmem>>, vector<1x16xf32>
    %16 = vector.shape_cast %15 : vector<1x16xf32> to vector<1x16xf32>
    %17 = vector.broadcast %16 : vector<1x16xf32> to vector<2x16xf32>
    %18 = vector.shape_cast %0 : vector<2x8x32xf32> to vector<16x32xf32>
    %cst = arith.constant dense<0.000000e+00> : vector<16x128xf32>
    %19 = tpu.matmul %18, %4, %cst {dimension_numbers = #tpu.dot_dimension_numbers<[1], [0], [0], [1], [0, 0, 1, 1], [], []>} : vector<16x32xf32>, vector<32x128xf32>, vector<16x128xf32> -> vector<16x128xf32>
    %20 = vector.broadcast %10 : vector<1x128xf32> to vector<16x128xf32>
    %21 = arith.addf %19, %20 : vector<16x128xf32>
    %22 = vector.shape_cast %21 : vector<16x128xf32> to vector<2x8x128xf32>
    %23 = vector.extract_strided_slice %22 {offsets = [0, 0, 0], sizes = [2, 8, 32], strides = [1, 1, 1]} : vector<2x8x128xf32> to vector<2x8x32xf32>
    %24 = vector.extract_strided_slice %22 {offsets = [0, 0, 32], sizes = [2, 8, 96], strides = [1, 1, 1]} : vector<2x8x128xf32> to vector<2x8x96xf32>
    %25 = tpu.iota {dimensions = array<i32: 1>} : vector<2x16xi32>
    %c0_i32 = arith.constant 0 : i32
    %26 = vector.broadcast %c0_i32 : i32 to vector<2x16xi32>
    %27 = arith.cmpi eq, %25, %26 : vector<2x16xi32>
    %28 = arith.extui %27 : vector<2x16xi1> to vector<2x16xi32>
    %29 = arith.sitofp %28 : vector<2x16xi32> to vector<2x16xf32>
    %cst_15 = arith.constant dense<0.000000e+00> : vector<2x128xf32>
    %30 = tpu.matmul %2, %3, %cst_15 {dimension_numbers = #tpu.dot_dimension_numbers<[1], [0], [0], [1], [0, 0, 1, 1], [], []>} : vector<2x32xf32>, vector<32x128xf32>, vector<2x128xf32> -> vector<2x128xf32>
    %31 = arith.addf %30, %9 : vector<2x128xf32>
    %32 = vector.extract_strided_slice %31 {offsets = [0, 0], sizes = [2, 32], strides = [1, 1]} : vector<2x128xf32> to vector<2x32xf32>
    %33 = vector.shape_cast %32 : vector<2x32xf32> to vector<2x1x32xf32>
    %34 = vector.broadcast %33 : vector<2x1x32xf32> to vector<2x8x32xf32>
    %35 = arith.addf %34, %23 : vector<2x8x32xf32>
    %36 = math.tanh %35 : vector<2x8x32xf32>
    %37 = arith.mulf %36, %14 : vector<2x8x32xf32>
    %cst_16 = arith.constant dense<0.000000e+00> : vector<2x8xf32>
    %38 = vector.multi_reduction <add>, %37, %cst_16 [2] : vector<2x8x32xf32> to vector<2x8xf32>
    %39 = vector.shape_cast %38 : vector<2x8xf32> to vector<2x8x1xf32>
    %cst_17 = arith.constant dense<0xFF800000> : vector<2x1xf32>
    %40 = vector.multi_reduction <maximumf>, %39, %cst_17 [1] : vector<2x8x1xf32> to vector<2x1xf32>
    %41 = vector.shape_cast %40 : vector<2x1xf32> to vector<2x1x1xf32>
    %42 = vector.broadcast %41 : vector<2x1x1xf32> to vector<2x8x1xf32>
    %43 = arith.subf %39, %42 : vector<2x8x1xf32>
    %44 = math.exp %43 : vector<2x8x1xf32>
    %cst_18 = arith.constant dense<0.000000e+00> : vector<2x1xf32>
    %45 = vector.multi_reduction <add>, %44, %cst_18 [1] : vector<2x8x1xf32> to vector<2x1xf32>
    %46 = vector.shape_cast %45 : vector<2x1xf32> to vector<2x1x1xf32>
    %47 = tpu.reciprocal %46 {approx = true} : vector<2x1x1xf32> -> vector<2x1x1xf32>
    %48 = vector.broadcast %47 : vector<2x1x1xf32> to vector<2x8x1xf32>
    %49 = arith.mulf %44, %48 : vector<2x8x1xf32>
    %50 = vector.broadcast %49 : vector<2x8x1xf32> to vector<2x8x96xf32>
    %51 = arith.mulf %50, %24 : vector<2x8x96xf32>
    %cst_19 = arith.constant dense<0.000000e+00> : vector<2x96xf32>
    %52 = vector.multi_reduction <add>, %51, %cst_19 [1] : vector<2x8x96xf32> to vector<2x96xf32>
    %cst_20 = arith.constant dense<0.000000e+00> : vector<2x96xf32>
    %53 = tpu.matmul %29, %6, %cst_20 {dimension_numbers = #tpu.dot_dimension_numbers<[1], [0], [0], [1], [0, 0, 1, 1], [], []>} : vector<2x16xf32>, vector<16x96xf32>, vector<2x96xf32> -> vector<2x96xf32>
    %54 = arith.addf %53, %52 : vector<2x96xf32>
    %55 = vector.extract_strided_slice %54 {offsets = [0, 0], sizes = [2, 32], strides = [1, 1]} : vector<2x96xf32> to vector<2x32xf32>
    %56 = vector.extract_strided_slice %31 {offsets = [0, 32], sizes = [2, 32], strides = [1, 1]} : vector<2x128xf32> to vector<2x32xf32>
    %57 = arith.addf %55, %56 : vector<2x32xf32>
    %58 = arith.negf %57 : vector<2x32xf32>
    %59 = math.exp %58 : vector<2x32xf32>
    %cst_21 = arith.constant 1.000000e+00 : f32
    %60 = vector.broadcast %cst_21 : f32 to vector<2x32xf32>
    %61 = arith.addf %60, %59 : vector<2x32xf32>
    %62 = arith.divf %60, %61 : vector<2x32xf32>
    %63 = vector.extract_strided_slice %54 {offsets = [0, 32], sizes = [2, 32], strides = [1, 1]} : vector<2x96xf32> to vector<2x32xf32>
    %64 = vector.extract_strided_slice %31 {offsets = [0, 64], sizes = [2, 32], strides = [1, 1]} : vector<2x128xf32> to vector<2x32xf32>
    %65 = arith.addf %63, %64 : vector<2x32xf32>
    %66 = arith.negf %65 : vector<2x32xf32>
    %67 = math.exp %66 : vector<2x32xf32>
    %cst_22 = arith.constant 1.000000e+00 : f32
    %68 = vector.broadcast %cst_22 : f32 to vector<2x32xf32>
    %69 = arith.addf %68, %67 : vector<2x32xf32>
    %70 = arith.divf %68, %69 : vector<2x32xf32>
    %71 = vector.extract_strided_slice %54 {offsets = [0, 64], sizes = [2, 32], strides = [1, 1]} : vector<2x96xf32> to vector<2x32xf32>
    %72 = vector.extract_strided_slice %31 {offsets = [0, 96], sizes = [2, 32], strides = [1, 1]} : vector<2x128xf32> to vector<2x32xf32>
    %73 = arith.mulf %62, %72 : vector<2x32xf32>
    %74 = arith.addf %71, %73 : vector<2x32xf32>
    %75 = math.tanh %74 : vector<2x32xf32>
    %cst_23 = arith.constant 1.000000e+00 : f32
    %76 = vector.broadcast %cst_23 : f32 to vector<2x32xf32>
    %77 = arith.subf %76, %70 : vector<2x32xf32>
    %78 = arith.mulf %77, %75 : vector<2x32xf32>
    %79 = arith.mulf %70, %2 : vector<2x32xf32>
    %80 = arith.addf %78, %79 : vector<2x32xf32>
    %cst_24 = arith.constant dense<0.000000e+00> : vector<2x16xf32>
    %81 = tpu.matmul %80, %5, %cst_24 {dimension_numbers = #tpu.dot_dimension_numbers<[1], [0], [0], [1], [0, 0, 1, 1], [], []>} : vector<2x32xf32>, vector<32x16xf32>, vector<2x16xf32> -> vector<2x16xf32>
    %82 = arith.addf %81, %17 : vector<2x16xf32>
    %cst_25 = arith.constant dense<0xFF800000> : vector<2xf32>
    %83 = vector.multi_reduction <maximumf>, %82, %cst_25 [1] : vector<2x16xf32> to vector<2xf32>
    %84 = vector.shape_cast %83 : vector<2xf32> to vector<2x1xf32>
    %85 = vector.broadcast %84 : vector<2x1xf32> to vector<2x16xf32>
    %86 = arith.subf %82, %85 : vector<2x16xf32>
    %87 = math.exp %86 : vector<2x16xf32>
    %cst_26 = arith.constant dense<0.000000e+00> : vector<2xf32>
    %88 = vector.multi_reduction <add>, %87, %cst_26 [1] : vector<2x16xf32> to vector<2xf32>
    %89 = vector.shape_cast %88 : vector<2xf32> to vector<2x1xf32>
    %90 = math.log %89 : vector<2x1xf32>
    %91 = arith.addf %90, %84 : vector<2x1xf32>
    %92 = vector.broadcast %91 : vector<2x1xf32> to vector<2x16xf32>
    %93 = arith.subf %82, %92 : vector<2x16xf32>
    %94 = vector.shape_cast %49 : vector<2x8x1xf32> to vector<2x8xf32>
    %95 = vector.broadcast %84 : vector<2x1xf32> to vector<2x16xf32>
    %96 = arith.cmpf oeq, %82, %95 : vector<2x16xf32>
    %c16_i32 = arith.constant 16 : i32
    %97 = vector.broadcast %c16_i32 : i32 to vector<2x16xi32>
    %98 = arith.select %96, %25, %97 : vector<2x16xi1>, vector<2x16xi32>
    %cst_27 = arith.constant dense<2147483647> : vector<2xi32>
    %99 = vector.multi_reduction <minsi>, %98, %cst_27 [1] : vector<2x16xi32> to vector<2xi32>
    %100 = vector.shape_cast %99 : vector<2xi32> to vector<2x1xi32>
    %101 = vector.broadcast %100 : vector<2x1xi32> to vector<2x16xi32>
    %102 = arith.cmpi eq, %25, %101 : vector<2x16xi32>
    %103 = arith.extui %102 : vector<2x16xi1> to vector<2x16xi32>
    %104 = arith.sitofp %103 : vector<2x16xi32> to vector<2x16xf32>
    %cst_28 = arith.constant dense<0.000000e+00> : vector<2x128xf32>
    %105 = tpu.matmul %80, %3, %cst_28 {dimension_numbers = #tpu.dot_dimension_numbers<[1], [0], [0], [1], [0, 0, 1, 1], [], []>} : vector<2x32xf32>, vector<32x128xf32>, vector<2x128xf32> -> vector<2x128xf32>
    %106 = arith.addf %105, %9 : vector<2x128xf32>
    %107 = vector.extract_strided_slice %106 {offsets = [0, 0], sizes = [2, 32], strides = [1, 1]} : vector<2x128xf32> to vector<2x32xf32>
    %108 = vector.shape_cast %107 : vector<2x32xf32> to vector<2x1x32xf32>
    %109 = vector.broadcast %108 : vector<2x1x32xf32> to vector<2x8x32xf32>
    %110 = arith.addf %109, %23 : vector<2x8x32xf32>
    %111 = math.tanh %110 : vector<2x8x32xf32>
    %112 = arith.mulf %111, %14 : vector<2x8x32xf32>
    %cst_29 = arith.constant dense<0.000000e+00> : vector<2x8xf32>
    %113 = vector.multi_reduction <add>, %112, %cst_29 [2] : vector<2x8x32xf32> to vector<2x8xf32>
    %114 = vector.shape_cast %113 : vector<2x8xf32> to vector<2x8x1xf32>
    %cst_30 = arith.constant dense<0xFF800000> : vector<2x1xf32>
    %115 = vector.multi_reduction <maximumf>, %114, %cst_30 [1] : vector<2x8x1xf32> to vector<2x1xf32>
    %116 = vector.shape_cast %115 : vector<2x1xf32> to vector<2x1x1xf32>
    %117 = vector.broadcast %116 : vector<2x1x1xf32> to vector<2x8x1xf32>
    %118 = arith.subf %114, %117 : vector<2x8x1xf32>
    %119 = math.exp %118 : vector<2x8x1xf32>
    %cst_31 = arith.constant dense<0.000000e+00> : vector<2x1xf32>
    %120 = vector.multi_reduction <add>, %119, %cst_31 [1] : vector<2x8x1xf32> to vector<2x1xf32>
    %121 = vector.shape_cast %120 : vector<2x1xf32> to vector<2x1x1xf32>
    %122 = tpu.reciprocal %121 {approx = true} : vector<2x1x1xf32> -> vector<2x1x1xf32>
    %123 = vector.broadcast %122 : vector<2x1x1xf32> to vector<2x8x1xf32>
    %124 = arith.mulf %119, %123 : vector<2x8x1xf32>
    %125 = vector.broadcast %124 : vector<2x8x1xf32> to vector<2x8x96xf32>
    %126 = arith.mulf %125, %24 : vector<2x8x96xf32>
    %cst_32 = arith.constant dense<0.000000e+00> : vector<2x96xf32>
    %127 = vector.multi_reduction <add>, %126, %cst_32 [1] : vector<2x8x96xf32> to vector<2x96xf32>
    %cst_33 = arith.constant dense<0.000000e+00> : vector<2x96xf32>
    %128 = tpu.matmul %104, %6, %cst_33 {dimension_numbers = #tpu.dot_dimension_numbers<[1], [0], [0], [1], [0, 0, 1, 1], [], []>} : vector<2x16xf32>, vector<16x96xf32>, vector<2x96xf32> -> vector<2x96xf32>
    %129 = arith.addf %128, %127 : vector<2x96xf32>
    %130 = vector.extract_strided_slice %129 {offsets = [0, 0], sizes = [2, 32], strides = [1, 1]} : vector<2x96xf32> to vector<2x32xf32>
    %131 = vector.extract_strided_slice %106 {offsets = [0, 32], sizes = [2, 32], strides = [1, 1]} : vector<2x128xf32> to vector<2x32xf32>
    %132 = arith.addf %130, %131 : vector<2x32xf32>
    %133 = arith.negf %132 : vector<2x32xf32>
    %134 = math.exp %133 : vector<2x32xf32>
    %cst_34 = arith.constant 1.000000e+00 : f32
    %135 = vector.broadcast %cst_34 : f32 to vector<2x32xf32>
    %136 = arith.addf %135, %134 : vector<2x32xf32>
    %137 = arith.divf %135, %136 : vector<2x32xf32>
    %138 = vector.extract_strided_slice %129 {offsets = [0, 32], sizes = [2, 32], strides = [1, 1]} : vector<2x96xf32> to vector<2x32xf32>
    %139 = vector.extract_strided_slice %106 {offsets = [0, 64], sizes = [2, 32], strides = [1, 1]} : vector<2x128xf32> to vector<2x32xf32>
    %140 = arith.addf %138, %139 : vector<2x32xf32>
    %141 = arith.negf %140 : vector<2x32xf32>
    %142 = math.exp %141 : vector<2x32xf32>
    %cst_35 = arith.constant 1.000000e+00 : f32
    %143 = vector.broadcast %cst_35 : f32 to vector<2x32xf32>
    %144 = arith.addf %143, %142 : vector<2x32xf32>
    %145 = arith.divf %143, %144 : vector<2x32xf32>
    %146 = vector.extract_strided_slice %129 {offsets = [0, 64], sizes = [2, 32], strides = [1, 1]} : vector<2x96xf32> to vector<2x32xf32>
    %147 = vector.extract_strided_slice %106 {offsets = [0, 96], sizes = [2, 32], strides = [1, 1]} : vector<2x128xf32> to vector<2x32xf32>
    %148 = arith.mulf %137, %147 : vector<2x32xf32>
    %149 = arith.addf %146, %148 : vector<2x32xf32>
    %150 = math.tanh %149 : vector<2x32xf32>
    %cst_36 = arith.constant 1.000000e+00 : f32
    %151 = vector.broadcast %cst_36 : f32 to vector<2x32xf32>
    %152 = arith.subf %151, %145 : vector<2x32xf32>
    %153 = arith.mulf %152, %150 : vector<2x32xf32>
    %154 = arith.mulf %145, %80 : vector<2x32xf32>
    %155 = arith.addf %153, %154 : vector<2x32xf32>
    %cst_37 = arith.constant dense<0.000000e+00> : vector<2x16xf32>
    %156 = tpu.matmul %155, %5, %cst_37 {dimension_numbers = #tpu.dot_dimension_numbers<[1], [0], [0], [1], [0, 0, 1, 1], [], []>} : vector<2x32xf32>, vector<32x16xf32>, vector<2x16xf32> -> vector<2x16xf32>
    %157 = arith.addf %156, %17 : vector<2x16xf32>
    %cst_38 = arith.constant dense<0xFF800000> : vector<2xf32>
    %158 = vector.multi_reduction <maximumf>, %157, %cst_38 [1] : vector<2x16xf32> to vector<2xf32>
    %159 = vector.shape_cast %158 : vector<2xf32> to vector<2x1xf32>
    %160 = vector.broadcast %159 : vector<2x1xf32> to vector<2x16xf32>
    %161 = arith.subf %157, %160 : vector<2x16xf32>
    %162 = math.exp %161 : vector<2x16xf32>
    %cst_39 = arith.constant dense<0.000000e+00> : vector<2xf32>
    %163 = vector.multi_reduction <add>, %162, %cst_39 [1] : vector<2x16xf32> to vector<2xf32>
    %164 = vector.shape_cast %163 : vector<2xf32> to vector<2x1xf32>
    %165 = math.log %164 : vector<2x1xf32>
    %166 = arith.addf %165, %159 : vector<2x1xf32>
    %167 = vector.broadcast %166 : vector<2x1xf32> to vector<2x16xf32>
    %168 = arith.subf %157, %167 : vector<2x16xf32>
    %169 = vector.shape_cast %124 : vector<2x8x1xf32> to vector<2x8xf32>
    %170 = vector.broadcast %159 : vector<2x1xf32> to vector<2x16xf32>
    %171 = arith.cmpf oeq, %157, %170 : vector<2x16xf32>
    %c16_i32_40 = arith.constant 16 : i32
    %172 = vector.broadcast %c16_i32_40 : i32 to vector<2x16xi32>
    %173 = arith.select %171, %25, %172 : vector<2x16xi1>, vector<2x16xi32>
    %cst_41 = arith.constant dense<2147483647> : vector<2xi32>
    %174 = vector.multi_reduction <minsi>, %173, %cst_41 [1] : vector<2x16xi32> to vector<2xi32>
    %175 = vector.shape_cast %174 : vector<2xi32> to vector<2x1xi32>
    %176 = vector.broadcast %175 : vector<2x1xi32> to vector<2x16xi32>
    %177 = arith.cmpi eq, %25, %176 : vector<2x16xi32>
    %178 = arith.extui %177 : vector<2x16xi1> to vector<2x16xi32>
    %179 = arith.sitofp %178 : vector<2x16xi32> to vector<2x16xf32>
    %cst_42 = arith.constant dense<0.000000e+00> : vector<2x128xf32>
    %180 = tpu.matmul %155, %3, %cst_42 {dimension_numbers = #tpu.dot_dimension_numbers<[1], [0], [0], [1], [0, 0, 1, 1], [], []>} : vector<2x32xf32>, vector<32x128xf32>, vector<2x128xf32> -> vector<2x128xf32>
    %181 = arith.addf %180, %9 : vector<2x128xf32>
    %182 = vector.extract_strided_slice %181 {offsets = [0, 0], sizes = [2, 32], strides = [1, 1]} : vector<2x128xf32> to vector<2x32xf32>
    %183 = vector.shape_cast %182 : vector<2x32xf32> to vector<2x1x32xf32>
    %184 = vector.broadcast %183 : vector<2x1x32xf32> to vector<2x8x32xf32>
    %185 = arith.addf %184, %23 : vector<2x8x32xf32>
    %186 = math.tanh %185 : vector<2x8x32xf32>
    %187 = arith.mulf %186, %14 : vector<2x8x32xf32>
    %cst_43 = arith.constant dense<0.000000e+00> : vector<2x8xf32>
    %188 = vector.multi_reduction <add>, %187, %cst_43 [2] : vector<2x8x32xf32> to vector<2x8xf32>
    %189 = vector.shape_cast %188 : vector<2x8xf32> to vector<2x8x1xf32>
    %cst_44 = arith.constant dense<0xFF800000> : vector<2x1xf32>
    %190 = vector.multi_reduction <maximumf>, %189, %cst_44 [1] : vector<2x8x1xf32> to vector<2x1xf32>
    %191 = vector.shape_cast %190 : vector<2x1xf32> to vector<2x1x1xf32>
    %192 = vector.broadcast %191 : vector<2x1x1xf32> to vector<2x8x1xf32>
    %193 = arith.subf %189, %192 : vector<2x8x1xf32>
    %194 = math.exp %193 : vector<2x8x1xf32>
    %cst_45 = arith.constant dense<0.000000e+00> : vector<2x1xf32>
    %195 = vector.multi_reduction <add>, %194, %cst_45 [1] : vector<2x8x1xf32> to vector<2x1xf32>
    %196 = vector.shape_cast %195 : vector<2x1xf32> to vector<2x1x1xf32>
    %197 = tpu.reciprocal %196 {approx = true} : vector<2x1x1xf32> -> vector<2x1x1xf32>
    %198 = vector.broadcast %197 : vector<2x1x1xf32> to vector<2x8x1xf32>
    %199 = arith.mulf %194, %198 : vector<2x8x1xf32>
    %200 = vector.broadcast %199 : vector<2x8x1xf32> to vector<2x8x96xf32>
    %201 = arith.mulf %200, %24 : vector<2x8x96xf32>
    %cst_46 = arith.constant dense<0.000000e+00> : vector<2x96xf32>
    %202 = vector.multi_reduction <add>, %201, %cst_46 [1] : vector<2x8x96xf32> to vector<2x96xf32>
    %cst_47 = arith.constant dense<0.000000e+00> : vector<2x96xf32>
    %203 = tpu.matmul %179, %6, %cst_47 {dimension_numbers = #tpu.dot_dimension_numbers<[1], [0], [0], [1], [0, 0, 1, 1], [], []>} : vector<2x16xf32>, vector<16x96xf32>, vector<2x96xf32> -> vector<2x96xf32>
    %204 = arith.addf %203, %202 : vector<2x96xf32>
    %205 = vector.extract_strided_slice %204 {offsets = [0, 0], sizes = [2, 32], strides = [1, 1]} : vector<2x96xf32> to vector<2x32xf32>
    %206 = vector.extract_strided_slice %181 {offsets = [0, 32], sizes = [2, 32], strides = [1, 1]} : vector<2x128xf32> to vector<2x32xf32>
    %207 = arith.addf %205, %206 : vector<2x32xf32>
    %208 = arith.negf %207 : vector<2x32xf32>
    %209 = math.exp %208 : vector<2x32xf32>
    %cst_48 = arith.constant 1.000000e+00 : f32
    %210 = vector.broadcast %cst_48 : f32 to vector<2x32xf32>
    %211 = arith.addf %210, %209 : vector<2x32xf32>
    %212 = arith.divf %210, %211 : vector<2x32xf32>
    %213 = vector.extract_strided_slice %204 {offsets = [0, 32], sizes = [2, 32], strides = [1, 1]} : vector<2x96xf32> to vector<2x32xf32>
    %214 = vector.extract_strided_slice %181 {offsets = [0, 64], sizes = [2, 32], strides = [1, 1]} : vector<2x128xf32> to vector<2x32xf32>
    %215 = arith.addf %213, %214 : vector<2x32xf32>
    %216 = arith.negf %215 : vector<2x32xf32>
    %217 = math.exp %216 : vector<2x32xf32>
    %cst_49 = arith.constant 1.000000e+00 : f32
    %218 = vector.broadcast %cst_49 : f32 to vector<2x32xf32>
    %219 = arith.addf %218, %217 : vector<2x32xf32>
    %220 = arith.divf %218, %219 : vector<2x32xf32>
    %221 = vector.extract_strided_slice %204 {offsets = [0, 64], sizes = [2, 32], strides = [1, 1]} : vector<2x96xf32> to vector<2x32xf32>
    %222 = vector.extract_strided_slice %181 {offsets = [0, 96], sizes = [2, 32], strides = [1, 1]} : vector<2x128xf32> to vector<2x32xf32>
    %223 = arith.mulf %212, %222 : vector<2x32xf32>
    %224 = arith.addf %221, %223 : vector<2x32xf32>
    %225 = math.tanh %224 : vector<2x32xf32>
    %cst_50 = arith.constant 1.000000e+00 : f32
    %226 = vector.broadcast %cst_50 : f32 to vector<2x32xf32>
    %227 = arith.subf %226, %220 : vector<2x32xf32>
    %228 = arith.mulf %227, %225 : vector<2x32xf32>
    %229 = arith.mulf %220, %155 : vector<2x32xf32>
    %230 = arith.addf %228, %229 : vector<2x32xf32>
    %cst_51 = arith.constant dense<0.000000e+00> : vector<2x16xf32>
    %231 = tpu.matmul %230, %5, %cst_51 {dimension_numbers = #tpu.dot_dimension_numbers<[1], [0], [0], [1], [0, 0, 1, 1], [], []>} : vector<2x32xf32>, vector<32x16xf32>, vector<2x16xf32> -> vector<2x16xf32>
    %232 = arith.addf %231, %17 : vector<2x16xf32>
    %cst_52 = arith.constant dense<0xFF800000> : vector<2xf32>
    %233 = vector.multi_reduction <maximumf>, %232, %cst_52 [1] : vector<2x16xf32> to vector<2xf32>
    %234 = vector.shape_cast %233 : vector<2xf32> to vector<2x1xf32>
    %235 = vector.broadcast %234 : vector<2x1xf32> to vector<2x16xf32>
    %236 = arith.subf %232, %235 : vector<2x16xf32>
    %237 = math.exp %236 : vector<2x16xf32>
    %cst_53 = arith.constant dense<0.000000e+00> : vector<2xf32>
    %238 = vector.multi_reduction <add>, %237, %cst_53 [1] : vector<2x16xf32> to vector<2xf32>
    %239 = vector.shape_cast %238 : vector<2xf32> to vector<2x1xf32>
    %240 = math.log %239 : vector<2x1xf32>
    %241 = arith.addf %240, %234 : vector<2x1xf32>
    %242 = vector.broadcast %241 : vector<2x1xf32> to vector<2x16xf32>
    %243 = arith.subf %232, %242 : vector<2x16xf32>
    %244 = vector.shape_cast %199 : vector<2x8x1xf32> to vector<2x8xf32>
    %245 = vector.broadcast %234 : vector<2x1xf32> to vector<2x16xf32>
    %246 = arith.cmpf oeq, %232, %245 : vector<2x16xf32>
    %c16_i32_54 = arith.constant 16 : i32
    %247 = vector.broadcast %c16_i32_54 : i32 to vector<2x16xi32>
    %248 = arith.select %246, %25, %247 : vector<2x16xi1>, vector<2x16xi32>
    %cst_55 = arith.constant dense<2147483647> : vector<2xi32>
    %249 = vector.multi_reduction <minsi>, %248, %cst_55 [1] : vector<2x16xi32> to vector<2xi32>
    %250 = vector.shape_cast %249 : vector<2xi32> to vector<2x1xi32>
    %251 = vector.broadcast %250 : vector<2x1xi32> to vector<2x16xi32>
    %252 = arith.cmpi eq, %25, %251 : vector<2x16xi32>
    %253 = arith.extui %252 : vector<2x16xi1> to vector<2x16xi32>
    %254 = arith.sitofp %253 : vector<2x16xi32> to vector<2x16xf32>
    %cst_56 = arith.constant dense<0.000000e+00> : vector<2x128xf32>
    %255 = tpu.matmul %230, %3, %cst_56 {dimension_numbers = #tpu.dot_dimension_numbers<[1], [0], [0], [1], [0, 0, 1, 1], [], []>} : vector<2x32xf32>, vector<32x128xf32>, vector<2x128xf32> -> vector<2x128xf32>
    %256 = arith.addf %255, %9 : vector<2x128xf32>
    %257 = vector.extract_strided_slice %256 {offsets = [0, 0], sizes = [2, 32], strides = [1, 1]} : vector<2x128xf32> to vector<2x32xf32>
    %258 = vector.shape_cast %257 : vector<2x32xf32> to vector<2x1x32xf32>
    %259 = vector.broadcast %258 : vector<2x1x32xf32> to vector<2x8x32xf32>
    %260 = arith.addf %259, %23 : vector<2x8x32xf32>
    %261 = math.tanh %260 : vector<2x8x32xf32>
    %262 = arith.mulf %261, %14 : vector<2x8x32xf32>
    %cst_57 = arith.constant dense<0.000000e+00> : vector<2x8xf32>
    %263 = vector.multi_reduction <add>, %262, %cst_57 [2] : vector<2x8x32xf32> to vector<2x8xf32>
    %264 = vector.shape_cast %263 : vector<2x8xf32> to vector<2x8x1xf32>
    %cst_58 = arith.constant dense<0xFF800000> : vector<2x1xf32>
    %265 = vector.multi_reduction <maximumf>, %264, %cst_58 [1] : vector<2x8x1xf32> to vector<2x1xf32>
    %266 = vector.shape_cast %265 : vector<2x1xf32> to vector<2x1x1xf32>
    %267 = vector.broadcast %266 : vector<2x1x1xf32> to vector<2x8x1xf32>
    %268 = arith.subf %264, %267 : vector<2x8x1xf32>
    %269 = math.exp %268 : vector<2x8x1xf32>
    %cst_59 = arith.constant dense<0.000000e+00> : vector<2x1xf32>
    %270 = vector.multi_reduction <add>, %269, %cst_59 [1] : vector<2x8x1xf32> to vector<2x1xf32>
    %271 = vector.shape_cast %270 : vector<2x1xf32> to vector<2x1x1xf32>
    %272 = tpu.reciprocal %271 {approx = true} : vector<2x1x1xf32> -> vector<2x1x1xf32>
    %273 = vector.broadcast %272 : vector<2x1x1xf32> to vector<2x8x1xf32>
    %274 = arith.mulf %269, %273 : vector<2x8x1xf32>
    %275 = vector.broadcast %274 : vector<2x8x1xf32> to vector<2x8x96xf32>
    %276 = arith.mulf %275, %24 : vector<2x8x96xf32>
    %cst_60 = arith.constant dense<0.000000e+00> : vector<2x96xf32>
    %277 = vector.multi_reduction <add>, %276, %cst_60 [1] : vector<2x8x96xf32> to vector<2x96xf32>
    %cst_61 = arith.constant dense<0.000000e+00> : vector<2x96xf32>
    %278 = tpu.matmul %254, %6, %cst_61 {dimension_numbers = #tpu.dot_dimension_numbers<[1], [0], [0], [1], [0, 0, 1, 1], [], []>} : vector<2x16xf32>, vector<16x96xf32>, vector<2x96xf32> -> vector<2x96xf32>
    %279 = arith.addf %278, %277 : vector<2x96xf32>
    %280 = vector.extract_strided_slice %279 {offsets = [0, 0], sizes = [2, 32], strides = [1, 1]} : vector<2x96xf32> to vector<2x32xf32>
    %281 = vector.extract_strided_slice %256 {offsets = [0, 32], sizes = [2, 32], strides = [1, 1]} : vector<2x128xf32> to vector<2x32xf32>
    %282 = arith.addf %280, %281 : vector<2x32xf32>
    %283 = arith.negf %282 : vector<2x32xf32>
    %284 = math.exp %283 : vector<2x32xf32>
    %cst_62 = arith.constant 1.000000e+00 : f32
    %285 = vector.broadcast %cst_62 : f32 to vector<2x32xf32>
    %286 = arith.addf %285, %284 : vector<2x32xf32>
    %287 = arith.divf %285, %286 : vector<2x32xf32>
    %288 = vector.extract_strided_slice %279 {offsets = [0, 32], sizes = [2, 32], strides = [1, 1]} : vector<2x96xf32> to vector<2x32xf32>
    %289 = vector.extract_strided_slice %256 {offsets = [0, 64], sizes = [2, 32], strides = [1, 1]} : vector<2x128xf32> to vector<2x32xf32>
    %290 = arith.addf %288, %289 : vector<2x32xf32>
    %291 = arith.negf %290 : vector<2x32xf32>
    %292 = math.exp %291 : vector<2x32xf32>
    %cst_63 = arith.constant 1.000000e+00 : f32
    %293 = vector.broadcast %cst_63 : f32 to vector<2x32xf32>
    %294 = arith.addf %293, %292 : vector<2x32xf32>
    %295 = arith.divf %293, %294 : vector<2x32xf32>
    %296 = vector.extract_strided_slice %279 {offsets = [0, 64], sizes = [2, 32], strides = [1, 1]} : vector<2x96xf32> to vector<2x32xf32>
    %297 = vector.extract_strided_slice %256 {offsets = [0, 96], sizes = [2, 32], strides = [1, 1]} : vector<2x128xf32> to vector<2x32xf32>
    %298 = arith.mulf %287, %297 : vector<2x32xf32>
    %299 = arith.addf %296, %298 : vector<2x32xf32>
    %300 = math.tanh %299 : vector<2x32xf32>
    %cst_64 = arith.constant 1.000000e+00 : f32
    %301 = vector.broadcast %cst_64 : f32 to vector<2x32xf32>
    %302 = arith.subf %301, %295 : vector<2x32xf32>
    %303 = arith.mulf %302, %300 : vector<2x32xf32>
    %304 = arith.mulf %295, %230 : vector<2x32xf32>
    %305 = arith.addf %303, %304 : vector<2x32xf32>
    %cst_65 = arith.constant dense<0.000000e+00> : vector<2x16xf32>
    %306 = tpu.matmul %305, %5, %cst_65 {dimension_numbers = #tpu.dot_dimension_numbers<[1], [0], [0], [1], [0, 0, 1, 1], [], []>} : vector<2x32xf32>, vector<32x16xf32>, vector<2x16xf32> -> vector<2x16xf32>
    %307 = arith.addf %306, %17 : vector<2x16xf32>
    %cst_66 = arith.constant dense<0xFF800000> : vector<2xf32>
    %308 = vector.multi_reduction <maximumf>, %307, %cst_66 [1] : vector<2x16xf32> to vector<2xf32>
    %309 = vector.shape_cast %308 : vector<2xf32> to vector<2x1xf32>
    %310 = vector.broadcast %309 : vector<2x1xf32> to vector<2x16xf32>
    %311 = arith.subf %307, %310 : vector<2x16xf32>
    %312 = math.exp %311 : vector<2x16xf32>
    %cst_67 = arith.constant dense<0.000000e+00> : vector<2xf32>
    %313 = vector.multi_reduction <add>, %312, %cst_67 [1] : vector<2x16xf32> to vector<2xf32>
    %314 = vector.shape_cast %313 : vector<2xf32> to vector<2x1xf32>
    %315 = math.log %314 : vector<2x1xf32>
    %316 = arith.addf %315, %309 : vector<2x1xf32>
    %317 = vector.broadcast %316 : vector<2x1xf32> to vector<2x16xf32>
    %318 = arith.subf %307, %317 : vector<2x16xf32>
    %319 = vector.shape_cast %274 : vector<2x8x1xf32> to vector<2x8xf32>
    %320 = vector.broadcast %309 : vector<2x1xf32> to vector<2x16xf32>
    %321 = arith.cmpf oeq, %307, %320 : vector<2x16xf32>
    %c16_i32_68 = arith.constant 16 : i32
    %322 = vector.broadcast %c16_i32_68 : i32 to vector<2x16xi32>
    %323 = arith.select %321, %25, %322 : vector<2x16xi1>, vector<2x16xi32>
    %cst_69 = arith.constant dense<2147483647> : vector<2xi32>
    %324 = vector.multi_reduction <minsi>, %323, %cst_69 [1] : vector<2x16xi32> to vector<2xi32>
    %325 = vector.shape_cast %324 : vector<2xi32> to vector<2x1xi32>
    %326 = vector.broadcast %325 : vector<2x1xi32> to vector<2x16xi32>
    %327 = arith.cmpi eq, %25, %326 : vector<2x16xi32>
    %328 = arith.extui %327 : vector<2x16xi1> to vector<2x16xi32>
    %329 = arith.sitofp %328 : vector<2x16xi32> to vector<2x16xf32>
    %cst_70 = arith.constant dense<0.000000e+00> : vector<2x128xf32>
    %330 = tpu.matmul %305, %3, %cst_70 {dimension_numbers = #tpu.dot_dimension_numbers<[1], [0], [0], [1], [0, 0, 1, 1], [], []>} : vector<2x32xf32>, vector<32x128xf32>, vector<2x128xf32> -> vector<2x128xf32>
    %331 = arith.addf %330, %9 : vector<2x128xf32>
    %332 = vector.extract_strided_slice %331 {offsets = [0, 0], sizes = [2, 32], strides = [1, 1]} : vector<2x128xf32> to vector<2x32xf32>
    %333 = vector.shape_cast %332 : vector<2x32xf32> to vector<2x1x32xf32>
    %334 = vector.broadcast %333 : vector<2x1x32xf32> to vector<2x8x32xf32>
    %335 = arith.addf %334, %23 : vector<2x8x32xf32>
    %336 = math.tanh %335 : vector<2x8x32xf32>
    %337 = arith.mulf %336, %14 : vector<2x8x32xf32>
    %cst_71 = arith.constant dense<0.000000e+00> : vector<2x8xf32>
    %338 = vector.multi_reduction <add>, %337, %cst_71 [2] : vector<2x8x32xf32> to vector<2x8xf32>
    %339 = vector.shape_cast %338 : vector<2x8xf32> to vector<2x8x1xf32>
    %cst_72 = arith.constant dense<0xFF800000> : vector<2x1xf32>
    %340 = vector.multi_reduction <maximumf>, %339, %cst_72 [1] : vector<2x8x1xf32> to vector<2x1xf32>
    %341 = vector.shape_cast %340 : vector<2x1xf32> to vector<2x1x1xf32>
    %342 = vector.broadcast %341 : vector<2x1x1xf32> to vector<2x8x1xf32>
    %343 = arith.subf %339, %342 : vector<2x8x1xf32>
    %344 = math.exp %343 : vector<2x8x1xf32>
    %cst_73 = arith.constant dense<0.000000e+00> : vector<2x1xf32>
    %345 = vector.multi_reduction <add>, %344, %cst_73 [1] : vector<2x8x1xf32> to vector<2x1xf32>
    %346 = vector.shape_cast %345 : vector<2x1xf32> to vector<2x1x1xf32>
    %347 = tpu.reciprocal %346 {approx = true} : vector<2x1x1xf32> -> vector<2x1x1xf32>
    %348 = vector.broadcast %347 : vector<2x1x1xf32> to vector<2x8x1xf32>
    %349 = arith.mulf %344, %348 : vector<2x8x1xf32>
    %350 = vector.broadcast %349 : vector<2x8x1xf32> to vector<2x8x96xf32>
    %351 = arith.mulf %350, %24 : vector<2x8x96xf32>
    %cst_74 = arith.constant dense<0.000000e+00> : vector<2x96xf32>
    %352 = vector.multi_reduction <add>, %351, %cst_74 [1] : vector<2x8x96xf32> to vector<2x96xf32>
    %cst_75 = arith.constant dense<0.000000e+00> : vector<2x96xf32>
    %353 = tpu.matmul %329, %6, %cst_75 {dimension_numbers = #tpu.dot_dimension_numbers<[1], [0], [0], [1], [0, 0, 1, 1], [], []>} : vector<2x16xf32>, vector<16x96xf32>, vector<2x96xf32> -> vector<2x96xf32>
    %354 = arith.addf %353, %352 : vector<2x96xf32>
    %355 = vector.extract_strided_slice %354 {offsets = [0, 0], sizes = [2, 32], strides = [1, 1]} : vector<2x96xf32> to vector<2x32xf32>
    %356 = vector.extract_strided_slice %331 {offsets = [0, 32], sizes = [2, 32], strides = [1, 1]} : vector<2x128xf32> to vector<2x32xf32>
    %357 = arith.addf %355, %356 : vector<2x32xf32>
    %358 = arith.negf %357 : vector<2x32xf32>
    %359 = math.exp %358 : vector<2x32xf32>
    %cst_76 = arith.constant 1.000000e+00 : f32
    %360 = vector.broadcast %cst_76 : f32 to vector<2x32xf32>
    %361 = arith.addf %360, %359 : vector<2x32xf32>
    %362 = arith.divf %360, %361 : vector<2x32xf32>
    %363 = vector.extract_strided_slice %354 {offsets = [0, 32], sizes = [2, 32], strides = [1, 1]} : vector<2x96xf32> to vector<2x32xf32>
    %364 = vector.extract_strided_slice %331 {offsets = [0, 64], sizes = [2, 32], strides = [1, 1]} : vector<2x128xf32> to vector<2x32xf32>
    %365 = arith.addf %363, %364 : vector<2x32xf32>
    %366 = arith.negf %365 : vector<2x32xf32>
    %367 = math.exp %366 : vector<2x32xf32>
    %cst_77 = arith.constant 1.000000e+00 : f32
    %368 = vector.broadcast %cst_77 : f32 to vector<2x32xf32>
    %369 = arith.addf %368, %367 : vector<2x32xf32>
    %370 = arith.divf %368, %369 : vector<2x32xf32>
    %371 = vector.extract_strided_slice %354 {offsets = [0, 64], sizes = [2, 32], strides = [1, 1]} : vector<2x96xf32> to vector<2x32xf32>
    %372 = vector.extract_strided_slice %331 {offsets = [0, 96], sizes = [2, 32], strides = [1, 1]} : vector<2x128xf32> to vector<2x32xf32>
    %373 = arith.mulf %362, %372 : vector<2x32xf32>
    %374 = arith.addf %371, %373 : vector<2x32xf32>
    %375 = math.tanh %374 : vector<2x32xf32>
    %cst_78 = arith.constant 1.000000e+00 : f32
    %376 = vector.broadcast %cst_78 : f32 to vector<2x32xf32>
    %377 = arith.subf %376, %370 : vector<2x32xf32>
    %378 = arith.mulf %377, %375 : vector<2x32xf32>
    %379 = arith.mulf %370, %305 : vector<2x32xf32>
    %380 = arith.addf %378, %379 : vector<2x32xf32>
    %cst_79 = arith.constant dense<0.000000e+00> : vector<2x16xf32>
    %381 = tpu.matmul %380, %5, %cst_79 {dimension_numbers = #tpu.dot_dimension_numbers<[1], [0], [0], [1], [0, 0, 1, 1], [], []>} : vector<2x32xf32>, vector<32x16xf32>, vector<2x16xf32> -> vector<2x16xf32>
    %382 = arith.addf %381, %17 : vector<2x16xf32>
    %cst_80 = arith.constant dense<0xFF800000> : vector<2xf32>
    %383 = vector.multi_reduction <maximumf>, %382, %cst_80 [1] : vector<2x16xf32> to vector<2xf32>
    %384 = vector.shape_cast %383 : vector<2xf32> to vector<2x1xf32>
    %385 = vector.broadcast %384 : vector<2x1xf32> to vector<2x16xf32>
    %386 = arith.subf %382, %385 : vector<2x16xf32>
    %387 = math.exp %386 : vector<2x16xf32>
    %cst_81 = arith.constant dense<0.000000e+00> : vector<2xf32>
    %388 = vector.multi_reduction <add>, %387, %cst_81 [1] : vector<2x16xf32> to vector<2xf32>
    %389 = vector.shape_cast %388 : vector<2xf32> to vector<2x1xf32>
    %390 = math.log %389 : vector<2x1xf32>
    %391 = arith.addf %390, %384 : vector<2x1xf32>
    %392 = vector.broadcast %391 : vector<2x1xf32> to vector<2x16xf32>
    %393 = arith.subf %382, %392 : vector<2x16xf32>
    %394 = vector.shape_cast %349 : vector<2x8x1xf32> to vector<2x8xf32>
    %395 = vector.broadcast %384 : vector<2x1xf32> to vector<2x16xf32>
    %396 = arith.cmpf oeq, %382, %395 : vector<2x16xf32>
    %c16_i32_82 = arith.constant 16 : i32
    %397 = vector.broadcast %c16_i32_82 : i32 to vector<2x16xi32>
    %398 = arith.select %396, %25, %397 : vector<2x16xi1>, vector<2x16xi32>
    %cst_83 = arith.constant dense<2147483647> : vector<2xi32>
    %399 = vector.multi_reduction <minsi>, %398, %cst_83 [1] : vector<2x16xi32> to vector<2xi32>
    %400 = vector.shape_cast %399 : vector<2xi32> to vector<2x1xi32>
    %401 = vector.broadcast %400 : vector<2x1xi32> to vector<2x16xi32>
    %402 = arith.cmpi eq, %25, %401 : vector<2x16xi32>
    %403 = arith.extui %402 : vector<2x16xi1> to vector<2x16xi32>
    %404 = arith.sitofp %403 : vector<2x16xi32> to vector<2x16xf32>
    %cst_84 = arith.constant dense<0.000000e+00> : vector<2x128xf32>
    %405 = tpu.matmul %380, %3, %cst_84 {dimension_numbers = #tpu.dot_dimension_numbers<[1], [0], [0], [1], [0, 0, 1, 1], [], []>} : vector<2x32xf32>, vector<32x128xf32>, vector<2x128xf32> -> vector<2x128xf32>
    %406 = arith.addf %405, %9 : vector<2x128xf32>
    %407 = vector.extract_strided_slice %406 {offsets = [0, 0], sizes = [2, 32], strides = [1, 1]} : vector<2x128xf32> to vector<2x32xf32>
    %408 = vector.shape_cast %407 : vector<2x32xf32> to vector<2x1x32xf32>
    %409 = vector.broadcast %408 : vector<2x1x32xf32> to vector<2x8x32xf32>
    %410 = arith.addf %409, %23 : vector<2x8x32xf32>
    %411 = math.tanh %410 : vector<2x8x32xf32>
    %412 = arith.mulf %411, %14 : vector<2x8x32xf32>
    %cst_85 = arith.constant dense<0.000000e+00> : vector<2x8xf32>
    %413 = vector.multi_reduction <add>, %412, %cst_85 [2] : vector<2x8x32xf32> to vector<2x8xf32>
    %414 = vector.shape_cast %413 : vector<2x8xf32> to vector<2x8x1xf32>
    %cst_86 = arith.constant dense<0xFF800000> : vector<2x1xf32>
    %415 = vector.multi_reduction <maximumf>, %414, %cst_86 [1] : vector<2x8x1xf32> to vector<2x1xf32>
    %416 = vector.shape_cast %415 : vector<2x1xf32> to vector<2x1x1xf32>
    %417 = vector.broadcast %416 : vector<2x1x1xf32> to vector<2x8x1xf32>
    %418 = arith.subf %414, %417 : vector<2x8x1xf32>
    %419 = math.exp %418 : vector<2x8x1xf32>
    %cst_87 = arith.constant dense<0.000000e+00> : vector<2x1xf32>
    %420 = vector.multi_reduction <add>, %419, %cst_87 [1] : vector<2x8x1xf32> to vector<2x1xf32>
    %421 = vector.shape_cast %420 : vector<2x1xf32> to vector<2x1x1xf32>
    %422 = tpu.reciprocal %421 {approx = true} : vector<2x1x1xf32> -> vector<2x1x1xf32>
    %423 = vector.broadcast %422 : vector<2x1x1xf32> to vector<2x8x1xf32>
    %424 = arith.mulf %419, %423 : vector<2x8x1xf32>
    %425 = vector.broadcast %424 : vector<2x8x1xf32> to vector<2x8x96xf32>
    %426 = arith.mulf %425, %24 : vector<2x8x96xf32>
    %cst_88 = arith.constant dense<0.000000e+00> : vector<2x96xf32>
    %427 = vector.multi_reduction <add>, %426, %cst_88 [1] : vector<2x8x96xf32> to vector<2x96xf32>
    %cst_89 = arith.constant dense<0.000000e+00> : vector<2x96xf32>
    %428 = tpu.matmul %404, %6, %cst_89 {dimension_numbers = #tpu.dot_dimension_numbers<[1], [0], [0], [1], [0, 0, 1, 1], [], []>} : vector<2x16xf32>, vector<16x96xf32>, vector<2x96xf32> -> vector<2x96xf32>
    %429 = arith.addf %428, %427 : vector<2x96xf32>
    %430 = vector.extract_strided_slice %429 {offsets = [0, 0], sizes = [2, 32], strides = [1, 1]} : vector<2x96xf32> to vector<2x32xf32>
    %431 = vector.extract_strided_slice %406 {offsets = [0, 32], sizes = [2, 32], strides = [1, 1]} : vector<2x128xf32> to vector<2x32xf32>
    %432 = arith.addf %430, %431 : vector<2x32xf32>
    %433 = arith.negf %432 : vector<2x32xf32>
    %434 = math.exp %433 : vector<2x32xf32>
    %cst_90 = arith.constant 1.000000e+00 : f32
    %435 = vector.broadcast %cst_90 : f32 to vector<2x32xf32>
    %436 = arith.addf %435, %434 : vector<2x32xf32>
    %437 = arith.divf %435, %436 : vector<2x32xf32>
    %438 = vector.extract_strided_slice %429 {offsets = [0, 32], sizes = [2, 32], strides = [1, 1]} : vector<2x96xf32> to vector<2x32xf32>
    %439 = vector.extract_strided_slice %406 {offsets = [0, 64], sizes = [2, 32], strides = [1, 1]} : vector<2x128xf32> to vector<2x32xf32>
    %440 = arith.addf %438, %439 : vector<2x32xf32>
    %441 = arith.negf %440 : vector<2x32xf32>
    %442 = math.exp %441 : vector<2x32xf32>
    %cst_91 = arith.constant 1.000000e+00 : f32
    %443 = vector.broadcast %cst_91 : f32 to vector<2x32xf32>
    %444 = arith.addf %443, %442 : vector<2x32xf32>
    %445 = arith.divf %443, %444 : vector<2x32xf32>
    %446 = vector.extract_strided_slice %429 {offsets = [0, 64], sizes = [2, 32], strides = [1, 1]} : vector<2x96xf32> to vector<2x32xf32>
    %447 = vector.extract_strided_slice %406 {offsets = [0, 96], sizes = [2, 32], strides = [1, 1]} : vector<2x128xf32> to vector<2x32xf32>
    %448 = arith.mulf %437, %447 : vector<2x32xf32>
    %449 = arith.addf %446, %448 : vector<2x32xf32>
    %450 = math.tanh %449 : vector<2x32xf32>
    %cst_92 = arith.constant 1.000000e+00 : f32
    %451 = vector.broadcast %cst_92 : f32 to vector<2x32xf32>
    %452 = arith.subf %451, %445 : vector<2x32xf32>
    %453 = arith.mulf %452, %450 : vector<2x32xf32>
    %454 = arith.mulf %445, %380 : vector<2x32xf32>
    %455 = arith.addf %453, %454 : vector<2x32xf32>
    %cst_93 = arith.constant dense<0.000000e+00> : vector<2x16xf32>
    %456 = tpu.matmul %455, %5, %cst_93 {dimension_numbers = #tpu.dot_dimension_numbers<[1], [0], [0], [1], [0, 0, 1, 1], [], []>} : vector<2x32xf32>, vector<32x16xf32>, vector<2x16xf32> -> vector<2x16xf32>
    %457 = arith.addf %456, %17 : vector<2x16xf32>
    %cst_94 = arith.constant dense<0xFF800000> : vector<2xf32>
    %458 = vector.multi_reduction <maximumf>, %457, %cst_94 [1] : vector<2x16xf32> to vector<2xf32>
    %459 = vector.shape_cast %458 : vector<2xf32> to vector<2x1xf32>
    %460 = vector.broadcast %459 : vector<2x1xf32> to vector<2x16xf32>
    %461 = arith.subf %457, %460 : vector<2x16xf32>
    %462 = math.exp %461 : vector<2x16xf32>
    %cst_95 = arith.constant dense<0.000000e+00> : vector<2xf32>
    %463 = vector.multi_reduction <add>, %462, %cst_95 [1] : vector<2x16xf32> to vector<2xf32>
    %464 = vector.shape_cast %463 : vector<2xf32> to vector<2x1xf32>
    %465 = math.log %464 : vector<2x1xf32>
    %466 = arith.addf %465, %459 : vector<2x1xf32>
    %467 = vector.broadcast %466 : vector<2x1xf32> to vector<2x16xf32>
    %468 = arith.subf %457, %467 : vector<2x16xf32>
    %469 = vector.shape_cast %424 : vector<2x8x1xf32> to vector<2x8xf32>
    %470 = vector.broadcast %459 : vector<2x1xf32> to vector<2x16xf32>
    %471 = arith.cmpf oeq, %457, %470 : vector<2x16xf32>
    %c16_i32_96 = arith.constant 16 : i32
    %472 = vector.broadcast %c16_i32_96 : i32 to vector<2x16xi32>
    %473 = arith.select %471, %25, %472 : vector<2x16xi1>, vector<2x16xi32>
    %cst_97 = arith.constant dense<2147483647> : vector<2xi32>
    %474 = vector.multi_reduction <minsi>, %473, %cst_97 [1] : vector<2x16xi32> to vector<2xi32>
    %475 = vector.shape_cast %474 : vector<2xi32> to vector<2x1xi32>
    %476 = vector.broadcast %475 : vector<2x1xi32> to vector<2x16xi32>
    %477 = arith.cmpi eq, %25, %476 : vector<2x16xi32>
    %478 = arith.extui %477 : vector<2x16xi1> to vector<2x16xi32>
    %479 = arith.sitofp %478 : vector<2x16xi32> to vector<2x16xf32>
    %cst_98 = arith.constant dense<0.000000e+00> : vector<2x128xf32>
    %480 = tpu.matmul %455, %3, %cst_98 {dimension_numbers = #tpu.dot_dimension_numbers<[1], [0], [0], [1], [0, 0, 1, 1], [], []>} : vector<2x32xf32>, vector<32x128xf32>, vector<2x128xf32> -> vector<2x128xf32>
    %481 = arith.addf %480, %9 : vector<2x128xf32>
    %482 = vector.extract_strided_slice %481 {offsets = [0, 0], sizes = [2, 32], strides = [1, 1]} : vector<2x128xf32> to vector<2x32xf32>
    %483 = vector.shape_cast %482 : vector<2x32xf32> to vector<2x1x32xf32>
    %484 = vector.broadcast %483 : vector<2x1x32xf32> to vector<2x8x32xf32>
    %485 = arith.addf %484, %23 : vector<2x8x32xf32>
    %486 = math.tanh %485 : vector<2x8x32xf32>
    %487 = arith.mulf %486, %14 : vector<2x8x32xf32>
    %cst_99 = arith.constant dense<0.000000e+00> : vector<2x8xf32>
    %488 = vector.multi_reduction <add>, %487, %cst_99 [2] : vector<2x8x32xf32> to vector<2x8xf32>
    %489 = vector.shape_cast %488 : vector<2x8xf32> to vector<2x8x1xf32>
    %cst_100 = arith.constant dense<0xFF800000> : vector<2x1xf32>
    %490 = vector.multi_reduction <maximumf>, %489, %cst_100 [1] : vector<2x8x1xf32> to vector<2x1xf32>
    %491 = vector.shape_cast %490 : vector<2x1xf32> to vector<2x1x1xf32>
    %492 = vector.broadcast %491 : vector<2x1x1xf32> to vector<2x8x1xf32>
    %493 = arith.subf %489, %492 : vector<2x8x1xf32>
    %494 = math.exp %493 : vector<2x8x1xf32>
    %cst_101 = arith.constant dense<0.000000e+00> : vector<2x1xf32>
    %495 = vector.multi_reduction <add>, %494, %cst_101 [1] : vector<2x8x1xf32> to vector<2x1xf32>
    %496 = vector.shape_cast %495 : vector<2x1xf32> to vector<2x1x1xf32>
    %497 = tpu.reciprocal %496 {approx = true} : vector<2x1x1xf32> -> vector<2x1x1xf32>
    %498 = vector.broadcast %497 : vector<2x1x1xf32> to vector<2x8x1xf32>
    %499 = arith.mulf %494, %498 : vector<2x8x1xf32>
    %500 = vector.broadcast %499 : vector<2x8x1xf32> to vector<2x8x96xf32>
    %501 = arith.mulf %500, %24 : vector<2x8x96xf32>
    %cst_102 = arith.constant dense<0.000000e+00> : vector<2x96xf32>
    %502 = vector.multi_reduction <add>, %501, %cst_102 [1] : vector<2x8x96xf32> to vector<2x96xf32>
    %cst_103 = arith.constant dense<0.000000e+00> : vector<2x96xf32>
    %503 = tpu.matmul %479, %6, %cst_103 {dimension_numbers = #tpu.dot_dimension_numbers<[1], [0], [0], [1], [0, 0, 1, 1], [], []>} : vector<2x16xf32>, vector<16x96xf32>, vector<2x96xf32> -> vector<2x96xf32>
    %504 = arith.addf %503, %502 : vector<2x96xf32>
    %505 = vector.extract_strided_slice %504 {offsets = [0, 0], sizes = [2, 32], strides = [1, 1]} : vector<2x96xf32> to vector<2x32xf32>
    %506 = vector.extract_strided_slice %481 {offsets = [0, 32], sizes = [2, 32], strides = [1, 1]} : vector<2x128xf32> to vector<2x32xf32>
    %507 = arith.addf %505, %506 : vector<2x32xf32>
    %508 = arith.negf %507 : vector<2x32xf32>
    %509 = math.exp %508 : vector<2x32xf32>
    %cst_104 = arith.constant 1.000000e+00 : f32
    %510 = vector.broadcast %cst_104 : f32 to vector<2x32xf32>
    %511 = arith.addf %510, %509 : vector<2x32xf32>
    %512 = arith.divf %510, %511 : vector<2x32xf32>
    %513 = vector.extract_strided_slice %504 {offsets = [0, 32], sizes = [2, 32], strides = [1, 1]} : vector<2x96xf32> to vector<2x32xf32>
    %514 = vector.extract_strided_slice %481 {offsets = [0, 64], sizes = [2, 32], strides = [1, 1]} : vector<2x128xf32> to vector<2x32xf32>
    %515 = arith.addf %513, %514 : vector<2x32xf32>
    %516 = arith.negf %515 : vector<2x32xf32>
    %517 = math.exp %516 : vector<2x32xf32>
    %cst_105 = arith.constant 1.000000e+00 : f32
    %518 = vector.broadcast %cst_105 : f32 to vector<2x32xf32>
    %519 = arith.addf %518, %517 : vector<2x32xf32>
    %520 = arith.divf %518, %519 : vector<2x32xf32>
    %521 = vector.extract_strided_slice %504 {offsets = [0, 64], sizes = [2, 32], strides = [1, 1]} : vector<2x96xf32> to vector<2x32xf32>
    %522 = vector.extract_strided_slice %481 {offsets = [0, 96], sizes = [2, 32], strides = [1, 1]} : vector<2x128xf32> to vector<2x32xf32>
    %523 = arith.mulf %512, %522 : vector<2x32xf32>
    %524 = arith.addf %521, %523 : vector<2x32xf32>
    %525 = math.tanh %524 : vector<2x32xf32>
    %cst_106 = arith.constant 1.000000e+00 : f32
    %526 = vector.broadcast %cst_106 : f32 to vector<2x32xf32>
    %527 = arith.subf %526, %520 : vector<2x32xf32>
    %528 = arith.mulf %527, %525 : vector<2x32xf32>
    %529 = arith.mulf %520, %455 : vector<2x32xf32>
    %530 = arith.addf %528, %529 : vector<2x32xf32>
    %cst_107 = arith.constant dense<0.000000e+00> : vector<2x16xf32>
    %531 = tpu.matmul %530, %5, %cst_107 {dimension_numbers = #tpu.dot_dimension_numbers<[1], [0], [0], [1], [0, 0, 1, 1], [], []>} : vector<2x32xf32>, vector<32x16xf32>, vector<2x16xf32> -> vector<2x16xf32>
    %532 = arith.addf %531, %17 : vector<2x16xf32>
    %cst_108 = arith.constant dense<0xFF800000> : vector<2xf32>
    %533 = vector.multi_reduction <maximumf>, %532, %cst_108 [1] : vector<2x16xf32> to vector<2xf32>
    %534 = vector.shape_cast %533 : vector<2xf32> to vector<2x1xf32>
    %535 = vector.broadcast %534 : vector<2x1xf32> to vector<2x16xf32>
    %536 = arith.subf %532, %535 : vector<2x16xf32>
    %537 = math.exp %536 : vector<2x16xf32>
    %cst_109 = arith.constant dense<0.000000e+00> : vector<2xf32>
    %538 = vector.multi_reduction <add>, %537, %cst_109 [1] : vector<2x16xf32> to vector<2xf32>
    %539 = vector.shape_cast %538 : vector<2xf32> to vector<2x1xf32>
    %540 = math.log %539 : vector<2x1xf32>
    %541 = arith.addf %540, %534 : vector<2x1xf32>
    %542 = vector.broadcast %541 : vector<2x1xf32> to vector<2x16xf32>
    %543 = arith.subf %532, %542 : vector<2x16xf32>
    %544 = vector.shape_cast %499 : vector<2x8x1xf32> to vector<2x8xf32>
    %545 = vector.broadcast %534 : vector<2x1xf32> to vector<2x16xf32>
    %546 = arith.cmpf oeq, %532, %545 : vector<2x16xf32>
    %c16_i32_110 = arith.constant 16 : i32
    %547 = vector.broadcast %c16_i32_110 : i32 to vector<2x16xi32>
    %548 = arith.select %546, %25, %547 : vector<2x16xi1>, vector<2x16xi32>
    %cst_111 = arith.constant dense<2147483647> : vector<2xi32>
    %549 = vector.multi_reduction <minsi>, %548, %cst_111 [1] : vector<2x16xi32> to vector<2xi32>
    %550 = vector.shape_cast %549 : vector<2xi32> to vector<2x1xi32>
    %551 = vector.broadcast %550 : vector<2x1xi32> to vector<2x16xi32>
    %552 = arith.cmpi eq, %25, %551 : vector<2x16xi32>
    %553 = arith.extui %552 : vector<2x16xi1> to vector<2x16xi32>
    %554 = arith.sitofp %553 : vector<2x16xi32> to vector<2x16xf32>
    %cst_112 = arith.constant dense<0.000000e+00> : vector<2x128xf32>
    %555 = tpu.matmul %530, %3, %cst_112 {dimension_numbers = #tpu.dot_dimension_numbers<[1], [0], [0], [1], [0, 0, 1, 1], [], []>} : vector<2x32xf32>, vector<32x128xf32>, vector<2x128xf32> -> vector<2x128xf32>
    %556 = arith.addf %555, %9 : vector<2x128xf32>
    %557 = vector.extract_strided_slice %556 {offsets = [0, 0], sizes = [2, 32], strides = [1, 1]} : vector<2x128xf32> to vector<2x32xf32>
    %558 = vector.shape_cast %557 : vector<2x32xf32> to vector<2x1x32xf32>
    %559 = vector.broadcast %558 : vector<2x1x32xf32> to vector<2x8x32xf32>
    %560 = arith.addf %559, %23 : vector<2x8x32xf32>
    %561 = math.tanh %560 : vector<2x8x32xf32>
    %562 = arith.mulf %561, %14 : vector<2x8x32xf32>
    %cst_113 = arith.constant dense<0.000000e+00> : vector<2x8xf32>
    %563 = vector.multi_reduction <add>, %562, %cst_113 [2] : vector<2x8x32xf32> to vector<2x8xf32>
    %564 = vector.shape_cast %563 : vector<2x8xf32> to vector<2x8x1xf32>
    %cst_114 = arith.constant dense<0xFF800000> : vector<2x1xf32>
    %565 = vector.multi_reduction <maximumf>, %564, %cst_114 [1] : vector<2x8x1xf32> to vector<2x1xf32>
    %566 = vector.shape_cast %565 : vector<2x1xf32> to vector<2x1x1xf32>
    %567 = vector.broadcast %566 : vector<2x1x1xf32> to vector<2x8x1xf32>
    %568 = arith.subf %564, %567 : vector<2x8x1xf32>
    %569 = math.exp %568 : vector<2x8x1xf32>
    %cst_115 = arith.constant dense<0.000000e+00> : vector<2x1xf32>
    %570 = vector.multi_reduction <add>, %569, %cst_115 [1] : vector<2x8x1xf32> to vector<2x1xf32>
    %571 = vector.shape_cast %570 : vector<2x1xf32> to vector<2x1x1xf32>
    %572 = tpu.reciprocal %571 {approx = true} : vector<2x1x1xf32> -> vector<2x1x1xf32>
    %573 = vector.broadcast %572 : vector<2x1x1xf32> to vector<2x8x1xf32>
    %574 = arith.mulf %569, %573 : vector<2x8x1xf32>
    %575 = vector.broadcast %574 : vector<2x8x1xf32> to vector<2x8x96xf32>
    %576 = arith.mulf %575, %24 : vector<2x8x96xf32>
    %cst_116 = arith.constant dense<0.000000e+00> : vector<2x96xf32>
    %577 = vector.multi_reduction <add>, %576, %cst_116 [1] : vector<2x8x96xf32> to vector<2x96xf32>
    %cst_117 = arith.constant dense<0.000000e+00> : vector<2x96xf32>
    %578 = tpu.matmul %554, %6, %cst_117 {dimension_numbers = #tpu.dot_dimension_numbers<[1], [0], [0], [1], [0, 0, 1, 1], [], []>} : vector<2x16xf32>, vector<16x96xf32>, vector<2x96xf32> -> vector<2x96xf32>
    %579 = arith.addf %578, %577 : vector<2x96xf32>
    %580 = vector.extract_strided_slice %579 {offsets = [0, 0], sizes = [2, 32], strides = [1, 1]} : vector<2x96xf32> to vector<2x32xf32>
    %581 = vector.extract_strided_slice %556 {offsets = [0, 32], sizes = [2, 32], strides = [1, 1]} : vector<2x128xf32> to vector<2x32xf32>
    %582 = arith.addf %580, %581 : vector<2x32xf32>
    %583 = arith.negf %582 : vector<2x32xf32>
    %584 = math.exp %583 : vector<2x32xf32>
    %cst_118 = arith.constant 1.000000e+00 : f32
    %585 = vector.broadcast %cst_118 : f32 to vector<2x32xf32>
    %586 = arith.addf %585, %584 : vector<2x32xf32>
    %587 = arith.divf %585, %586 : vector<2x32xf32>
    %588 = vector.extract_strided_slice %579 {offsets = [0, 32], sizes = [2, 32], strides = [1, 1]} : vector<2x96xf32> to vector<2x32xf32>
    %589 = vector.extract_strided_slice %556 {offsets = [0, 64], sizes = [2, 32], strides = [1, 1]} : vector<2x128xf32> to vector<2x32xf32>
    %590 = arith.addf %588, %589 : vector<2x32xf32>
    %591 = arith.negf %590 : vector<2x32xf32>
    %592 = math.exp %591 : vector<2x32xf32>
    %cst_119 = arith.constant 1.000000e+00 : f32
    %593 = vector.broadcast %cst_119 : f32 to vector<2x32xf32>
    %594 = arith.addf %593, %592 : vector<2x32xf32>
    %595 = arith.divf %593, %594 : vector<2x32xf32>
    %596 = vector.extract_strided_slice %579 {offsets = [0, 64], sizes = [2, 32], strides = [1, 1]} : vector<2x96xf32> to vector<2x32xf32>
    %597 = vector.extract_strided_slice %556 {offsets = [0, 96], sizes = [2, 32], strides = [1, 1]} : vector<2x128xf32> to vector<2x32xf32>
    %598 = arith.mulf %587, %597 : vector<2x32xf32>
    %599 = arith.addf %596, %598 : vector<2x32xf32>
    %600 = math.tanh %599 : vector<2x32xf32>
    %cst_120 = arith.constant 1.000000e+00 : f32
    %601 = vector.broadcast %cst_120 : f32 to vector<2x32xf32>
    %602 = arith.subf %601, %595 : vector<2x32xf32>
    %603 = arith.mulf %602, %600 : vector<2x32xf32>
    %604 = arith.mulf %595, %530 : vector<2x32xf32>
    %605 = arith.addf %603, %604 : vector<2x32xf32>
    %cst_121 = arith.constant dense<0.000000e+00> : vector<2x16xf32>
    %606 = tpu.matmul %605, %5, %cst_121 {dimension_numbers = #tpu.dot_dimension_numbers<[1], [0], [0], [1], [0, 0, 1, 1], [], []>} : vector<2x32xf32>, vector<32x16xf32>, vector<2x16xf32> -> vector<2x16xf32>
    %607 = arith.addf %606, %17 : vector<2x16xf32>
    %cst_122 = arith.constant dense<0xFF800000> : vector<2xf32>
    %608 = vector.multi_reduction <maximumf>, %607, %cst_122 [1] : vector<2x16xf32> to vector<2xf32>
    %609 = vector.shape_cast %608 : vector<2xf32> to vector<2x1xf32>
    %610 = vector.broadcast %609 : vector<2x1xf32> to vector<2x16xf32>
    %611 = arith.subf %607, %610 : vector<2x16xf32>
    %612 = math.exp %611 : vector<2x16xf32>
    %cst_123 = arith.constant dense<0.000000e+00> : vector<2xf32>
    %613 = vector.multi_reduction <add>, %612, %cst_123 [1] : vector<2x16xf32> to vector<2xf32>
    %614 = vector.shape_cast %613 : vector<2xf32> to vector<2x1xf32>
    %615 = math.log %614 : vector<2x1xf32>
    %616 = arith.addf %615, %609 : vector<2x1xf32>
    %617 = vector.broadcast %616 : vector<2x1xf32> to vector<2x16xf32>
    %618 = arith.subf %607, %617 : vector<2x16xf32>
    %619 = vector.shape_cast %574 : vector<2x8x1xf32> to vector<2x8xf32>
    %cst_124 = arith.constant 0.000000e+00 : f32
    %620 = vector.broadcast %cst_124 : f32 to vector<2x32xf32>
    %621 = tpu.concatenate %93, %168, %243, %318, %393, %468, %543, %618, %94, %169, %244, %319, %394, %469, %544, %619 in 1 : vector<2x16xf32>, vector<2x16xf32>, vector<2x16xf32>, vector<2x16xf32>, vector<2x16xf32>, vector<2x16xf32>, vector<2x16xf32>, vector<2x16xf32>, vector<2x8xf32>, vector<2x8xf32>, vector<2x8xf32>, vector<2x8xf32>, vector<2x8xf32>, vector<2x8xf32>, vector<2x8xf32>, vector<2x8xf32> -> vector<2x192xf32>
    %622 = tpu.concatenate %605, %620 in 1 : vector<2x32xf32>, vector<2x32xf32> -> vector<2x64xf32>
    %623 = tpu.concatenate %621, %622 in 1 : vector<2x192xf32>, vector<2x64xf32> -> vector<2x256xf32>
    %c0_125 = arith.constant 0 : index
    %c0_126 = arith.constant 0 : index
    %624 = vector.load %arg4[%c0_125, %c0_126] : memref<2x256xf32, #tpu.memory_space<vmem>>, vector<2x256xf32>
    tpu.vector_store %arg4[%c0_125, %c0_126], %623 {strides = array<i32>} : memref<2x256xf32, #tpu.memory_space<vmem>>, vector<2x256xf32>,
    return
  }
}

</mosaic_0001>

<bundles_post_ra>
// kernel: attn_decoder_forward.1
= control target key start
LH: loop header
LB: loop body
LE: loop exit
PB: predicated region body
PF: predicated region fallthrough
CT: control target
= control target key end

     0   :  { %9 = vsyncpa [#allocation3], 0  ;;  %s4872_s0 = inlined_call_operand.hbm [shape: f32[2,8,32], index: 0, kind: input, shape index: {}]   ;;  %s4873_s1 = inlined_call_operand.vmem [shape: f32[1,2,32], index: 1, kind: input, shape index: {}]   ;;  %s4874_s2 = inlined_call_operand.hbm [shape: f32[48,272], index: 2, kind: input, shape index: {}]   ;;  %s4875_s3 = inlined_call_operand.vmem [shape: f32[4,128], index: 3, kind: input, shape index: {}]   ;;  %s4876_s4 = inlined_call_operand.vmem [shape: f32[2,256], index: 4, kind: output, shape index: {}]  }
   0x1   :  { %10 = vsyncpa [#allocation5], 0  ;;  %s4150_s15 = smov [#allocation2]   ;;  %s4102_s19 = scalar_lea.hbm %s4872_s0, 256 }
   0x2   :  { %s16_s16 = sshll.u32 %s4150_s15, 4  ;;  %p4103_p0 = scmp.ne.s32.totalorder %s4872_s0, %s4102_s19  ;;  %s17_s16 = int_to_ptr.vmem [resolvable:$true] %s16_s16 }
   0x3   :  { %p4106_p1 = scmp.lt.u32.totalorder %s4102_s19, %s4872_s0 }
   0x5   :  { %p4108_p2 = pnand %p4106_p1, %p4103_p0 }
   0x7   :  { %4111 = shalt.err (!%p4108_p2)
}
   0x8   :  { %s4112_s24 = scalar_lea.vmem %s17_s16, 256  ;;  %p4117_p4 = scmp.lt.s32.totalorder %s17_s16, %s17_s16 }
   0x9   :  { %p4113_p3 = scmp.ne.s32.totalorder %s17_s16, %s4112_s24  ;;  %p4118_p5 = scmp.lt.s32.totalorder %s4112_s24, %s4112_s24 }
   0xb   :  { %p4119_p6 = por %p4118_p5, %p4117_p4 }
   0xd   :  { %p4120_p7 = pnand %p4119_p6, %p4113_p3 }
   0xf   :  { %4123 = shalt.err (!%p4120_p7)
}
  0x10   :  { %s4151_s25 = smov 128   ;;  %s4152_s26 = smov 8  }
  0x11   :  { %22 = dma.hbm_to_vmem [thread:$0]  %s4872_s0, 256, %s17_s16, [#allocation3], %s4151_s25, %s4151_s25, %s4152_s26  }
  0x12   :  { %s4153_s29 = smov [#allocation4]   ;;  %s4124_s7 = scalar_lea.hbm %s4874_s2, 2304 }
  0x13   :  { %s30_s30 = sshll.u32 %s4153_s29, 4  ;;  %p4125_p8 = scmp.ne.s32.totalorder %s4874_s2, %s4124_s7  ;;  %s31_s30 = int_to_ptr.vmem [resolvable:$true] %s30_s30 }
  0x14   :  { %p4128_p9 = scmp.lt.u32.totalorder %s4124_s7, %s4874_s2 }
  0x16   :  { %p4130_p10 = pnand %p4128_p9, %p4125_p8 }
  0x18   :  { %4133 = shalt.err (!%p4130_p10)
}
  0x19   :  { %s4134_s12 = scalar_lea.vmem %s31_s30, 2304  ;;  %p4139_p12 = scmp.lt.s32.totalorder %s31_s30, %s31_s30 }
  0x1a   :  { %p4135_p11 = scmp.ne.s32.totalorder %s31_s30, %s4134_s12  ;;  %p4140_p13 = scmp.lt.s32.totalorder %s4134_s12, %s4134_s12 }
  0x1c   :  { %p4141_p0 = por %p4140_p13, %p4139_p12 }
  0x1e   :  { %p4142_p1 = pnand %p4141_p0, %p4135_p11 }
  0x20   :  { %4145 = shalt.err (!%p4142_p1)
}
  0x21   :  { %s4154_s0 = smov 384   ;;  %s4155_s13 = smov 24  }
  0x22   :  { %36 = dma.hbm_to_vmem [thread:$0]  %s4874_s2, 2304, %s31_s30, [#allocation5], %s4154_s0, %s4154_s0, %s4155_s13  }
  0x23   :  { %4146 = dma.done.wait [#allocation3], 256  }
  0x24   :  { %4147 = vsyncadd [#allocation3], 4294967040 }
  0x25   :  { %4148 = dma.done.wait [#allocation5], 2304  }
  0x26   :  { %4149 = vsyncadd [#allocation5], 4294964992  ;;  %v4156_v0 = vmov 0.0|0.0   ;;  %vm4157_vm0 = vmmov 0   ;;  %v4158_v1 = vmov 0.0   ;;  %v48_v2 = vld [vmem:[#allocation4] sm:$0xff]  ;;  %v164_v17 = vlaneseq }
  0x27   :  { %3786 = vmatprep.subr.bf16.mxu1 %v4156_v0  ;;  %3554 = vmatprep.mubr.msk.f32.mxu1 %vm4157_vm0, %v4158_v1  ;;  %v49_v3 = vld [vmem:[#allocation4 + $0x18] sm:$0xff]  ;;  %v52_v4 = vld [vmem:[#allocation4 + $0x8] sm:$0xff]  ;;  %v53_v6 = vld [vmem:[#allocation4 + $0x20] sm:$0xff]  ;;  %vm82_vm1 = vcmask 261120   ;;  %vm345_vm3 = vcmask 130048   ;;  %s4160_s22 = smov 32  }
  0x28   :  { %v4219_v5 = vpack.c.bf16 %v49_v3, %v48_v2  ;;  %v50_v7 = vld [vmem:[#allocation4 + $0x30] sm:$0xff]  ;;  %v51_v8 = vld [vmem:[#allocation4 + $0x48] sm:$0xff]  ;;  %v3778_v9 = vpack.c.bf16 %v53_v6, %v52_v4  ;;  %v54_v10 = vld [vmem:[#allocation4 + $0x38] sm:$0xff]  ;;  %v4245_v18 = vand.u32 127, %v164_v17  ;;  %v4159_v23 = vmov 1966171168  }
  0x29   :  { %v55_v11 = vld [vmem:[#allocation4 + $0x50] sm:$0xff]  ;;  %v4222_v12 = vpack.c.bf16 %v51_v8, %v50_v7  ;;  %v46_v16 = vld [vmem:[#allocation2 + $0x8] sm:$0xff]  ;;  %v60_v19 = vld [vmem:[#allocation4 + $0x60] sm:$0xff]  ;;  %v244_v24 = vunpack.c.l.s4 %v4159_v23  ;;  %v4256_v26 = vshrl.u32 %v164_v17, 7  ;;  %vm323_vm4 = vcmask 1047808   ;;  %s4161_s23 = smov 96  }
  0x2a   :  { %3788 = vmatpush3.bf16.msra.mxu1 %v4219_v5  ;;  %v3782_v13 = vpack.c.bf16 %v55_v11, %v54_v10  ;;  %v45_v14 = vld [vmem:[#allocation2] sm:$0xff]  ;;  %3779 = vmatprep.subr.bf16.mxu0 %v3778_v9  ;;  %v61_v20 = vld [vmem:[#allocation4 + $0x78] sm:$0xff]  ;;  %vm166_vm2 = vcmp.eq.s32.totalorder %v4245_v18, 0  ;;  %vm340_vm5 = vcmask 1041409   ;;  %s4162_s24 = smov 64   ;;  %vm525_vm6 = vcmask 123904  }
  0x2b   :  { %3789 = vmatprep.subr.bf16.mxu1 %v4156_v0  ;;  %3781 = vmatpush3.bf16.msra.mxu0 %v3778_v9  ;;  %v4230_v15 = vld [vmem:[%s4873_s1] sm:$0x3]  ;;  %v4248_v21 = vpack.c.bf16 %v61_v20, %v60_v19  ;;  %v3384_v22 = vsel %vm166_vm2, 1.0, %v4158_v1  ;;  %v245_v25 = vunpack.c.0.s8 %v244_v24  ;;  %v4275_v35 = vsub.s32 0, %v4256_v26  ;;  %v4290_v46 = vld [vmem:[%s4875_s3 + $0x2] ss:$0 sm:$0xff] }
  0x2c   :  { %3543 = vmatprep.mubr.msk.f32.mxu0 %vm82_vm1, %v45_v14  ;;  %3783 = vmatprep.subr.bf16.mxu0 %v3782_v13  ;;  %v4261_v27 = vld [vmem:[%s4875_s3] ss:$0 sm:$0xff]  ;;  %v3381_v33 = vld [vmem:[%s4875_s3 + $0x1] ss:$0 sm:$0xff]  ;;  %vm3342_vm10 = vcmask 64512   ;;  %s4164_s7 = smov 16  }
  0x2d   :  { %v4264_v28 = vsub.s32 %v245_v25, %v4256_v26  ;;  %s4165_s8 = smov 48   ;;  %s4166_s9 = smov 112  }
  0x2e   :  { %3791 = vmatpush3.bf16.msra.mxu1 %v4222_v12 }
  0x2f   :  { %3792 = vmatprep.subr.bf16.mxu1 %v4156_v0  ;;  %3785 = vmatpush3.bf16.msra.mxu0 %v3782_v13 }
  0x30   :  { %3801 = vmatprep.subr.bf16.mxu0 %v4156_v0 }
  0x31   :  { %3555 = vmatmul.mubr.msk.f32.vlgmr.msra.gmra.mrb[0].mxu1 %vm82_vm1, %v4230_v15 }
  0x32   :  { %3561 = vmatprep.mubr.msk.f32.mxu1 %vm4157_vm0, %v4158_v1  ;;  %3544 = vmatmul.mubr.msk.f32.vlgmr.msra.gmra.mrb[0].mxu0 %vm82_vm1, %v46_v16 }
  0x33   :  { %3803 = vmatpush3.bf16.msra.mxu0 %v4219_v5  ;;  %3583 = vmatprep.mubr.msk.f32.mxu0 %vm4157_vm0, %v4158_v1 }
  0x34   :  { %3804 = vmatprep.subr.bf16.mxu0 %v4156_v0  ;;  %3794 = vmatpush3.bf16.msra.mxu1 %v4248_v21 }
  0x35   :  { %3795 = vmatprep.subr.bf16.mxu1 %v4156_v0 }
  0x37   :  { %3806 = vmatpush3.bf16.msra.mxu0 %v4222_v12  ;;  %3562 = vmatmul.mubr.msk.f32.vlgmr.msra.gmra.mrb[2].mxu1 %vm345_vm3, %v3384_v22 }
  0x38   :  { %3810 = vmatprep.subr.bf16.mxu0 %v4156_v0  ;;  %3572 = vmatprep.mubr.msk.f32.mxu1 %vm4157_vm0, %v4158_v1 }
 0x104   :  { %v238_v29 = vpop.f32.mrb[0].mxu1 }
 0x105   :  { %v4267_v30 = vadd.f32 %v4261_v27, %v238_v29  ;;  %v3556_v31 = vpop.f32.mrb[1].mxu1  ;;  %v3545_v32 = vpop.f32.mrb[0].mxu0 }
 0x106   :  { %v155_v36 = vpop.f32.mrb[1].mxu0  ;;  %v4283_v43 = vadd.f32 %v3545_v32, %v3381_v33 }
 0x107   :  { %v249_v34 = vrot.slane %v4267_v30, %v4264_v28  ;;  %v4278_v39 = vadd.f32 %v3381_v33, %v155_v36 }
 0x109   :  { %v250_v37 = vcombine.high %v249_v34, %v249_v34  ;;  %v257_v38 = vrot.slane %v249_v34, %v4264_v28 }
 0x10a   :  { %v4298_v53 = vpop.f32.mrb[2].mxu1 }
 0x10b   :  { %v264_v40 = vrot.slane %v250_v37, %v4264_v28  ;;  %v268_v41 = vrot.slane %v257_v38, %v4275_v35  ;;  %v3563_v54 = vpop.f32.mrb[3].mxu1  ;;  %v3231_v38 = vsub.s32 %v4245_v18, %v4256_v26 }
 0x10d   :  { %v272_v42 = vrot.slane %v264_v40, %v4275_v35  ;;  %v275_v44 = vadd.f32 %v268_v41, %v4278_v39 }
 0x10f   :  { %3923 = vtanh.f32 %v275_v44  ;;  %v276_v45 = vadd.f32 %v272_v42, %v4283_v43 }
 0x111   :  { %3925 = vtanh.f32 %v276_v45 }
 0x119   :  { %v3924_v47 = vpop.eup %3923 }
 0x11a   :  { %v279_v48 = vmul.f32 %v3924_v47, %v4290_v46 }
 0x11b   :  { %v3926_v49 = vpop.eup %3925 }
 0x11c   :  { %v281_v50 = vsel %vm82_vm1, %v279_v48, 0.0  ;;  %v280_v51 = vmul.f32 %v3926_v49, %v4290_v46 }
 0x11d   :  { %282 = vadd.xlane.f32.xlu0 %v281_v50 }
 0x11e   :  { %v284_v52 = vsel %vm82_vm1, %v280_v51, 0.0 }
 0x121   :  { %285 = vadd.xlane.f32.xlu0 %v284_v52 }
 0x137   :  { %429 = vrot.lane.b32.xlu0 %v4267_v30, %s4160_s22 }
 0x1aa   :  { %v283_v55 = vpop.xlane.xlu0 %282 }
 0x1ab   :  { %v287_v56 = vrot.slane %v283_v55, 4 }
 0x1ad   :  { %v288_v57 = vmax.f32 %v283_v55, %v287_v56 }
 0x1ae   :  { %v286_v58 = vpop.xlane.xlu0 %285 }
 0x1af   :  { %v289_v59 = vrot.slane %v288_v57, 2  ;;  %v293_v60 = vrot.slane %v286_v58, 4 }
 0x1b1   :  { %v290_v61 = vmax.f32 %v288_v57, %v289_v59  ;;  %v294_v62 = vmax.f32 %v286_v58, %v293_v60 }
 0x1b3   :  { %v291_v63 = vrot.slane %v290_v61, 1  ;;  %v295_v2 = vrot.slane %v294_v62, 2 }
 0x1b5   :  { %v292_v3 = vmax.f32 %v290_v61, %v291_v63  ;;  %v296_v4 = vmax.f32 %v294_v62, %v295_v2 }
 0x1b7   :  { %v299_v6 = vsub.f32 %v283_v55, %v292_v3  ;;  %v297_v7 = vrot.slane %v296_v4, 1 }
 0x1b9   :  { %v301_v8 = vmul.f32 1.442695, %v299_v6  ;;  %v298_v9 = vmax.f32 %v296_v4, %v297_v7 }
 0x1bb   :  { %3927 = vpow2.f32 %v301_v8  ;;  %v300_v10 = vsub.f32 %v286_v58, %v298_v9 }
 0x1bd   :  { %v303_v11 = vmul.f32 1.442695, %v300_v10 }
 0x1bf   :  { %3929 = vpow2.f32 %v303_v11  ;;  %v430_v11 = vpop.permute.xlu0 %429 }
 0x1c5   :  { %v3928_v13 = vpop.eup %3927 }
 0x1c6   :  { %v305_v14 = vrot.slane %v3928_v13, 4 }
 0x1c8   :  { %v306_v16 = vadd.f32 %v3928_v13, %v305_v14 }
 0x1c9   :  { %v3930_v17 = vpop.eup %3929 }
 0x1ca   :  { %v311_v19 = vrot.slane %v3930_v17, 4  ;;  %v307_v20 = vrot.slane %v306_v16, 2 }
 0x1cc   :  { %v312_v22 = vadd.f32 %v3930_v17, %v311_v19  ;;  %v308_v23 = vadd.f32 %v307_v20, %v306_v16  ;;  %v58_v19 = vld [vmem:[#allocation4 + $0x40] sm:$0xff]  ;;  %v59_v20 = vld [vmem:[#allocation4 + $0x58] sm:$0xff] }
 0x1ce   :  { %v309_v24 = vrot.slane %v308_v23, 1  ;;  %v313_v25 = vrot.slane %v312_v22, 2 }
 0x1d0   :  { %v310_v29 = vadd.f32 %v309_v24, %v308_v23  ;;  %v314_v31 = vadd.f32 %v313_v25, %v312_v22  ;;  %v4318_v22 = vpack.c.bf16 %v59_v20, %v58_v19 }
 0x1d2   :  { %v315_v32 = vrot.slane %v314_v31, 1  ;;  %3931 = vrcp.f32 %v310_v29 }
 0x1d4   :  { %v316_v33 = vadd.f32 %v315_v32, %v314_v31 }
 0x1d6   :  { %3933 = vrcp.f32 %v316_v33 }
 0x1dc   :  { %v3932_v34 = vpop.eup %3931 }
 0x1dd   :  { %v319_v36 = vmul.f32 %v3932_v34, %v3928_v13 }
 0x1df   :  { %v321_v37 = vmul.f32 %v319_v36, %v4278_v39  ;;  %v3232_v47 = vrot.slane %v319_v36, %v3231_v38 }
 0x1e0   :  { %v3934_v40 = vpop.eup %3933 }
 0x1e1   :  { %v320_v41 = vmul.f32 %v3934_v40, %v3930_v17  ;;  %v324_v42 = vsel %vm323_vm4, %v321_v37, 0.0  ;;  %v57_v17 = vld [vmem:[#allocation4 + $0x28] sm:$0xff] }
 0x1e2   :  { %v325_v44 = vrot.slane %v324_v42, 4 }
 0x1e3   :  { %v322_v45 = vmul.f32 %v320_v41, %v4283_v43  ;;  %v3236_v48 = vrot.slane %v320_v41, %v3231_v38 }
 0x1e4   :  { %v326_v49 = vadd.f32 %v325_v44, %v324_v42 }
 0x1e5   :  { %v331_v50 = vsel %vm323_vm4, %v322_v45, 0.0  ;;  %v4307_v51 = vsel %vm340_vm5, %v3236_v48, %v3232_v47 }
 0x1e6   :  { %v327_v52 = vrot.slane %v326_v49, 2  ;;  %v332_v54 = vrot.slane %v331_v50, 4 }
 0x1e8   :  { %v328_v55 = vadd.f32 %v327_v52, %v326_v49  ;;  %v333_v56 = vadd.f32 %v332_v54, %v331_v50 }
 0x1ea   :  { %v334_v57 = vrot.slane %v333_v56, 2  ;;  %v329_v58 = vrot.slane %v328_v55, 1 }
 0x1ec   :  { %v335_v59 = vadd.f32 %v334_v57, %v333_v56  ;;  %v330_v61 = vadd.f32 %v329_v58, %v328_v55 }
 0x1ee   :  { %v336_v60 = vrot.slane %v335_v59, 1 }
 0x1f0   :  { %v337_v62 = vadd.f32 %v336_v60, %v335_v59 }
 0x1f2   :  { %v341_v63 = vsel %vm340_vm5, %v337_v62, %v330_v61 }
 0x1f3   :  { %342 = vrot.lane.b32.xlu1 %v341_v63, %s4161_s23 }
 0x1f7   :  { %419 = vrot.lane.b32.xlu1 %v4267_v30, %s4161_s23  ;;  %v56_v30 = vld [vmem:[#allocation4 + $0x10] sm:$0xff] }
 0x265   :  { %v343_v2 = vpop.permute.xlu1 %342 }
 0x266   :  { %v416_v3 = vadd.f32 %v4298_v53, %v343_v2  ;;  %v4315_v53 = vpack.c.bf16 %v57_v17, %v56_v30 }
 0x268   :  { %3797 = vmatpush3.bf16.msra.mxu1 %v4315_v53 }
 0x269   :  { %v420_v4 = vpop.permute.xlu1 %419  ;;  %3798 = vmatprep.subr.bf16.mxu1 %v4156_v0 }
 0x26a   :  { %v422_v6 = vadd.f32 %v420_v4, %v416_v3 }
 0x26c   :  { %v3387_v7 = vmul.f32 -1.442695, %v422_v6  ;;  %3800 = vmatpush3.bf16.msra.mxu1 %v4318_v22 }
 0x26d   :  { %3807 = vmatprep.subr.bf16.mxu1 %v4156_v0 }
 0x26e   :  { %3935 = vpow2.f32 %v3387_v7 }
 0x278   :  { %v3936_v8 = vpop.eup %3935 }
 0x279   :  { %v426_v9 = vadd.f32 1.0, %v3936_v8 }
 0x27b   :  { %3937 = vrcp.f32 %v426_v9 }
 0x285   :  { %v3938_v10 = vpop.eup %3937 }
 0x286   :  { %v432_v13 = vmul.f32 %v3938_v10, %v430_v11  ;;  %v439_v25 = vsub.f32 1.0, %v3938_v10 }
 0x288   :  { %434 = vrot.lane.b32.xlu1 %v432_v13, %s4162_s24 }
 0x2fa   :  { %v435_v14 = vpop.permute.xlu1 %434 }
 0x2fb   :  { %v437_v16 = vadd.f32 %v435_v14, %v416_v3 }
 0x2fd   :  { %3939 = vtanh.f32 %v437_v16 }
 0x307   :  { %v3940_v23 = vpop.eup %3939 }
 0x308   :  { %441 = vrot.lane.b32.xlu1 %v3940_v23, %s4161_s23 }
 0x30c   :  { %445 = vrot.lane.b32.xlu1 %v4230_v15, %s4160_s22  ;;  %v4345_v15 = vld [vmem:[%s4875_s3 + $0x3] ss:$0 sm:$0xff] }
 0x37a   :  { %v442_v24 = vpop.permute.xlu1 %441 }
 0x37b   :  { %v444_v31 = vmul.f32 %v442_v24, %v439_v25 }
 0x37e   :  { %v446_v29 = vpop.permute.xlu1 %445 }
 0x37f   :  { %v448_v32 = vmul.f32 %v3938_v10, %v446_v29 }
 0x381   :  { %v4326_v33 = vadd.f32 %v448_v32, %v444_v31 }
 0x383   :  { %451 = vrot.lane.b32.xlu1 %v4326_v33, %s4161_s23 }
 0x3f5   :  { %v452_v34 = vpop.permute.xlu1 %451 }
 0x3f6   :  { %3573 = vmatmul.mubr.msk.f32.vlgmr.msra.gmra.mrb[4].mxu1 %vm82_vm1, %v452_v34  ;;  %3584 = vmatmul.mubr.msk.f32.vlgmr.msra.gmra.mrb[2].mxu0 %vm82_vm1, %v452_v34 }
 0x3f7   :  { %3809 = vmatpush3.bf16.msra.mxu1 %v4248_v21  ;;  %3590 = vmatprep.mubr.msk.f32.mxu1 %vm4157_vm0, %v4158_v1 }
 0x3f8   :  { %3816 = vmatprep.subr.bf16.mxu1 %v4156_v0  ;;  %3812 = vmatpush3.bf16.msra.mxu0 %v4315_v53 }
 0x3f9   :  { %3813 = vmatprep.subr.bf16.mxu0 %v4156_v0  ;;  %3601 = vmatprep.mubr.msk.f32.mxu0 %vm4157_vm0, %v4158_v1 }
 0x3fc   :  { %3815 = vmatpush3.bf16.msra.mxu0 %v4318_v22 }
 0x3fd   :  { %3822 = vmatprep.subr.bf16.mxu0 %v4156_v0 }
 0x4c9   :  { %v521_v36 = vpop.f32.mrb[4].mxu1  ;;  %v625_v37 = vpop.f32.mrb[2].mxu0 }
 0x4ca   :  { %v4348_v38 = vadd.f32 %v4345_v15, %v521_v36  ;;  %v3574_v40 = vpop.f32.mrb[5].mxu1  ;;  %v3585_v41 = vpop.f32.mrb[3].mxu0  ;;  %v626_v44 = vadd.f32 %v4261_v27, %v625_v37 }
 0x4cc   :  { %v526_v42 = vsel %vm525_vm6, %v4348_v38, -inf  ;;  %v636_v45 = vrot.slane %v626_v44, %v4264_v28 }
 0x4cd   :  { %527 = vmax.xlane.f32.xlu1 %v526_v42 }
 0x4ce   :  { %v644_v47 = vrot.slane %v636_v45, %v4264_v28  ;;  %v637_v60 = vcombine.high %v636_v45, %v636_v45 }
 0x4d0   :  { %v655_v48 = vrot.slane %v644_v47, %v4275_v35  ;;  %v651_v61 = vrot.slane %v637_v60, %v4264_v28 }
 0x4d2   :  { %v662_v49 = vadd.f32 %v655_v48, %v4278_v39  ;;  %v659_v62 = vrot.slane %v651_v61, %v4275_v35 }
 0x4d4   :  { %3941 = vtanh.f32 %v662_v49  ;;  %v663_v63 = vadd.f32 %v659_v62, %v4283_v43 }
 0x4d6   :  { %3943 = vtanh.f32 %v663_v63 }
 0x4de   :  { %v3942_v55 = vpop.eup %3941 }
 0x4df   :  { %v666_v58 = vmul.f32 %v3942_v55, %v4290_v46 }
 0x4e0   :  { %v3944_v3 = vpop.eup %3943 }
 0x4e1   :  { %v668_v59 = vsel %vm82_vm1, %v666_v58, 0.0  ;;  %v667_v8 = vmul.f32 %v3944_v3, %v4290_v46 }
 0x4e3   :  { %v671_v9 = vsel %vm82_vm1, %v667_v8, 0.0  ;;  %v3241_v8 = vadd.s32 4294967288, %v4245_v18 }
 0x55a   :  { %v4357_v50 = vpop.xlane.xlu1 %527 }
 0x55b   :  { %vm539_vm7 = vcmp.eq.f32.partialorder %v4348_v38, %v4357_v50 }
 0x55c   :  { %v540_v52 = vsel %vm539_vm7, %v4245_v18, 16  ;;  %vm3345_vm7 = vcmask 195584  }
 0x55d   :  { %v541_v54 = vsel %vm525_vm6, %v540_v52, 2147483647 }
 0x55e   :  { %v543_v56 = vshra.s32 %v541_v54, 16  ;;  %v542_v2 = vand.u32 65535, %v541_v54 }
 0x560   :  { %v545_v57 = vcvt.s32.f32 %v543_v56  ;;  %v544_v6 = vcvt.s32.f32 %v542_v2 }
 0x562   :  { %546 = vmin.xlane.f32.xlu0 %v545_v57 }
 0x566   :  { %669 = vadd.xlane.f32.xlu0 %v668_v59 }
 0x5ef   :  { %v547_v4 = vpop.xlane.xlu0 %546 }
 0x5f0   :  { %vm548_vm8 = vcmp.eq.f32.partialorder %v545_v57, %v547_v4  ;;  %v553_v23 = vcvt.f32.s32 %v547_v4 }
 0x5f1   :  { %v549_v7 = vsel %vm548_vm8, %v544_v6, inf }
 0x5f2   :  { %550 = vmin.xlane.f32.xlu1 %v549_v7  ;;  %v554_v29 = vshll.u32 %v553_v23, 16 }
 0x5f3   :  { %v670_v10 = vpop.xlane.xlu0 %669 }
 0x5f4   :  { %v674_v11 = vrot.slane %v670_v10, 4 }
 0x5f6   :  { %672 = vadd.xlane.f32.xlu1 %v671_v9  ;;  %v675_v13 = vmax.f32 %v670_v10, %v674_v11 }
 0x5f8   :  { %v676_v14 = vrot.slane %v675_v13, 2 }
 0x5fa   :  { %v677_v16 = vmax.f32 %v675_v13, %v676_v14 }
 0x5fc   :  { %v678_v30 = vrot.slane %v677_v16, 1 }
 0x5fe   :  { %v679_v17 = vmax.f32 %v677_v16, %v678_v30 }
 0x600   :  { %v686_v19 = vsub.f32 %v670_v10, %v679_v17  ;;  %v3244_v10 = vsub.s32 %v3241_v8, %v4256_v26 }
 0x602   :  { %v688_v20 = vmul.f32 1.442695, %v686_v19 }
 0x604   :  { %3945 = vpow2.f32 %v688_v20 }
 0x607   :  { %803 = vrot.lane.b32.xlu1 %v626_v44, %s4161_s23 }
 0x60b   :  { %813 = vrot.lane.b32.xlu1 %v626_v44, %s4160_s22 }
 0x60e   :  { %v3946_v24 = vpop.eup %3945 }
 0x60f   :  { %v692_v32 = vrot.slane %v3946_v24, 4 }
 0x611   :  { %v693_v40 = vadd.f32 %v3946_v24, %v692_v32 }
 0x613   :  { %v694_v45 = vrot.slane %v693_v40, 2 }
 0x615   :  { %v695_v49 = vadd.f32 %v694_v45, %v693_v40 }
 0x617   :  { %v696_v55 = vrot.slane %v695_v49, 1 }
 0x619   :  { %v697_v57 = vadd.f32 %v696_v55, %v695_v49 }
 0x67f   :  { %v551_v25 = vpop.xlane.xlu1 %550 }
 0x680   :  { %v552_v31 = vcvt.f32.s32 %v551_v25 }
 0x682   :  { %v555_v34 = vadd.s32 %v554_v29, %v552_v31 }
 0x683   :  { %v673_v36 = vpop.xlane.xlu1 %672 }
 0x684   :  { %vm556_vm9 = vcmp.eq.s32.totalorder %v4245_v18, %v555_v34  ;;  %v680_v37 = vrot.slane %v673_v36, 4 }
 0x685   :  { %v3389_v41 = vsel %vm556_vm9, 1.0, %v4158_v1 }
 0x686   :  { %v681_v42 = vmax.f32 %v673_v36, %v680_v37  ;;  %3591 = vmatmul.mubr.msk.f32.vlgmr.msra.gmra.mrb[6].mxu1 %vm345_vm3, %v3389_v41 }
 0x687   :  { %3818 = vmatpush3.bf16.msra.mxu1 %v4219_v5  ;;  %3612 = vmatprep.mubr.msk.f32.mxu1 %vm4157_vm0, %v4158_v1  ;;  %v804_v49 = vpop.permute.xlu1 %803 }
 0x688   :  { %v682_v44 = vrot.slane %v681_v42, 2  ;;  %3819 = vmatprep.subr.bf16.mxu1 %v4156_v0 }
 0x68a   :  { %v683_v47 = vmax.f32 %v681_v42, %v682_v44 }
 0x68b   :  { %3821 = vmatpush3.bf16.msra.mxu1 %v4222_v12 }
 0x68c   :  { %v684_v48 = vrot.slane %v683_v47, 1  ;;  %3825 = vmatprep.subr.bf16.mxu1 %v4156_v0 }
 0x68e   :  { %v685_v52 = vmax.f32 %v683_v47, %v684_v48 }
 0x690   :  { %v687_v54 = vsub.f32 %v673_v36, %v685_v52 }
 0x692   :  { %v690_v56 = vmul.f32 1.442695, %v687_v54 }
 0x694   :  { %3947 = vpow2.f32 %v690_v56 }
 0x695   :  { %3949 = vrcp.f32 %v697_v57  ;;  %v814_v57 = vpop.permute.xlu1 %813 }
 0x69e   :  { %v3948_v58 = vpop.eup %3947 }
 0x69f   :  { %v698_v59 = vrot.slane %v3948_v58, 4  ;;  %v3950_v61 = vpop.eup %3949 }
 0x6a0   :  { %v706_v2 = vmul.f32 %v3950_v61, %v3946_v24 }
 0x6a1   :  { %v699_v60 = vadd.f32 %v3948_v58, %v698_v59 }
 0x6a2   :  { %v708_v6 = vmul.f32 %v706_v2, %v4278_v39  ;;  %v3245_v30 = vrot.slane %v706_v2, %v3244_v10 }
 0x6a3   :  { %v700_v62 = vrot.slane %v699_v60, 2 }
 0x6a4   :  { %v710_v7 = vsel %vm323_vm4, %v708_v6, 0.0 }
 0x6a5   :  { %v701_v63 = vadd.f32 %v700_v62, %v699_v60  ;;  %v711_v9 = vrot.slane %v710_v7, 4 }
 0x6a7   :  { %v702_v3 = vrot.slane %v701_v63, 1  ;;  %v712_v13 = vadd.f32 %v711_v9, %v710_v7 }
 0x6a9   :  { %v703_v4 = vadd.f32 %v702_v3, %v701_v63  ;;  %v713_v19 = vrot.slane %v712_v13, 2 }
 0x6ab   :  { %3951 = vrcp.f32 %v703_v4  ;;  %v714_v29 = vadd.f32 %v713_v19, %v712_v13 }
 0x6ad   :  { %v715_v34 = vrot.slane %v714_v29, 1 }
 0x6af   :  { %v716_v40 = vadd.f32 %v715_v34, %v714_v29 }
 0x6b5   :  { %v3952_v11 = vpop.eup %3951 }
 0x6b6   :  { %v707_v14 = vmul.f32 %v3952_v11, %v3948_v58 }
 0x6b8   :  { %v709_v16 = vmul.f32 %v707_v14, %v4283_v43  ;;  %v3249_v17 = vrot.slane %v707_v14, %v3244_v10 }
 0x6ba   :  { %v717_v20 = vsel %vm323_vm4, %v709_v16, 0.0  ;;  %v3250_v23 = vsel %vm340_vm5, %v3249_v17, %v3245_v30 }
 0x6bb   :  { %v718_v24 = vrot.slane %v717_v20, 4  ;;  %v4389_v25 = vsel %vm3342_vm10, %v4307_v51, %v3250_v23 }
 0x6bd   :  { %v719_v31 = vadd.f32 %v718_v24, %v717_v20 }
 0x6bf   :  { %v720_v32 = vrot.slane %v719_v31, 2 }
 0x6c1   :  { %v721_v36 = vadd.f32 %v720_v32, %v719_v31 }
 0x6c3   :  { %v722_v37 = vrot.slane %v721_v36, 1 }
 0x6c5   :  { %v723_v41 = vadd.f32 %v722_v37, %v721_v36 }
 0x6c7   :  { %v726_v42 = vsel %vm340_vm5, %v723_v41, %v716_v40 }
 0x6c8   :  { %727 = vrot.lane.b32.xlu0 %v726_v42, %s4161_s23 }
 0x73a   :  { %v728_v44 = vpop.permute.xlu0 %727 }
 0x759   :  { %v799_v45 = vpop.f32.mrb[6].mxu1 }
 0x75a   :  { %v800_v47 = vadd.f32 %v799_v45, %v728_v44  ;;  %v3592_v48 = vpop.f32.mrb[7].mxu1 }
 0x75c   :  { %v806_v52 = vadd.f32 %v804_v49, %v800_v47 }
 0x75e   :  { %v3392_v51 = vmul.f32 -1.442695, %v806_v52 }
 0x760   :  { %3953 = vpow2.f32 %v3392_v51 }
 0x76a   :  { %v3954_v54 = vpop.eup %3953 }
 0x76b   :  { %v810_v55 = vadd.f32 1.0, %v3954_v54 }
 0x76d   :  { %3955 = vrcp.f32 %v810_v55 }
 0x777   :  { %v3956_v56 = vpop.eup %3955 }
 0x778   :  { %v816_v58 = vmul.f32 %v3956_v56, %v814_v57  ;;  %v823_v62 = vsub.f32 1.0, %v3956_v56  ;;  %v829_v2 = vmul.f32 %v3956_v56, %v4326_v33 }
 0x77a   :  { %818 = vrot.lane.b32.xlu0 %v816_v58, %s4162_s24 }
 0x7ec   :  { %v819_v59 = vpop.permute.xlu0 %818 }
 0x7ed   :  { %v821_v60 = vadd.f32 %v819_v59, %v800_v47 }
 0x7ef   :  { %3957 = vtanh.f32 %v821_v60 }
 0x7f9   :  { %v3958_v61 = vpop.eup %3957 }
 0x7fa   :  { %825 = vrot.lane.b32.xlu1 %v3958_v61, %s4161_s23 }
 0x86c   :  { %v826_v63 = vpop.permute.xlu1 %825 }
 0x86d   :  { %v828_v3 = vmul.f32 %v826_v63, %v823_v62 }
 0x86f   :  { %v4396_v4 = vadd.f32 %v829_v2, %v828_v3 }
 0x871   :  { %832 = vrot.lane.b32.xlu0 %v4396_v4, %s4161_s23 }
 0x8e3   :  { %v833_v6 = vpop.permute.xlu0 %832 }
 0x8e4   :  { %3602 = vmatmul.mubr.msk.f32.vlgmr.msra.gmra.mrb[4].mxu0 %vm82_vm1, %v833_v6  ;;  %3613 = vmatmul.mubr.msk.f32.vlgmr.msra.gmra.mrb[8].mxu1 %vm82_vm1, %v833_v6 }
 0x8e5   :  { %3824 = vmatpush3.bf16.msra.mxu0 %v4248_v21  ;;  %3619 = vmatprep.mubr.msk.f32.mxu0 %vm4157_vm0, %v4158_v1 }
 0x8e6   :  { %3831 = vmatprep.subr.bf16.mxu0 %v4156_v0  ;;  %3827 = vmatpush3.bf16.msra.mxu1 %v4315_v53 }
 0x8e7   :  { %3828 = vmatprep.subr.bf16.mxu1 %v4156_v0  ;;  %3630 = vmatprep.mubr.msk.f32.mxu1 %vm4157_vm0, %v4158_v1 }
 0x8ea   :  { %3830 = vmatpush3.bf16.msra.mxu1 %v4318_v22 }
 0x8eb   :  { %3837 = vmatprep.subr.bf16.mxu1 %v4156_v0 }
 0x9b7   :  { %v902_v33 = vpop.f32.mrb[4].mxu0  ;;  %v1005_v7 = vpop.f32.mrb[8].mxu1 }
 0x9b8   :  { %v4413_v8 = vadd.f32 %v4345_v15, %v902_v33  ;;  %v4416_v9 = vadd.f32 %v4261_v27, %v1005_v7  ;;  %v3603_v10 = vpop.f32.mrb[5].mxu0  ;;  %v3614_v11 = vpop.f32.mrb[9].mxu1 }
 0x9ba   :  { %v1016_v13 = vrot.slane %v4416_v9, %v4264_v28  ;;  %v906_v14 = vsel %vm525_vm6, %v4413_v8, -inf }
 0x9bb   :  { %907 = vmax.xlane.f32.xlu1 %v906_v14 }
 0x9bc   :  { %v1024_v16 = vrot.slane %v1016_v13, %v4264_v28  ;;  %v1017_v36 = vcombine.high %v1016_v13, %v1016_v13 }
 0x9be   :  { %v1035_v30 = vrot.slane %v1024_v16, %v4275_v35  ;;  %v1031_v37 = vrot.slane %v1017_v36, %v4264_v28 }
 0x9c0   :  { %v1042_v17 = vadd.f32 %v1035_v30, %v4278_v39  ;;  %v1039_v40 = vrot.slane %v1031_v37, %v4275_v35 }
 0x9c2   :  { %3959 = vtanh.f32 %v1042_v17  ;;  %v1043_v41 = vadd.f32 %v1039_v40, %v4283_v43 }
 0x9c4   :  { %3961 = vtanh.f32 %v1043_v41 }
 0x9cc   :  { %v3960_v19 = vpop.eup %3959 }
 0x9cd   :  { %v1046_v20 = vmul.f32 %v3960_v19, %v4290_v46 }
 0x9ce   :  { %v3962_v44 = vpop.eup %3961 }
 0x9cf   :  { %v1048_v23 = vsel %vm82_vm1, %v1046_v20, 0.0  ;;  %v1047_v49 = vmul.f32 %v3962_v44, %v4290_v46 }
 0x9d0   :  { %1049 = vadd.xlane.f32.xlu1 %v1048_v23 }
 0x9d1   :  { %v1051_v52 = vsel %vm82_vm1, %v1047_v49, 0.0 }
 0xa48   :  { %v4427_v24 = vpop.xlane.xlu1 %907 }
 0xa49   :  { %vm919_vm11 = vcmp.eq.f32.partialorder %v4413_v8, %v4427_v24 }
 0xa4a   :  { %v920_v29 = vsel %vm919_vm11, %v4245_v18, 16 }
 0xa4b   :  { %v921_v31 = vsel %vm525_vm6, %v920_v29, 2147483647 }
 0xa4c   :  { %v923_v32 = vshra.s32 %v921_v31, 16  ;;  %v922_v42 = vand.u32 65535, %v921_v31 }
 0xa4e   :  { %v925_v34 = vcvt.s32.f32 %v923_v32  ;;  %v924_v47 = vcvt.s32.f32 %v922_v42 }
 0xa50   :  { %926 = vmin.xlane.f32.xlu0 %v925_v34 }
 0xa5d   :  { %v1050_v51 = vpop.xlane.xlu1 %1049 }
 0xa5e   :  { %v1054_v54 = vrot.slane %v1050_v51, 4 }
 0xa60   :  { %v1055_v55 = vmax.f32 %v1050_v51, %v1054_v54  ;;  %v3254_v54 = vadd.s32 4294967280, %v4245_v18 }
 0xa62   :  { %v1056_v56 = vrot.slane %v1055_v55, 2 }
 0xa64   :  { %v1057_v57 = vmax.f32 %v1055_v55, %v1056_v56  ;;  %v3257_v56 = vsub.s32 %v3254_v54, %v4256_v26 }
 0xa66   :  { %v1058_v58 = vrot.slane %v1057_v57, 1 }
 0xa68   :  { %v1059_v59 = vmax.f32 %v1057_v57, %v1058_v58 }
 0xa6a   :  { %v1066_v60 = vsub.f32 %v1050_v51, %v1059_v59 }
 0xa6c   :  { %v1068_v61 = vmul.f32 1.442695, %v1066_v60 }
 0xa6e   :  { %3963 = vpow2.f32 %v1068_v61 }
 0xa78   :  { %v3964_v63 = vpop.eup %3963 }
 0xa79   :  { %v1072_v33 = vrot.slane %v3964_v63, 4 }
 0xa7b   :  { %v1073_v13 = vadd.f32 %v3964_v63, %v1072_v33 }
 0xa7d   :  { %v1074_v17 = vrot.slane %v1073_v13, 2 }
 0xa7f   :  { %v1075_v23 = vadd.f32 %v1074_v17, %v1073_v13 }
 0xa81   :  { %v1076_v32 = vrot.slane %v1075_v23, 1 }
 0xa83   :  { %v1077_v36 = vadd.f32 %v1076_v32, %v1075_v23 }
 0xadd   :  { %v927_v45 = vpop.xlane.xlu0 %926 }
 0xade   :  { %vm928_vm12 = vcmp.eq.f32.partialorder %v925_v34, %v927_v45  ;;  %v933_v62 = vcvt.f32.s32 %v927_v45 }
 0xadf   :  { %v929_v48 = vsel %vm928_vm12, %v924_v47, inf }
 0xae0   :  { %930 = vmin.xlane.f32.xlu0 %v929_v48  ;;  %v934_v3 = vshll.u32 %v933_v62, 16 }
 0xae4   :  { %1052 = vadd.xlane.f32.xlu0 %v1051_v52 }
 0xafa   :  { %1183 = vrot.lane.b32.xlu0 %v4416_v9, %s4161_s23 }
 0xb6d   :  { %v931_v2 = vpop.xlane.xlu0 %930 }
 0xb6e   :  { %v932_v6 = vcvt.f32.s32 %v931_v2 }
 0xb70   :  { %v935_v7 = vadd.s32 %v934_v3, %v932_v6 }
 0xb71   :  { %v1053_v10 = vpop.xlane.xlu0 %1052 }
 0xb72   :  { %vm936_vm13 = vcmp.eq.s32.totalorder %v4245_v18, %v935_v7  ;;  %v1060_v11 = vrot.slane %v1053_v10, 4 }
 0xb73   :  { %v3394_v14 = vsel %vm936_vm13, 1.0, %v4158_v1 }
 0xb74   :  { %v1061_v16 = vmax.f32 %v1053_v10, %v1060_v11  ;;  %3620 = vmatmul.mubr.msk.f32.vlgmr.msra.gmra.mrb[6].mxu0 %vm345_vm3, %v3394_v14 }
 0xb75   :  { %3833 = vmatpush3.bf16.msra.mxu0 %v4219_v5  ;;  %3641 = vmatprep.mubr.msk.f32.mxu0 %vm4157_vm0, %v4158_v1 }
 0xb76   :  { %v1062_v30 = vrot.slane %v1061_v16, 2  ;;  %3834 = vmatprep.subr.bf16.mxu0 %v4156_v0 }
 0xb78   :  { %v1063_v19 = vmax.f32 %v1061_v16, %v1062_v30 }
 0xb79   :  { %3836 = vmatpush3.bf16.msra.mxu0 %v4222_v12 }
 0xb7a   :  { %v1064_v20 = vrot.slane %v1063_v19, 1  ;;  %3840 = vmatprep.subr.bf16.mxu0 %v4156_v0 }
 0xb7c   :  { %v1065_v29 = vmax.f32 %v1063_v19, %v1064_v20 }
 0xb7e   :  { %v1067_v31 = vsub.f32 %v1053_v10, %v1065_v29 }
 0xb80   :  { %v1070_v34 = vmul.f32 1.442695, %v1067_v31  ;;  %v1184_v31 = vpop.permute.xlu0 %1183 }
 0xb82   :  { %3965 = vpow2.f32 %v1070_v34 }
 0xb83   :  { %3967 = vrcp.f32 %v1077_v36 }
 0xb8c   :  { %v3966_v37 = vpop.eup %3965 }
 0xb8d   :  { %v1078_v40 = vrot.slane %v3966_v37, 4  ;;  %v3968_v42 = vpop.eup %3967 }
 0xb8e   :  { %v1086_v47 = vmul.f32 %v3968_v42, %v3964_v63 }
 0xb8f   :  { %v1079_v41 = vadd.f32 %v3966_v37, %v1078_v40 }
 0xb90   :  { %v1088_v52 = vmul.f32 %v1086_v47, %v4278_v39  ;;  %v3258_v61 = vrot.slane %v1086_v47, %v3257_v56 }
 0xb91   :  { %v1080_v44 = vrot.slane %v1079_v41, 2 }
 0xb92   :  { %v1090_v51 = vsel %vm323_vm4, %v1088_v52, 0.0 }
 0xb93   :  { %v1081_v45 = vadd.f32 %v1080_v44, %v1079_v41  ;;  %v1091_v55 = vrot.slane %v1090_v51, 4 }
 0xb95   :  { %v1082_v48 = vrot.slane %v1081_v45, 1  ;;  %v1092_v58 = vadd.f32 %v1091_v55, %v1090_v51 }
 0xb97   :  { %v1083_v49 = vadd.f32 %v1082_v48, %v1081_v45  ;;  %v1093_v63 = vrot.slane %v1092_v58, 2 }
 0xb99   :  { %3969 = vrcp.f32 %v1083_v49  ;;  %v1094_v7 = vadd.f32 %v1093_v63, %v1092_v58 }
 0xb9b   :  { %v1095_v13 = vrot.slane %v1094_v7, 1 }
 0xb9d   :  { %v1096_v30 = vadd.f32 %v1095_v13, %v1094_v7 }
 0xba3   :  { %v3970_v57 = vpop.eup %3969 }
 0xba4   :  { %v1087_v59 = vmul.f32 %v3970_v57, %v3966_v37 }
 0xba6   :  { %v1089_v60 = vmul.f32 %v1087_v59, %v4283_v43  ;;  %v3262_v62 = vrot.slane %v1087_v59, %v3257_v56 }
 0xba8   :  { %v1097_v2 = vsel %vm323_vm4, %v1089_v60, 0.0  ;;  %v3263_v3 = vsel %vm340_vm5, %v3262_v62, %v3258_v61 }
 0xba9   :  { %v1098_v6 = vrot.slane %v1097_v2, 4  ;;  %v4458_v33 = vsel %vm345_vm3, %v4389_v25, %v3263_v3 }
 0xbab   :  { %v1099_v10 = vadd.f32 %v1098_v6, %v1097_v2 }
 0xbad   :  { %v1100_v11 = vrot.slane %v1099_v10, 2 }
 0xbaf   :  { %v1101_v14 = vadd.f32 %v1100_v11, %v1099_v10 }
 0xbb1   :  { %v1102_v16 = vrot.slane %v1101_v14, 1 }
 0xbb3   :  { %v1103_v17 = vadd.f32 %v1102_v16, %v1101_v14 }
 0xbb5   :  { %v1106_v19 = vsel %vm340_vm5, %v1103_v17, %v1096_v30 }
 0xbb6   :  { %1107 = vrot.lane.b32.xlu1 %v1106_v19, %s4161_s23 }
 0xbba   :  { %1193 = vrot.lane.b32.xlu1 %v4416_v9, %s4160_s22 }
 0xc28   :  { %v1108_v20 = vpop.permute.xlu1 %1107 }
 0xc2c   :  { %v1194_v41 = vpop.permute.xlu1 %1193 }
 0xc47   :  { %v1179_v23 = vpop.f32.mrb[6].mxu0 }
 0xc48   :  { %v1180_v29 = vadd.f32 %v1179_v23, %v1108_v20  ;;  %v3621_v25 = vpop.f32.mrb[7].mxu0 }
 0xc4a   :  { %v1186_v32 = vadd.f32 %v1184_v31, %v1180_v29 }
 0xc4c   :  { %v3397_v34 = vmul.f32 -1.442695, %v1186_v32 }
 0xc4e   :  { %3971 = vpow2.f32 %v3397_v34 }
 0xc58   :  { %v3972_v36 = vpop.eup %3971 }
 0xc59   :  { %v1190_v37 = vadd.f32 1.0, %v3972_v36 }
 0xc5b   :  { %3973 = vrcp.f32 %v1190_v37 }
 0xc65   :  { %v3974_v40 = vpop.eup %3973 }
 0xc66   :  { %v1196_v42 = vmul.f32 %v3974_v40, %v1194_v41  ;;  %v1203_v47 = vsub.f32 1.0, %v3974_v40  ;;  %v1209_v49 = vmul.f32 %v3974_v40, %v4396_v4 }
 0xc68   :  { %1198 = vrot.lane.b32.xlu1 %v1196_v42, %s4162_s24 }
 0xcda   :  { %v1199_v44 = vpop.permute.xlu1 %1198 }
 0xcdb   :  { %v1201_v45 = vadd.f32 %v1199_v44, %v1180_v29 }
 0xcdd   :  { %3975 = vtanh.f32 %v1201_v45 }
 0xce7   :  { %v3976_v9 = vpop.eup %3975 }
 0xce8   :  { %1205 = vrot.lane.b32.xlu0 %v3976_v9, %s4161_s23 }
 0xd5a   :  { %v1206_v48 = vpop.permute.xlu0 %1205 }
 0xd5b   :  { %v1208_v52 = vmul.f32 %v1206_v48, %v1203_v47 }
 0xd5d   :  { %v4467_v51 = vadd.f32 %v1209_v49, %v1208_v52 }
 0xd5f   :  { %1212 = vrot.lane.b32.xlu1 %v4467_v51, %s4161_s23 }
 0xdd1   :  { %v1213_v54 = vpop.permute.xlu1 %1212 }
 0xdd2   :  { %3631 = vmatmul.mubr.msk.f32.vlgmr.msra.gmra.mrb[10].mxu1 %vm82_vm1, %v1213_v54  ;;  %3642 = vmatmul.mubr.msk.f32.vlgmr.msra.gmra.mrb[8].mxu0 %vm82_vm1, %v1213_v54 }
 0xdd3   :  { %3839 = vmatpush3.bf16.msra.mxu1 %v4248_v21  ;;  %3648 = vmatprep.mubr.msk.f32.mxu1 %vm4157_vm0, %v4158_v1 }
 0xdd4   :  { %3846 = vmatprep.subr.bf16.mxu1 %v4156_v0  ;;  %3842 = vmatpush3.bf16.msra.mxu0 %v4315_v53 }
 0xdd5   :  { %3843 = vmatprep.subr.bf16.mxu0 %v4156_v0  ;;  %3659 = vmatprep.mubr.msk.f32.mxu0 %vm4157_vm0, %v4158_v1 }
 0xdd8   :  { %3845 = vmatpush3.bf16.msra.mxu0 %v4318_v22 }
 0xdd9   :  { %3852 = vmatprep.subr.bf16.mxu0 %v4156_v0 }
 0xea5   :  { %v1282_v4 = vpop.f32.mrb[10].mxu1  ;;  %v1385_v55 = vpop.f32.mrb[8].mxu0 }
 0xea6   :  { %v4484_v56 = vadd.f32 %v4345_v15, %v1282_v4  ;;  %v3632_v57 = vpop.f32.mrb[11].mxu1  ;;  %v3643_v58 = vpop.f32.mrb[9].mxu0  ;;  %v1386_v60 = vadd.f32 %v4261_v27, %v1385_v55 }
 0xea8   :  { %v1286_v59 = vsel %vm525_vm6, %v4484_v56, -inf  ;;  %v1396_v61 = vrot.slane %v1386_v60, %v4264_v28 }
 0xea9   :  { %1287 = vmax.xlane.f32.xlu0 %v1286_v59 }
 0xeaa   :  { %v1397_v62 = vcombine.high %v1396_v61, %v1396_v61  ;;  %v1404_v30 = vrot.slane %v1396_v61, %v4264_v28 }
 0xeac   :  { %v1411_v63 = vrot.slane %v1397_v62, %v4264_v28  ;;  %v1415_v17 = vrot.slane %v1404_v30, %v4275_v35 }
 0xeae   :  { %v1419_v2 = vrot.slane %v1411_v63, %v4275_v35  ;;  %v1422_v19 = vadd.f32 %v1415_v17, %v4278_v39 }
 0xeb0   :  { %v1423_v3 = vadd.f32 %v1419_v2, %v4283_v43 }
 0xeb2   :  { %3977 = vtanh.f32 %v1423_v3 }
 0xeb3   :  { %3979 = vtanh.f32 %v1422_v19 }
 0xebc   :  { %v3978_v27 = vpop.eup %3977 }
 0xebd   :  { %v1427_v14 = vmul.f32 %v3978_v27, %v4290_v46  ;;  %v3980_v23 = vpop.eup %3979 }
 0xebe   :  { %v1426_v32 = vmul.f32 %v3980_v23, %v4290_v46 }
 0xebf   :  { %v1431_v16 = vsel %vm82_vm1, %v1427_v14, 0.0 }
 0xec0   :  { %v1428_v34 = vsel %vm82_vm1, %v1426_v32, 0.0 }
 0xf36   :  { %v4493_v6 = vpop.xlane.xlu0 %1287 }
 0xf37   :  { %vm1299_vm14 = vcmp.eq.f32.partialorder %v4484_v56, %v4493_v6 }
 0xf38   :  { %v1300_v7 = vsel %vm1299_vm14, %v4245_v18, 16  ;;  %vm3348_vm14 = vcmask 326656  }
 0xf39   :  { %v1301_v10 = vsel %vm525_vm6, %v1300_v7, 2147483647 }
 0xf3a   :  { %v1303_v11 = vshra.s32 %v1301_v10, 16  ;;  %v1302_v20 = vand.u32 65535, %v1301_v10 }
 0xf3c   :  { %v1305_v13 = vcvt.s32.f32 %v1303_v11  ;;  %v1304_v25 = vcvt.s32.f32 %v1302_v20 }
 0xf3e   :  { %1306 = vmin.xlane.f32.xlu1 %v1305_v13 }
 0xf42   :  { %1432 = vadd.xlane.f32.xlu1 %v1431_v16 }
 0xf53   :  { %1563 = vrot.lane.b32.xlu1 %v1386_v60, %s4161_s23 }
 0xf57   :  { %1573 = vrot.lane.b32.xlu1 %v1386_v60, %s4160_s22 }
 0xfcb   :  { %v1307_v29 = vpop.xlane.xlu1 %1306 }
 0xfcc   :  { %vm1308_vm15 = vcmp.eq.f32.partialorder %v1305_v13, %v1307_v29  ;;  %v1313_v48 = vcvt.f32.s32 %v1307_v29 }
 0xfcd   :  { %v1309_v31 = vsel %vm1308_vm15, %v1304_v25, inf }
 0xfce   :  { %1310 = vmin.xlane.f32.xlu0 %v1309_v31  ;;  %v1314_v54 = vshll.u32 %v1313_v48, 16 }
 0xfcf   :  { %v1433_v36 = vpop.xlane.xlu1 %1432 }
 0xfd0   :  { %v1440_v37 = vrot.slane %v1433_v36, 4 }
 0xfd2   :  { %1429 = vadd.xlane.f32.xlu0 %v1428_v34  ;;  %v1441_v40 = vmax.f32 %v1433_v36, %v1440_v37 }
 0xfd4   :  { %v1442_v41 = vrot.slane %v1441_v40, 2 }
 0xfd6   :  { %v1443_v42 = vmax.f32 %v1441_v40, %v1442_v41 }
 0xfd8   :  { %v1444_v44 = vrot.slane %v1443_v42, 1 }
 0xfda   :  { %v1445_v45 = vmax.f32 %v1443_v42, %v1444_v44 }
 0xfdc   :  { %v1447_v9 = vsub.f32 %v1433_v36, %v1445_v45  ;;  %v3267_v36 = vadd.s32 4294967272, %v4245_v18 }
 0xfde   :  { %v1450_v47 = vmul.f32 1.442695, %v1447_v9  ;;  %v3270_v40 = vsub.s32 %v3267_v36, %v4256_v26 }
 0xfe0   :  { %3981 = vpow2.f32 %v1450_v47 }
 0xfea   :  { %v3982_v49 = vpop.eup %3981 }
 0xfeb   :  { %v1458_v46 = vrot.slane %v3982_v49, 4 }
 0xfed   :  { %v1459_v59 = vadd.f32 %v3982_v49, %v1458_v46 }
 0xfef   :  { %v1460_v63 = vrot.slane %v1459_v59, 2 }
 0xff1   :  { %v1461_v7 = vadd.f32 %v1460_v63, %v1459_v59 }
 0xff3   :  { %v1462_v11 = vrot.slane %v1461_v7, 1 }
 0xff5   :  { %v1463_v14 = vadd.f32 %v1462_v11, %v1461_v7 }
0x105b   :  { %v1311_v52 = vpop.xlane.xlu0 %1310 }
0x105c   :  { %v1312_v4 = vcvt.f32.s32 %v1311_v52 }
0x105e   :  { %v1315_v55 = vadd.s32 %v1314_v54, %v1312_v4 }
0x105f   :  { %v1430_v57 = vpop.xlane.xlu0 %1429 }
0x1060   :  { %vm1316_vm2 = vcmp.eq.s32.totalorder %v4245_v18, %v1315_v55  ;;  %v1434_v58 = vrot.slane %v1430_v57, 4 }
0x1061   :  { %v3399_v60 = vsel %vm1316_vm2, 1.0, %v4158_v1 }
0x1062   :  { %v1435_v61 = vmax.f32 %v1430_v57, %v1434_v58  ;;  %3649 = vmatmul.mubr.msk.f32.vlgmr.msra.gmra.mrb[12].mxu1 %vm345_vm3, %v3399_v60 }
0x1063   :  { %3848 = vmatpush3.bf16.msra.mxu1 %v4219_v5  ;;  %3670 = vmatprep.mubr.msk.f32.mxu1 %vm4157_vm0, %v4158_v1 }
0x1064   :  { %v1436_v62 = vrot.slane %v1435_v61, 2  ;;  %3849 = vmatprep.subr.bf16.mxu1 %v4156_v0 }
0x1066   :  { %v1437_v2 = vmax.f32 %v1435_v61, %v1436_v62 }
0x1067   :  { %3851 = vmatpush3.bf16.msra.mxu1 %v4222_v12 }
0x1068   :  { %v1438_v3 = vrot.slane %v1437_v2, 1  ;;  %3855 = vmatprep.subr.bf16.mxu1 %v4156_v0 }
0x106a   :  { %v1439_v10 = vmax.f32 %v1437_v2, %v1438_v3 }
0x106c   :  { %v1446_v27 = vsub.f32 %v1430_v57, %v1439_v10 }
0x106e   :  { %v1448_v13 = vmul.f32 1.442695, %v1446_v27  ;;  %v1564_v27 = vpop.permute.xlu1 %1563 }
0x1070   :  { %3983 = vpow2.f32 %v1448_v13 }
0x1071   :  { %3985 = vrcp.f32 %v1463_v14 }
0x107a   :  { %v3984_v16 = vpop.eup %3983 }
0x107b   :  { %v1452_v30 = vrot.slane %v3984_v16, 4  ;;  %v3986_v19 = vpop.eup %3985 }
0x107c   :  { %v1467_v29 = vmul.f32 %v3986_v19, %v3982_v49 }
0x107d   :  { %v1453_v17 = vadd.f32 %v3984_v16, %v1452_v30  ;;  %v1574_v30 = vpop.permute.xlu1 %1573 }
0x107e   :  { %v1469_v32 = vmul.f32 %v1467_v29, %v4283_v43  ;;  %v3275_v47 = vrot.slane %v1467_v29, %v3270_v40 }
0x107f   :  { %v1454_v20 = vrot.slane %v1453_v17, 2 }
0x1080   :  { %v1477_v34 = vsel %vm323_vm4, %v1469_v32, 0.0 }
0x1081   :  { %v1455_v23 = vadd.f32 %v1454_v20, %v1453_v17  ;;  %v1478_v37 = vrot.slane %v1477_v34, 4 }
0x1083   :  { %v1456_v25 = vrot.slane %v1455_v23, 1  ;;  %v1479_v42 = vadd.f32 %v1478_v37, %v1477_v34 }
0x1085   :  { %v1457_v31 = vadd.f32 %v1456_v25, %v1455_v23  ;;  %v1480_v48 = vrot.slane %v1479_v42, 2 }
0x1087   :  { %3987 = vrcp.f32 %v1457_v31  ;;  %v1481_v55 = vadd.f32 %v1480_v48, %v1479_v42 }
0x1089   :  { %v1482_v59 = vrot.slane %v1481_v55, 1 }
0x108b   :  { %v1483_v62 = vadd.f32 %v1482_v59, %v1481_v55 }
0x1091   :  { %v3988_v41 = vpop.eup %3987 }
0x1092   :  { %v1466_v44 = vmul.f32 %v3988_v41, %v3984_v16  ;;  %v4554_v41 = vld [vmem:[%s4875_s3] ss:$0 sm:$0xff] }
0x1094   :  { %v1468_v45 = vmul.f32 %v1466_v44, %v4278_v39  ;;  %v3271_v9 = vrot.slane %v1466_v44, %v3270_v40 }
0x1096   :  { %v1470_v49 = vsel %vm323_vm4, %v1468_v45, 0.0  ;;  %v3276_v52 = vsel %vm340_vm5, %v3275_v47, %v3271_v9 }
0x1097   :  { %v1471_v54 = vrot.slane %v1470_v49, 4  ;;  %v4525_v4 = vsel %vm3345_vm7, %v4458_v33, %v3276_v52 }
0x1099   :  { %v1472_v46 = vadd.f32 %v1471_v54, %v1470_v49  ;;  %v4569_v54 = vld [vmem:[%s4875_s3 + $0x2] ss:$0 sm:$0xff] }
0x109b   :  { %v1473_v57 = vrot.slane %v1472_v46, 2 }
0x109d   :  { %v1474_v58 = vadd.f32 %v1473_v57, %v1472_v46 }
0x109f   :  { %v1475_v60 = vrot.slane %v1474_v58, 1 }
0x10a1   :  { %v1476_v61 = vadd.f32 %v1475_v60, %v1474_v58 }
0x10a3   :  { %v1486_v63 = vsel %vm340_vm5, %v1483_v62, %v1476_v61 }
0x10a4   :  { %1487 = vrot.lane.b32.xlu0 %v1486_v63, %s4161_s23 }
0x1116   :  { %v1488_v2 = vpop.permute.xlu0 %1487 }
0x1135   :  { %v1559_v3 = vpop.f32.mrb[12].mxu1 }
0x1136   :  { %v1560_v7 = vadd.f32 %v1559_v3, %v1488_v2  ;;  %v3650_v10 = vpop.f32.mrb[13].mxu1 }
0x1138   :  { %v1566_v11 = vadd.f32 %v1564_v27, %v1560_v7 }
0x113a   :  { %v3402_v33 = vmul.f32 -1.442695, %v1566_v11 }
0x113c   :  { %3989 = vpow2.f32 %v3402_v33 }
0x1146   :  { %v3990_v13 = vpop.eup %3989 }
0x1147   :  { %v1570_v14 = vadd.f32 1.0, %v3990_v13 }
0x1149   :  { %3991 = vrcp.f32 %v1570_v14 }
0x1153   :  { %v3992_v16 = vpop.eup %3991 }
0x1154   :  { %v1576_v17 = vmul.f32 %v3992_v16, %v1574_v30  ;;  %v1583_v29 = vsub.f32 1.0, %v3992_v16  ;;  %v1589_v31 = vmul.f32 %v3992_v16, %v4467_v51 }
0x1156   :  { %1578 = vrot.lane.b32.xlu0 %v1576_v17, %s4162_s24 }
0x11c8   :  { %v1579_v19 = vpop.permute.xlu0 %1578 }
0x11c9   :  { %v1581_v20 = vadd.f32 %v1579_v19, %v1560_v7 }
0x11cb   :  { %3993 = vtanh.f32 %v1581_v20 }
0x11d5   :  { %v3994_v23 = vpop.eup %3993 }
0x11d6   :  { %1585 = vrot.lane.b32.xlu1 %v3994_v23, %s4161_s23 }
0x1248   :  { %v1586_v25 = vpop.permute.xlu1 %1585 }
0x1249   :  { %v1588_v32 = vmul.f32 %v1586_v25, %v1583_v29 }
0x124b   :  { %v4532_v34 = vadd.f32 %v1589_v31, %v1588_v32 }
0x124d   :  { %1592 = vrot.lane.b32.xlu0 %v4532_v34, %s4161_s23 }
0x12bf   :  { %v1593_v36 = vpop.permute.xlu0 %1592 }
0x12c0   :  { %3660 = vmatmul.mubr.msk.f32.vlgmr.msra.gmra.mrb[10].mxu0 %vm82_vm1, %v1593_v36  ;;  %3671 = vmatmul.mubr.msk.f32.vlgmr.msra.gmra.mrb[14].mxu1 %vm82_vm1, %v1593_v36 }
0x12c1   :  { %3854 = vmatpush3.bf16.msra.mxu0 %v4248_v21  ;;  %3677 = vmatprep.mubr.msk.f32.mxu0 %vm4157_vm0, %v4158_v1 }
0x12c2   :  { %3861 = vmatprep.subr.bf16.mxu0 %v4156_v0  ;;  %3857 = vmatpush3.bf16.msra.mxu1 %v4315_v53 }
0x12c3   :  { %3858 = vmatprep.subr.bf16.mxu1 %v4156_v0  ;;  %3688 = vmatprep.mubr.msk.f32.mxu1 %vm4157_vm0, %v4158_v1 }
0x12c6   :  { %3860 = vmatpush3.bf16.msra.mxu1 %v4318_v22 }
0x12c7   :  { %3867 = vmatprep.subr.bf16.mxu1 %v4156_v0 }
0x1393   :  { %v1662_v51 = vpop.f32.mrb[10].mxu0  ;;  %v1765_v37 = vpop.f32.mrb[14].mxu1 }
0x1394   :  { %v4549_v40 = vadd.f32 %v4345_v15, %v1662_v51  ;;  %v4557_v42 = vadd.f32 %v4554_v41, %v1765_v37  ;;  %v3661_v44 = vpop.f32.mrb[11].mxu0  ;;  %v3672_v45 = vpop.f32.mrb[15].mxu1 }
0x1396   :  { %v1776_v9 = vrot.slane %v4557_v42, %v4264_v28  ;;  %v1666_v47 = vsel %vm525_vm6, %v4549_v40, -inf }
0x1397   :  { %1667 = vmax.xlane.f32.xlu1 %v1666_v47 }
0x1398   :  { %v1784_v15 = vrot.slane %v1776_v9, %v4264_v28  ;;  %v1777_v62 = vcombine.high %v1776_v9, %v1776_v9 }
0x139a   :  { %v1795_v48 = vrot.slane %v1784_v15, %v4275_v35  ;;  %v1791_v63 = vrot.slane %v1777_v62, %v4264_v28 }
0x139c   :  { %v1802_v49 = vadd.f32 %v1795_v48, %v4278_v39  ;;  %v1799_v2 = vrot.slane %v1791_v63, %v4275_v35 }
0x139e   :  { %3995 = vtanh.f32 %v1802_v49  ;;  %v1803_v3 = vadd.f32 %v1799_v2, %v4283_v43 }
0x13a0   :  { %3997 = vtanh.f32 %v1803_v3 }
0x13a8   :  { %v3996_v52 = vpop.eup %3995 }
0x13a9   :  { %v1806_v46 = vmul.f32 %v4569_v54, %v3996_v52 }
0x13aa   :  { %v3998_v10 = vpop.eup %3997 }
0x13ab   :  { %v1808_v55 = vsel %vm82_vm1, %v1806_v46, 0.0  ;;  %v1807_v13 = vmul.f32 %v4569_v54, %v3998_v10 }
0x13ac   :  { %1809 = vadd.xlane.f32.xlu1 %v1808_v55 }
0x13ad   :  { %v1811_v14 = vsel %vm82_vm1, %v1807_v13, 0.0 }
0x1424   :  { %v4573_v57 = vpop.xlane.xlu1 %1667 }
0x1425   :  { %vm1679_vm8 = vcmp.eq.f32.partialorder %v4549_v40, %v4573_v57 }
0x1426   :  { %v1680_v58 = vsel %vm1679_vm8, %v4245_v18, 16  ;;  %vm3332_vm8 = vcmask 392192  }
0x1427   :  { %v1681_v59 = vsel %vm525_vm6, %v1680_v58, 2147483647 }
0x1428   :  { %v1683_v60 = vshra.s32 %v1681_v59, 16  ;;  %v1682_v7 = vand.u32 65535, %v1681_v59 }
0x142a   :  { %v1685_v61 = vcvt.s32.f32 %v1683_v60  ;;  %v1684_v11 = vcvt.s32.f32 %v1682_v7 }
0x142c   :  { %1686 = vmin.xlane.f32.xlu0 %v1685_v61 }
0x1439   :  { %v1810_v16 = vpop.xlane.xlu1 %1809 }
0x143a   :  { %v1814_v30 = vrot.slane %v1810_v16, 4 }
0x143c   :  { %v1815_v17 = vmax.f32 %v1810_v16, %v1814_v30 }
0x143e   :  { %v1816_v19 = vrot.slane %v1815_v17, 2 }
0x1440   :  { %v1817_v20 = vmax.f32 %v1815_v17, %v1816_v19 }
0x1442   :  { %v1818_v23 = vrot.slane %v1817_v20, 1 }
0x1444   :  { %v1819_v29 = vmax.f32 %v1817_v20, %v1818_v23  ;;  %v3280_v20 = vadd.s32 4294967264, %v4245_v18 }
0x1446   :  { %v1826_v25 = vsub.f32 %v1810_v16, %v1819_v29  ;;  %v3283_v29 = vsub.s32 %v3280_v20, %v4256_v26 }
0x1448   :  { %v1828_v31 = vmul.f32 1.442695, %v1826_v25 }
0x144a   :  { %3999 = vpow2.f32 %v1828_v31 }
0x1454   :  { %v4000_v36 = vpop.eup %3999 }
0x1455   :  { %v1832_v45 = vrot.slane %v4000_v36, 4 }
0x1457   :  { %v1833_v48 = vadd.f32 %v4000_v36, %v1832_v45 }
0x1459   :  { %v1834_v55 = vrot.slane %v1833_v48, 2 }
0x145b   :  { %v1835_v60 = vadd.f32 %v1834_v55, %v1833_v48 }
0x145d   :  { %v1836_v63 = vrot.slane %v1835_v60, 1 }
0x145f   :  { %v1837_v3 = vadd.f32 %v1836_v63, %v1835_v60 }
0x14b9   :  { %v1687_v27 = vpop.xlane.xlu0 %1686 }
0x14ba   :  { %vm1688_vm9 = vcmp.eq.f32.partialorder %v1685_v61, %v1687_v27  ;;  %v1693_v32 = vcvt.f32.s32 %v1687_v27 }
0x14bb   :  { %v1689_v33 = vsel %vm1688_vm9, %v1684_v11, inf }
0x14bc   :  { %1690 = vmin.xlane.f32.xlu0 %v1689_v33  ;;  %v1694_v37 = vshll.u32 %v1693_v32, 16 }
0x14c0   :  { %1812 = vadd.xlane.f32.xlu0 %v1811_v14 }
0x14d6   :  { %1943 = vrot.lane.b32.xlu0 %v4557_v42, %s4161_s23 }
0x1549   :  { %v1691_v51 = vpop.xlane.xlu0 %1690 }
0x154a   :  { %v1692_v44 = vcvt.f32.s32 %v1691_v51 }
0x154c   :  { %v1695_v9 = vadd.s32 %v1694_v37, %v1692_v44 }
0x154d   :  { %v1813_v47 = vpop.xlane.xlu0 %1812 }
0x154e   :  { %vm1696_vm10 = vcmp.eq.s32.totalorder %v4245_v18, %v1695_v9  ;;  %v1820_v15 = vrot.slane %v1813_v47, 4 }
0x154f   :  { %v3404_v49 = vsel %vm1696_vm10, 1.0, %v4158_v1 }
0x1550   :  { %v1821_v52 = vmax.f32 %v1813_v47, %v1820_v15  ;;  %3678 = vmatmul.mubr.msk.f32.vlgmr.msra.gmra.mrb[12].mxu0 %vm345_vm3, %v3404_v49 }
0x1551   :  { %3863 = vmatpush3.bf16.msra.mxu0 %v4219_v5  ;;  %3699 = vmatprep.mubr.msk.f32.mxu0 %vm4157_vm0, %v4158_v1 }
0x1552   :  { %v1822_v46 = vrot.slane %v1821_v52, 2  ;;  %3864 = vmatprep.subr.bf16.mxu0 %v4156_v0 }
0x1554   :  { %v1823_v58 = vmax.f32 %v1821_v52, %v1822_v46 }
0x1555   :  { %3866 = vmatpush3.bf16.msra.mxu0 %v4222_v12 }
0x1556   :  { %v1824_v59 = vrot.slane %v1823_v58, 1  ;;  %3870 = vmatprep.subr.bf16.mxu0 %v4156_v0 }
0x1558   :  { %v1825_v61 = vmax.f32 %v1823_v58, %v1824_v59 }
0x155a   :  { %v1827_v62 = vsub.f32 %v1813_v47, %v1825_v61 }
0x155c   :  { %v1830_v2 = vmul.f32 1.442695, %v1827_v62 }
0x155e   :  { %4001 = vpow2.f32 %v1830_v2 }
0x155f   :  { %4003 = vrcp.f32 %v1837_v3  ;;  %v1944_v3 = vpop.permute.xlu0 %1943 }
0x1568   :  { %v4002_v7 = vpop.eup %4001 }
0x1569   :  { %v1838_v10 = vrot.slane %v4002_v7, 4  ;;  %v4004_v11 = vpop.eup %4003 }
0x156a   :  { %v1846_v14 = vmul.f32 %v4004_v11, %v4000_v36 }
0x156b   :  { %v1839_v27 = vadd.f32 %v4002_v7, %v1838_v10 }
0x156c   :  { %v1848_v17 = vmul.f32 %v1846_v14, %v4278_v39  ;;  %v3284_v37 = vrot.slane %v1846_v14, %v3283_v29 }
0x156d   :  { %v1840_v33 = vrot.slane %v1839_v27, 2 }
0x156e   :  { %v1850_v19 = vsel %vm323_vm4, %v1848_v17, 0.0 }
0x156f   :  { %v1841_v13 = vadd.f32 %v1840_v33, %v1839_v27  ;;  %v1851_v23 = vrot.slane %v1850_v19, 4 }
0x1571   :  { %v1842_v16 = vrot.slane %v1841_v13, 1  ;;  %v1852_v31 = vadd.f32 %v1851_v23, %v1850_v19 }
0x1573   :  { %v1843_v30 = vadd.f32 %v1842_v16, %v1841_v13  ;;  %v1853_v36 = vrot.slane %v1852_v31, 2 }
0x1575   :  { %4005 = vrcp.f32 %v1843_v30  ;;  %v1854_v48 = vadd.f32 %v1853_v36, %v1852_v31 }
0x1577   :  { %v1855_v46 = vrot.slane %v1854_v48, 1 }
0x1579   :  { %v1856_v59 = vadd.f32 %v1855_v46, %v1854_v48 }
0x157f   :  { %v4006_v25 = vpop.eup %4005 }
0x1580   :  { %v1847_v32 = vmul.f32 %v4006_v25, %v4002_v7 }
0x1582   :  { %v1849_v51 = vmul.f32 %v1847_v32, %v4283_v43  ;;  %v3288_v44 = vrot.slane %v1847_v32, %v3283_v29  ;;  %v4632_v32 = vld [vmem:[%s4875_s3 + $0x3] ss:$0 sm:$0xff]  ;;  %s4163_s3 = smov 80  }
0x1584   :  { %v1857_v45 = vsel %vm323_vm4, %v1849_v51, 0.0  ;;  %v3289_v9 = vsel %vm340_vm5, %v3288_v44, %v3284_v37 }
0x1585   :  { %v1858_v47 = vrot.slane %v1857_v45, 4  ;;  %v4604_v15 = vsel %vm82_vm1, %v4525_v4, %v3289_v9 }
0x1587   :  { %v1859_v49 = vadd.f32 %v1858_v47, %v1857_v45 }
0x1589   :  { %v1860_v52 = vrot.slane %v1859_v49, 2 }
0x158b   :  { %v1861_v55 = vadd.f32 %v1860_v52, %v1859_v49 }
0x158d   :  { %v1862_v58 = vrot.slane %v1861_v55, 1 }
0x158f   :  { %v1863_v60 = vadd.f32 %v1862_v58, %v1861_v55 }
0x1591   :  { %v1866_v61 = vsel %vm340_vm5, %v1863_v60, %v1856_v59 }
0x1592   :  { %1867 = vrot.lane.b32.xlu1 %v1866_v61, %s4161_s23 }
0x1596   :  { %1953 = vrot.lane.b32.xlu1 %v4557_v42, %s4160_s22 }
0x1604   :  { %v1868_v62 = vpop.permute.xlu1 %1867 }
0x1608   :  { %v1954_v13 = vpop.permute.xlu1 %1953 }
0x1623   :  { %v1939_v63 = vpop.f32.mrb[12].mxu0 }
0x1624   :  { %v1940_v2 = vadd.f32 %v1939_v63, %v1868_v62  ;;  %v3679_v4 = vpop.f32.mrb[13].mxu0 }
0x1626   :  { %v1946_v7 = vadd.f32 %v1944_v3, %v1940_v2 }
0x1628   :  { %v3407_v10 = vmul.f32 -1.442695, %v1946_v7 }
0x162a   :  { %4007 = vpow2.f32 %v3407_v10 }
0x1634   :  { %v4008_v27 = vpop.eup %4007 }
0x1635   :  { %v1950_v11 = vadd.f32 1.0, %v4008_v27 }
0x1637   :  { %4009 = vrcp.f32 %v1950_v11 }
0x1641   :  { %v4010_v33 = vpop.eup %4009 }
0x1642   :  { %v1956_v14 = vmul.f32 %v4010_v33, %v1954_v13  ;;  %v1963_v17 = vsub.f32 1.0, %v4010_v33  ;;  %v1969_v20 = vmul.f32 %v4010_v33, %v4532_v34 }
0x1644   :  { %1958 = vrot.lane.b32.xlu1 %v1956_v14, %s4162_s24 }
0x16b6   :  { %v1959_v16 = vpop.permute.xlu1 %1958 }
0x16b7   :  { %v1961_v30 = vadd.f32 %v1959_v16, %v1940_v2 }
0x16b9   :  { %4011 = vtanh.f32 %v1961_v30 }
0x16c3   :  { %v4012_v42 = vpop.eup %4011 }
0x16c4   :  { %1965 = vrot.lane.b32.xlu0 %v4012_v42, %s4161_s23 }
0x1736   :  { %v1966_v19 = vpop.permute.xlu0 %1965 }
0x1737   :  { %v1968_v23 = vmul.f32 %v1966_v19, %v1963_v17 }
0x1739   :  { %v4613_v29 = vadd.f32 %v1969_v20, %v1968_v23 }
0x173b   :  { %1972 = vrot.lane.b32.xlu1 %v4613_v29, %s4161_s23 }
0x17ad   :  { %v1973_v25 = vpop.permute.xlu1 %1972 }
0x17ae   :  { %3689 = vmatmul.mubr.msk.f32.vlgmr.msra.gmra.mrb[16].mxu1 %vm82_vm1, %v1973_v25  ;;  %3700 = vmatmul.mubr.msk.f32.vlgmr.msra.gmra.mrb[14].mxu0 %vm82_vm1, %v1973_v25 }
0x17af   :  { %3869 = vmatpush3.bf16.msra.mxu1 %v4248_v21  ;;  %3706 = vmatprep.mubr.msk.f32.mxu1 %vm4157_vm0, %v4158_v1 }
0x17b0   :  { %3876 = vmatprep.subr.bf16.mxu1 %v4156_v0  ;;  %3872 = vmatpush3.bf16.msra.mxu0 %v4315_v53 }
0x17b1   :  { %3873 = vmatprep.subr.bf16.mxu0 %v4156_v0  ;;  %3717 = vmatprep.mubr.msk.f32.mxu0 %vm4157_vm0, %v4158_v1 }
0x17b4   :  { %3875 = vmatpush3.bf16.msra.mxu0 %v4318_v22 }
0x17b5   :  { %3882 = vmatprep.subr.bf16.mxu0 %v4156_v0 }
0x1881   :  { %v2042_v34 = vpop.f32.mrb[16].mxu1  ;;  %v2145_v31 = vpop.f32.mrb[14].mxu0 }
0x1882   :  { %v4635_v51 = vadd.f32 %v4632_v32, %v2042_v34  ;;  %v3690_v37 = vpop.f32.mrb[17].mxu1  ;;  %v3701_v44 = vpop.f32.mrb[15].mxu0  ;;  %v2146_v45 = vadd.f32 %v4554_v41, %v2145_v31 }
0x1884   :  { %v2046_v36 = vsel %vm525_vm6, %v4635_v51, -inf  ;;  %v2156_v9 = vrot.slane %v2146_v45, %v4264_v28 }
0x1885   :  { %2047 = vmax.xlane.f32.xlu0 %v2046_v36 }
0x1886   :  { %v2157_v47 = vcombine.high %v2156_v9, %v2156_v9  ;;  %v2164_v2 = vrot.slane %v2156_v9, %v4264_v28 }
0x1888   :  { %v2171_v48 = vrot.slane %v2157_v47, %v4264_v28  ;;  %v2175_v4 = vrot.slane %v2164_v2, %v4275_v35 }
0x188a   :  { %v2179_v49 = vrot.slane %v2171_v48, %v4275_v35  ;;  %v2182_v3 = vadd.f32 %v2175_v4, %v4278_v39 }
0x188c   :  { %v2183_v52 = vadd.f32 %v2179_v49, %v4283_v43 }
0x188e   :  { %4013 = vtanh.f32 %v2183_v52 }
0x188f   :  { %4015 = vtanh.f32 %v2182_v3 }
0x1898   :  { %v4014_v59 = vpop.eup %4013 }
0x1899   :  { %v2187_v62 = vmul.f32 %v4569_v54, %v4014_v59  ;;  %v4016_v10 = vpop.eup %4015 }
0x189a   :  { %v2186_v13 = vmul.f32 %v4569_v54, %v4016_v10 }
0x189b   :  { %v2191_v63 = vsel %vm82_vm1, %v2187_v62, 0.0 }
0x189c   :  { %v2188_v14 = vsel %vm82_vm1, %v2186_v13, 0.0 }
0x1912   :  { %v4644_v46 = vpop.xlane.xlu0 %2047 }
0x1913   :  { %vm2059_vm11 = vcmp.eq.f32.partialorder %v4635_v51, %v4644_v46 }
0x1914   :  { %v2060_v55 = vsel %vm2059_vm11, %v4245_v18, 16  ;;  %vm3351_vm11 = vcmask 457728  }
0x1915   :  { %v2061_v58 = vsel %vm525_vm6, %v2060_v55, 2147483647 }
0x1916   :  { %v2063_v60 = vshra.s32 %v2061_v58, 16  ;;  %v2062_v7 = vand.u32 65535, %v2061_v58 }
0x1918   :  { %v2065_v61 = vcvt.s32.f32 %v2063_v60  ;;  %v2064_v11 = vcvt.s32.f32 %v2062_v7 }
0x191a   :  { %2066 = vmin.xlane.f32.xlu1 %v2065_v61 }
0x191e   :  { %2192 = vadd.xlane.f32.xlu1 %v2191_v63 }
0x192f   :  { %2323 = vrot.lane.b32.xlu1 %v2146_v45, %s4161_s23 }
0x1933   :  { %2333 = vrot.lane.b32.xlu1 %v2146_v45, %s4160_s22 }
0x19a7   :  { %v2067_v27 = vpop.xlane.xlu1 %2066 }
0x19a8   :  { %vm2068_vm12 = vcmp.eq.f32.partialorder %v2065_v61, %v2067_v27  ;;  %v2073_v31 = vcvt.f32.s32 %v2067_v27 }
0x19a9   :  { %v2069_v33 = vsel %vm2068_vm12, %v2064_v11, inf  ;;  %vm3340_vm12 = vcmask 916480  }
0x19aa   :  { %2070 = vmin.xlane.f32.xlu0 %v2069_v33  ;;  %v2074_v36 = vshll.u32 %v2073_v31, 16 }
0x19ab   :  { %v2193_v16 = vpop.xlane.xlu1 %2192 }
0x19ac   :  { %v2200_v30 = vrot.slane %v2193_v16, 4 }
0x19ae   :  { %2189 = vadd.xlane.f32.xlu0 %v2188_v14  ;;  %v2201_v42 = vmax.f32 %v2193_v16, %v2200_v30 }
0x19b0   :  { %v2202_v17 = vrot.slane %v2201_v42, 2 }
0x19b2   :  { %v2203_v19 = vmax.f32 %v2201_v42, %v2202_v17 }
0x19b4   :  { %v2204_v20 = vrot.slane %v2203_v19, 1 }
0x19b6   :  { %v2205_v23 = vmax.f32 %v2203_v19, %v2204_v20 }
0x19b8   :  { %v2207_v25 = vsub.f32 %v2193_v16, %v2205_v23  ;;  %v3293_v23 = vadd.s32 4294967256, %v4245_v18 }
0x19ba   :  { %v2210_v34 = vmul.f32 1.442695, %v2207_v25 }
0x19bc   :  { %4017 = vpow2.f32 %v2210_v34  ;;  %v3296_v34 = vsub.s32 %v3293_v23, %v4256_v26 }
0x19c6   :  { %v4018_v37 = vpop.eup %4017 }
0x19c7   :  { %v2218_v9 = vrot.slane %v4018_v37, 4 }
0x19c9   :  { %v2219_v52 = vadd.f32 %v4018_v37, %v2218_v9 }
0x19cb   :  { %v2220_v60 = vrot.slane %v2219_v52, 2 }
0x19cd   :  { %v2221_v63 = vadd.f32 %v2220_v60, %v2219_v52 }
0x19cf   :  { %v2222_v3 = vrot.slane %v2221_v63, 1 }
0x19d1   :  { %v2223_v10 = vadd.f32 %v2222_v3, %v2221_v63 }
0x1a37   :  { %v2071_v44 = vpop.xlane.xlu0 %2070 }
0x1a38   :  { %v2072_v45 = vcvt.f32.s32 %v2071_v44 }
0x1a3a   :  { %v2075_v47 = vadd.s32 %v2074_v36, %v2072_v45 }
0x1a3b   :  { %v2190_v48 = vpop.xlane.xlu0 %2189 }
0x1a3c   :  { %vm2076_vm13 = vcmp.eq.s32.totalorder %v4245_v18, %v2075_v47  ;;  %v2194_v49 = vrot.slane %v2190_v48, 4 }
0x1a3d   :  { %v3409_v55 = vsel %vm2076_vm13, 1.0, %v4158_v1 }
0x1a3e   :  { %v2195_v58 = vmax.f32 %v2190_v48, %v2194_v49  ;;  %3707 = vmatmul.mubr.msk.f32.vlgmr.msra.gmra.mrb[18].mxu1 %vm345_vm3, %v3409_v55 }
0x1a3f   :  { %3878 = vmatpush3.bf16.msra.mxu1 %v4219_v5  ;;  %3728 = vmatprep.mubr.msk.f32.mxu1 %vm4157_vm0, %v4158_v1 }
0x1a40   :  { %v2196_v59 = vrot.slane %v2195_v58, 2  ;;  %3879 = vmatprep.subr.bf16.mxu1 %v4156_v0 }
0x1a42   :  { %v2197_v61 = vmax.f32 %v2195_v58, %v2196_v59 }
0x1a43   :  { %3881 = vmatpush3.bf16.msra.mxu1 %v4222_v12 }
0x1a44   :  { %v2198_v62 = vrot.slane %v2197_v61, 1  ;;  %3885 = vmatprep.subr.bf16.mxu1 %v4156_v0 }
0x1a46   :  { %v2199_v2 = vmax.f32 %v2197_v61, %v2198_v62 }
0x1a48   :  { %v2206_v4 = vsub.f32 %v2190_v48, %v2199_v2 }
0x1a4a   :  { %v2208_v7 = vmul.f32 1.442695, %v2206_v4 }
0x1a4c   :  { %4019 = vpow2.f32 %v2208_v7 }
0x1a4d   :  { %4021 = vrcp.f32 %v2223_v10 }
0x1a56   :  { %v4020_v27 = vpop.eup %4019 }
0x1a57   :  { %v2212_v11 = vrot.slane %v4020_v27, 4  ;;  %v4022_v13 = vpop.eup %4021 }
0x1a58   :  { %v2227_v30 = vmul.f32 %v4022_v13, %v4018_v37 }
0x1a59   :  { %v2213_v33 = vadd.f32 %v4020_v27, %v2212_v11 }
0x1a5a   :  { %v2229_v19 = vmul.f32 %v2227_v30, %v4283_v43  ;;  %v3301_v47 = vrot.slane %v2227_v30, %v3296_v34 }
0x1a5b   :  { %v2214_v14 = vrot.slane %v2213_v33, 2 }
0x1a5c   :  { %v2237_v20 = vsel %vm323_vm4, %v2229_v19, 0.0 }
0x1a5d   :  { %v2215_v16 = vadd.f32 %v2214_v14, %v2213_v33  ;;  %v2238_v25 = vrot.slane %v2237_v20, 4  ;;  %v2324_v33 = vpop.permute.xlu1 %2323 }
0x1a5f   :  { %v2216_v42 = vrot.slane %v2215_v16, 1  ;;  %v2239_v44 = vadd.f32 %v2238_v25, %v2237_v20 }
0x1a61   :  { %v2217_v17 = vadd.f32 %v2216_v42, %v2215_v16  ;;  %v2240_v37 = vrot.slane %v2239_v44, 2  ;;  %v2334_v42 = vpop.permute.xlu1 %2333 }
0x1a63   :  { %4023 = vrcp.f32 %v2217_v17  ;;  %v2241_v59 = vadd.f32 %v2240_v37, %v2239_v44 }
0x1a65   :  { %v2242_v62 = vrot.slane %v2241_v59, 1 }
0x1a67   :  { %v2243_v4 = vadd.f32 %v2242_v62, %v2241_v59 }
0x1a6d   :  { %v4024_v31 = vpop.eup %4023 }
0x1a6e   :  { %v2226_v36 = vmul.f32 %v4024_v31, %v4020_v27 }
0x1a70   :  { %v2228_v45 = vmul.f32 %v2226_v36, %v4278_v39  ;;  %v3297_v9 = vrot.slane %v2226_v36, %v3296_v34 }
0x1a72   :  { %v2230_v48 = vsel %vm323_vm4, %v2228_v45, 0.0  ;;  %v3302_v49 = vsel %vm340_vm5, %v3301_v47, %v3297_v9 }
0x1a73   :  { %v2231_v52 = vrot.slane %v2230_v48, 4  ;;  %v4676_v55 = vsel %vm3348_vm14, %v4604_v15, %v3302_v49 }
0x1a75   :  { %v2232_v58 = vadd.f32 %v2231_v52, %v2230_v48 }
0x1a77   :  { %v2233_v60 = vrot.slane %v2232_v58, 2 }
0x1a79   :  { %v2234_v61 = vadd.f32 %v2233_v60, %v2232_v58 }
0x1a7b   :  { %v2235_v63 = vrot.slane %v2234_v61, 1 }
0x1a7d   :  { %v2236_v2 = vadd.f32 %v2235_v63, %v2234_v61 }
0x1a7f   :  { %v2246_v3 = vsel %vm340_vm5, %v2243_v4, %v2236_v2 }
0x1a80   :  { %2247 = vrot.lane.b32.xlu0 %v2246_v3, %s4161_s23 }
0x1af2   :  { %v2248_v7 = vpop.permute.xlu0 %2247 }
0x1b11   :  { %v2319_v10 = vpop.f32.mrb[18].mxu1 }
0x1b12   :  { %v2320_v27 = vadd.f32 %v2319_v10, %v2248_v7  ;;  %v3708_v11 = vpop.f32.mrb[19].mxu1 }
0x1b14   :  { %v2326_v13 = vadd.f32 %v2324_v33, %v2320_v27 }
0x1b16   :  { %v3412_v15 = vmul.f32 -1.442695, %v2326_v13 }
0x1b18   :  { %4025 = vpow2.f32 %v3412_v15 }
0x1b22   :  { %v4026_v14 = vpop.eup %4025 }
0x1b23   :  { %v2330_v16 = vadd.f32 1.0, %v4026_v14 }
0x1b25   :  { %4027 = vrcp.f32 %v2330_v16 }
0x1b2f   :  { %v4028_v30 = vpop.eup %4027 }
0x1b30   :  { %v2336_v17 = vmul.f32 %v4028_v30, %v2334_v42  ;;  %v2343_v25 = vsub.f32 1.0, %v4028_v30  ;;  %v2349_v31 = vmul.f32 %v4028_v30, %v4613_v29 }
0x1b32   :  { %2338 = vrot.lane.b32.xlu0 %v2336_v17, %s4162_s24 }
0x1ba4   :  { %v2339_v19 = vpop.permute.xlu0 %2338 }
0x1ba5   :  { %v2341_v20 = vadd.f32 %v2339_v19, %v2320_v27 }
0x1ba7   :  { %4029 = vtanh.f32 %v2341_v20 }
0x1bb1   :  { %v4030_v23 = vpop.eup %4029 }
0x1bb2   :  { %2345 = vrot.lane.b32.xlu1 %v4030_v23, %s4161_s23 }
0x1c24   :  { %v2346_v34 = vpop.permute.xlu1 %2345 }
0x1c25   :  { %v2348_v44 = vmul.f32 %v2346_v34, %v2343_v25 }
0x1c27   :  { %v4683_v36 = vadd.f32 %v2349_v31, %v2348_v44 }
0x1c29   :  { %2352 = vrot.lane.b32.xlu0 %v4683_v36, %s4161_s23 }
0x1c9b   :  { %v2353_v45 = vpop.permute.xlu0 %2352 }
0x1c9c   :  { %3718 = vmatmul.mubr.msk.f32.vlgmr.msra.gmra.mrb[16].mxu0 %vm82_vm1, %v2353_v45  ;;  %3729 = vmatmul.mubr.msk.f32.vlgmr.msra.gmra.mrb[20].mxu1 %vm82_vm1, %v2353_v45 }
0x1c9d   :  { %3884 = vmatpush3.bf16.msra.mxu0 %v4248_v21  ;;  %3735 = vmatprep.mubr.msk.f32.mxu0 %vm4157_vm0, %v4158_v1 }
0x1c9e   :  { %3891 = vmatprep.subr.bf16.mxu0 %v4156_v0  ;;  %3887 = vmatpush3.bf16.msra.mxu1 %v4315_v53 }
0x1c9f   :  { %3888 = vmatprep.subr.bf16.mxu1 %v4156_v0  ;;  %3746 = vmatprep.mubr.msk.f32.mxu1 %vm4157_vm0, %v4158_v1 }
0x1ca2   :  { %3890 = vmatpush3.bf16.msra.mxu1 %v4318_v22 }
0x1ca3   :  { %3897 = vmatprep.subr.bf16.mxu1 %v4156_v0 }
0x1d6f   :  { %v2422_v29 = vpop.f32.mrb[16].mxu0  ;;  %v2525_v9 = vpop.f32.mrb[20].mxu1 }
0x1d70   :  { %v4700_v47 = vadd.f32 %v4632_v32, %v2422_v29  ;;  %v4703_v37 = vadd.f32 %v4554_v41, %v2525_v9  ;;  %v3719_v48 = vpop.f32.mrb[17].mxu0  ;;  %v3730_v49 = vpop.f32.mrb[21].mxu1 }
0x1d72   :  { %v2536_v52 = vrot.slane %v4703_v37, %v4264_v28  ;;  %v2426_v58 = vsel %vm525_vm6, %v4700_v47, -inf }
0x1d73   :  { %2427 = vmax.xlane.f32.xlu1 %v2426_v58 }
0x1d74   :  { %v2544_v59 = vrot.slane %v2536_v52, %v4264_v28  ;;  %v2537_v11 = vcombine.high %v2536_v52, %v2536_v52 }
0x1d76   :  { %v2555_v60 = vrot.slane %v2544_v59, %v4275_v35  ;;  %v2551_v33 = vrot.slane %v2537_v11, %v4264_v28 }
0x1d78   :  { %v2562_v61 = vadd.f32 %v2555_v60, %v4278_v39  ;;  %v2559_v13 = vrot.slane %v2551_v33, %v4275_v35 }
0x1d7a   :  { %4031 = vtanh.f32 %v2562_v61  ;;  %v2563_v15 = vadd.f32 %v2559_v13, %v4283_v43 }
0x1d7c   :  { %4033 = vtanh.f32 %v2563_v15 }
0x1d84   :  { %v4032_v62 = vpop.eup %4031 }
0x1d85   :  { %v2566_v63 = vmul.f32 %v4569_v54, %v4032_v62 }
0x1d86   :  { %v4034_v16 = vpop.eup %4033 }
0x1d87   :  { %v2568_v2 = vsel %vm82_vm1, %v2566_v63, 0.0  ;;  %v2567_v19 = vmul.f32 %v4569_v54, %v4034_v16 }
0x1d88   :  { %2569 = vadd.xlane.f32.xlu1 %v2568_v2 }
0x1d89   :  { %v2571_v20 = vsel %vm82_vm1, %v2567_v19, 0.0 }
0x1e00   :  { %v4714_v4 = vpop.xlane.xlu1 %2427 }
0x1e01   :  { %vm2439_vm15 = vcmp.eq.f32.partialorder %v4700_v47, %v4714_v4 }
0x1e02   :  { %v2440_v3 = vsel %vm2439_vm15, %v4245_v18, 16 }
0x1e03   :  { %v2441_v7 = vsel %vm525_vm6, %v2440_v3, 2147483647 }
0x1e04   :  { %v2443_v10 = vshra.s32 %v2441_v7, 16  ;;  %v2442_v14 = vand.u32 65535, %v2441_v7 }
0x1e06   :  { %v2445_v27 = vcvt.s32.f32 %v2443_v10  ;;  %v2444_v42 = vcvt.s32.f32 %v2442_v14 }
0x1e08   :  { %2446 = vmin.xlane.f32.xlu0 %v2445_v27 }
0x1e15   :  { %v2570_v23 = vpop.xlane.xlu1 %2569 }
0x1e16   :  { %v2574_v25 = vrot.slane %v2570_v23, 4 }
0x1e18   :  { %v2575_v34 = vmax.f32 %v2570_v23, %v2574_v25 }
0x1e1a   :  { %v2576_v31 = vrot.slane %v2575_v34, 2 }
0x1e1c   :  { %v2577_v44 = vmax.f32 %v2575_v34, %v2576_v31 }
0x1e1e   :  { %v2578_v45 = vrot.slane %v2577_v44, 1 }
0x1e20   :  { %v2579_v29 = vmax.f32 %v2577_v44, %v2578_v45 }
0x1e22   :  { %v2586_v9 = vsub.f32 %v2570_v23, %v2579_v29 }
0x1e24   :  { %v2588_v48 = vmul.f32 1.442695, %v2586_v9  ;;  %v3306_v9 = vadd.s32 4294967248, %v4245_v18 }
0x1e26   :  { %4035 = vpow2.f32 %v2588_v48 }
0x1e30   :  { %v4036_v52 = vpop.eup %4035 }
0x1e31   :  { %v2592_v61 = vrot.slane %v4036_v52, 4 }
0x1e33   :  { %v2593_v3 = vadd.f32 %v4036_v52, %v2592_v61 }
0x1e35   :  { %v2594_v11 = vrot.slane %v2593_v3, 2 }
0x1e37   :  { %v2595_v15 = vadd.f32 %v2594_v11, %v2593_v3 }
0x1e95   :  { %v2447_v30 = vpop.xlane.xlu0 %2446 }
0x1e96   :  { %vm2448_vm2 = vcmp.eq.f32.partialorder %v2445_v27, %v2447_v30  ;;  %v2453_v49 = vcvt.f32.s32 %v2447_v30  ;;  %v2596_v30 = vrot.slane %v2595_v15, 1 }
0x1e97   :  { %v2449_v17 = vsel %vm2448_vm2, %v2444_v42, inf }
0x1e98   :  { %2450 = vmin.xlane.f32.xlu0 %v2449_v17  ;;  %v2454_v59 = vshll.u32 %v2453_v49, 16  ;;  %v3309_v49 = vsub.s32 %v3306_v9, %v4256_v26 }
0x1e9c   :  { %2572 = vadd.xlane.f32.xlu0 %v2571_v20 }
0x1eb2   :  { %2703 = vrot.lane.b32.xlu0 %v4703_v37, %s4161_s23 }
0x1f25   :  { %v2451_v58 = vpop.xlane.xlu0 %2450 }
0x1f26   :  { %v2452_v60 = vcvt.f32.s32 %v2451_v58 }
0x1f28   :  { %v2455_v62 = vadd.s32 %v2454_v59, %v2452_v60 }
0x1f29   :  { %v2573_v63 = vpop.xlane.xlu0 %2572 }
0x1f2a   :  { %vm2456_vm7 = vcmp.eq.s32.totalorder %v4245_v18, %v2455_v62  ;;  %v2580_v2 = vrot.slane %v2573_v63, 4 }
0x1f2b   :  { %v3414_v7 = vsel %vm2456_vm7, 1.0, %v4158_v1 }
0x1f2c   :  { %v2581_v10 = vmax.f32 %v2573_v63, %v2580_v2  ;;  %3736 = vmatmul.mubr.msk.f32.vlgmr.msra.gmra.mrb[18].mxu0 %vm345_vm3, %v3414_v7 }
0x1f2d   :  { %3893 = vmatpush3.bf16.msra.mxu0 %v4219_v5  ;;  %3757 = vmatprep.mubr.msk.f32.mxu0 %vm4157_vm0, %v4158_v1  ;;  %v2597_v5 = vadd.f32 %v2596_v30, %v2595_v15 }
0x1f2e   :  { %v2582_v27 = vrot.slane %v2581_v10, 2  ;;  %3894 = vmatprep.subr.bf16.mxu0 %v4156_v0 }
0x1f30   :  { %v2583_v33 = vmax.f32 %v2581_v10, %v2582_v27 }
0x1f31   :  { %3896 = vmatpush3.bf16.msra.mxu0 %v4222_v12 }
0x1f32   :  { %v2584_v13 = vrot.slane %v2583_v33, 1  ;;  %3900 = vmatprep.subr.bf16.mxu0 %v4156_v0 }
0x1f34   :  { %v2585_v14 = vmax.f32 %v2583_v33, %v2584_v13 }
0x1f36   :  { %v2587_v16 = vsub.f32 %v2573_v63, %v2585_v14 }
0x1f38   :  { %v2590_v42 = vmul.f32 1.442695, %v2587_v16 }
0x1f3a   :  { %4037 = vpow2.f32 %v2590_v42 }
0x1f3b   :  { %4039 = vrcp.f32 %v2597_v5 }
0x1f44   :  { %v4038_v17 = vpop.eup %4037 }
0x1f45   :  { %v2598_v19 = vrot.slane %v4038_v17, 4  ;;  %v4040_v23 = vpop.eup %4039 }
0x1f46   :  { %v2606_v31 = vmul.f32 %v4040_v23, %v4036_v52 }
0x1f47   :  { %v2599_v20 = vadd.f32 %v4038_v17, %v2598_v19 }
0x1f48   :  { %v2608_v45 = vmul.f32 %v2606_v31, %v4278_v39  ;;  %v3310_v62 = vrot.slane %v2606_v31, %v3309_v49 }
0x1f49   :  { %v2600_v25 = vrot.slane %v2599_v20, 2 }
0x1f4a   :  { %v2610_v29 = vsel %vm323_vm4, %v2608_v45, 0.0 }
0x1f4b   :  { %v2601_v34 = vadd.f32 %v2600_v25, %v2599_v20  ;;  %v2611_v48 = vrot.slane %v2610_v29, 4  ;;  %v2704_v20 = vpop.permute.xlu0 %2703 }
0x1f4d   :  { %v2602_v44 = vrot.slane %v2601_v34, 1  ;;  %v2612_v59 = vadd.f32 %v2611_v48, %v2610_v29 }
0x1f4f   :  { %v2603_v12 = vadd.f32 %v2602_v44, %v2601_v34  ;;  %v2613_v63 = vrot.slane %v2612_v59, 2 }
0x1f51   :  { %4041 = vrcp.f32 %v2603_v12  ;;  %v2614_v27 = vadd.f32 %v2613_v63, %v2612_v59 }
0x1f53   :  { %v2615_v13 = vrot.slane %v2614_v27, 1 }
0x1f55   :  { %v2616_v16 = vadd.f32 %v2615_v13, %v2614_v27 }
0x1f5b   :  { %v4042_v58 = vpop.eup %4041 }
0x1f5c   :  { %v2607_v60 = vmul.f32 %v4042_v58, %v4038_v17 }
0x1f5e   :  { %v2609_v61 = vmul.f32 %v2607_v60, %v4283_v43  ;;  %v3314_v52 = vrot.slane %v2607_v60, %v3309_v49 }
0x1f60   :  { %v2617_v2 = vsel %vm323_vm4, %v2609_v61, 0.0  ;;  %v3315_v3 = vsel %vm340_vm5, %v3314_v52, %v3310_v62 }
0x1f61   :  { %v2618_v7 = vrot.slane %v2617_v2, 4  ;;  %v4745_v10 = vsel %vm3332_vm8, %v4676_v55, %v3315_v3 }
0x1f63   :  { %v2619_v11 = vadd.f32 %v2618_v7, %v2617_v2 }
0x1f65   :  { %v2620_v33 = vrot.slane %v2619_v11, 2 }
0x1f67   :  { %v2621_v15 = vadd.f32 %v2620_v33, %v2619_v11 }
0x1f69   :  { %v2622_v14 = vrot.slane %v2621_v15, 1 }
0x1f6b   :  { %v2623_v30 = vadd.f32 %v2622_v14, %v2621_v15 }
0x1f6d   :  { %v2626_v42 = vsel %vm340_vm5, %v2623_v30, %v2616_v16 }
0x1f6e   :  { %2627 = vrot.lane.b32.xlu1 %v2626_v42, %s4161_s23 }
0x1f72   :  { %2713 = vrot.lane.b32.xlu1 %v4703_v37, %s4160_s22 }
0x1fe0   :  { %v2628_v5 = vpop.permute.xlu1 %2627 }
0x1fe4   :  { %v2714_v12 = vpop.permute.xlu1 %2713 }
0x1fff   :  { %v2699_v17 = vpop.f32.mrb[18].mxu0 }
0x2000   :  { %v2700_v19 = vadd.f32 %v2699_v17, %v2628_v5  ;;  %v3737_v55 = vpop.f32.mrb[19].mxu0 }
0x2002   :  { %v2706_v23 = vadd.f32 %v2704_v20, %v2700_v19 }
0x2004   :  { %v3417_v25 = vmul.f32 -1.442695, %v2706_v23 }
0x2006   :  { %4043 = vpow2.f32 %v3417_v25 }
0x2010   :  { %v4044_v34 = vpop.eup %4043 }
0x2011   :  { %v2710_v31 = vadd.f32 1.0, %v4044_v34 }
0x2013   :  { %4045 = vrcp.f32 %v2710_v31 }
0x201d   :  { %v4046_v44 = vpop.eup %4045 }
0x201e   :  { %v2716_v45 = vmul.f32 %v4046_v44, %v2714_v12  ;;  %v2723_v48 = vsub.f32 1.0, %v4046_v44  ;;  %v2729_v58 = vmul.f32 %v4046_v44, %v4683_v36 }
0x2020   :  { %2718 = vrot.lane.b32.xlu1 %v2716_v45, %s4162_s24 }
0x2092   :  { %v2719_v29 = vpop.permute.xlu1 %2718 }
0x2093   :  { %v2721_v9 = vadd.f32 %v2719_v29, %v2700_v19 }
0x2095   :  { %4047 = vtanh.f32 %v2721_v9 }
0x209f   :  { %v4048_v37 = vpop.eup %4047 }
0x20a0   :  { %2725 = vrot.lane.b32.xlu0 %v4048_v37, %s4161_s23 }
0x2112   :  { %v2726_v49 = vpop.permute.xlu0 %2725 }
0x2113   :  { %v2728_v59 = vmul.f32 %v2726_v49, %v2723_v48 }
0x2115   :  { %v4754_v60 = vadd.f32 %v2729_v58, %v2728_v59 }
0x2117   :  { %2732 = vrot.lane.b32.xlu1 %v4754_v60, %s4161_s23 }
0x2189   :  { %v2733_v61 = vpop.permute.xlu1 %2732 }
0x218a   :  { %3747 = vmatmul.mubr.msk.f32.vlgmr.msra.gmra.mrb[22].mxu1 %vm82_vm1, %v2733_v61  ;;  %3758 = vmatmul.mubr.msk.f32.vlgmr.msra.gmra.mrb[20].mxu0 %vm82_vm1, %v2733_v61 }
0x218b   :  { %3899 = vmatpush3.bf16.msra.mxu1 %v4248_v21  ;;  %3764 = vmatprep.mubr.msk.f32.mxu1 %vm4157_vm0, %v4158_v1 }
0x218c   :  { %3902 = vmatpush3.bf16.msra.mxu0 %v4315_v53  ;;  %3775 = vmatprep.mubr.msk.f32.mxu0 %vm4157_vm0, %v4158_v1 }
0x218d   :  { %3903 = vmatprep.subr.bf16.mxu0 %v4156_v0 }
0x2190   :  { %3905 = vmatpush3.bf16.msra.mxu0 %v4318_v22 }
0x225d   :  { %v2802_v36 = vpop.f32.mrb[22].mxu1  ;;  %v2905_v62 = vpop.f32.mrb[20].mxu0 }
0x225e   :  { %v4769_v52 = vadd.f32 %v4632_v32, %v2802_v36  ;;  %v3748_v63 = vpop.f32.mrb[23].mxu1  ;;  %v3759_v2 = vpop.f32.mrb[21].mxu0  ;;  %v2906_v53 = vadd.f32 %v4554_v41, %v2905_v62 }
0x2260   :  { %v2806_v21 = vsel %vm525_vm6, %v4769_v52, -inf  ;;  %v2916_v3 = vrot.slane %v2906_v53, %v4264_v28 }
0x2261   :  { %2807 = vmax.xlane.f32.xlu0 %v2806_v21 }
0x2262   :  { %v2917_v7 = vcombine.high %v2916_v3, %v2916_v3  ;;  %v2924_v42 = vrot.slane %v2916_v3, %v4264_v28 }
0x2264   :  { %v2931_v0 = vrot.slane %v2917_v7, %v4264_v28  ;;  %v2935_v5 = vrot.slane %v2924_v42, %v4275_v35 }
0x2266   :  { %v2939_v22 = vrot.slane %v2931_v0, %v4275_v35  ;;  %v2942_v17 = vadd.f32 %v2935_v5, %v4278_v39 }
0x2268   :  { %v2943_v27 = vadd.f32 %v2939_v22, %v4283_v43 }
0x226a   :  { %4049 = vtanh.f32 %v2943_v27 }
0x226b   :  { %4051 = vtanh.f32 %v2942_v17 }
0x2274   :  { %v4050_v41 = vpop.eup %4049 }
0x2275   :  { %v2947_v16 = vmul.f32 %v4569_v54, %v4050_v41  ;;  %v4052_v55 = vpop.eup %4051 }
0x2276   :  { %v2946_v34 = vmul.f32 %v4569_v54, %v4052_v55 }
0x2277   :  { %v2951_v30 = vsel %vm82_vm1, %v2947_v16, 0.0 }
0x2278   :  { %v2948_v31 = vsel %vm82_vm1, %v2946_v34, 0.0 }
0x22ee   :  { %v4778_v11 = vpop.xlane.xlu0 %2807 }
0x22ef   :  { %vm2819_vm0 = vcmp.eq.f32.partialorder %v4769_v52, %v4778_v11 }
0x22f0   :  { %v2820_v33 = vsel %vm2819_vm0, %v4245_v18, 16 }
0x22f1   :  { %v2821_v13 = vsel %vm525_vm6, %v2820_v33, 2147483647 }
0x22f2   :  { %v2823_v15 = vshra.s32 %v2821_v13, 16  ;;  %v2822_v19 = vand.u32 65535, %v2821_v13 }
0x22f4   :  { %v2825_v14 = vcvt.s32.f32 %v2823_v15  ;;  %v2824_v23 = vcvt.s32.f32 %v2822_v19 }
0x22f6   :  { %2826 = vmin.xlane.f32.xlu1 %v2825_v14 }
0x22fa   :  { %2952 = vadd.xlane.f32.xlu1 %v2951_v30 }
0x230b   :  { %3083 = vrot.lane.b32.xlu1 %v2906_v53, %s4161_s23 }
0x230f   :  { %3093 = vrot.lane.b32.xlu1 %v2906_v53, %s4160_s22 }
0x2383   :  { %v2827_v20 = vpop.xlane.xlu1 %2826 }
0x2384   :  { %vm2828_vm9 = vcmp.eq.f32.partialorder %v2825_v14, %v2827_v20  ;;  %v2833_v49 = vcvt.f32.s32 %v2827_v20 }
0x2385   :  { %v2829_v25 = vsel %vm2828_vm9, %v2824_v23, inf }
0x2386   :  { %2830 = vmin.xlane.f32.xlu0 %v2829_v25  ;;  %v2834_v61 = vshll.u32 %v2833_v49, 16 }
0x2387   :  { %v2953_v44 = vpop.xlane.xlu1 %2952 }
0x2388   :  { %v2960_v12 = vrot.slane %v2953_v44, 4 }
0x238a   :  { %2949 = vadd.xlane.f32.xlu0 %v2948_v31  ;;  %v2961_v28 = vmax.f32 %v2953_v44, %v2960_v12  ;;  %v3319_v31 = vadd.s32 4294967240, %v4245_v18 }
0x238c   :  { %v2962_v45 = vrot.slane %v2961_v28, 2  ;;  %v3322_v12 = vsub.s32 %v3319_v31, %v4256_v26 }
0x238e   :  { %v2963_v35 = vmax.f32 %v2961_v28, %v2962_v45 }
0x2390   :  { %v2964_v29 = vrot.slane %v2963_v35, 1 }
0x2392   :  { %v2965_v9 = vmax.f32 %v2963_v35, %v2964_v29 }
0x2394   :  { %v2967_v37 = vsub.f32 %v2953_v44, %v2965_v9 }
0x2396   :  { %v2970_v48 = vmul.f32 1.442695, %v2967_v37 }
0x2398   :  { %4053 = vpow2.f32 %v2970_v48 }
0x23a2   :  { %v4054_v58 = vpop.eup %4053 }
0x23a3   :  { %v2978_v54 = vrot.slane %v4054_v58, 4 }
0x23a5   :  { %v2979_v21 = vadd.f32 %v4054_v58, %v2978_v54 }
0x23a7   :  { %v2980_v0 = vrot.slane %v2979_v21, 2 }
0x23a9   :  { %v2981_v33 = vadd.f32 %v2980_v0, %v2979_v21  ;;  %v3084_v0 = vpop.permute.xlu1 %3083 }
0x23ab   :  { %v2982_v15 = vrot.slane %v2981_v33, 1 }
0x23ad   :  { %v2983_v16 = vadd.f32 %v2982_v15, %v2981_v33 }
0x2413   :  { %v2831_v59 = vpop.xlane.xlu0 %2830 }
0x2414   :  { %v2832_v36 = vcvt.f32.s32 %v2831_v59 }
0x2416   :  { %v2835_v62 = vadd.s32 %v2834_v61, %v2832_v36 }
0x2417   :  { %v2950_v63 = vpop.xlane.xlu0 %2949 }
0x2418   :  { %vm2836_vm10 = vcmp.eq.s32.totalorder %v4245_v18, %v2835_v62  ;;  %v2954_v2 = vrot.slane %v2950_v63, 4 }
0x2419   :  { %v3419_v53 = vsel %vm2836_vm10, 1.0, %v4158_v1 }
0x241a   :  { %v2955_v3 = vmax.f32 %v2950_v63, %v2954_v2  ;;  %3765 = vmatmul.mubr.msk.f32.vlgmr.msra.gmra.mrb[24].mxu1 %vm345_vm3, %v3419_v53 }
0x241c   :  { %v2956_v7 = vrot.slane %v2955_v3, 2 }
0x241e   :  { %v2957_v22 = vmax.f32 %v2955_v3, %v2956_v7 }
0x2420   :  { %v2958_v27 = vrot.slane %v2957_v22, 1 }
0x2422   :  { %v2959_v13 = vmax.f32 %v2957_v22, %v2958_v27 }
0x2424   :  { %v2966_v41 = vsub.f32 %v2950_v63, %v2959_v13 }
0x2426   :  { %v2968_v14 = vmul.f32 1.442695, %v2966_v41  ;;  %v3094_v41 = vpop.permute.xlu1 %3093 }
0x2428   :  { %4055 = vpow2.f32 %v2968_v14 }
0x2429   :  { %4057 = vrcp.f32 %v2983_v16 }
0x2432   :  { %v4056_v30 = vpop.eup %4055 }
0x2433   :  { %v2972_v42 = vrot.slane %v4056_v30, 4  ;;  %v4058_v17 = vpop.eup %4057 }
0x2434   :  { %v2987_v55 = vmul.f32 %v4058_v17, %v4054_v58 }
0x2435   :  { %v2973_v5 = vadd.f32 %v4056_v30, %v2972_v42 }
0x2436   :  { %v2989_v25 = vmul.f32 %v2987_v55, %v4283_v43  ;;  %v3327_v37 = vrot.slane %v2987_v55, %v3322_v12  ;;  %v909_v55 = vsub.f32 %v4413_v8, %v4427_v24 }
0x2437   :  { %v2974_v1 = vrot.slane %v2973_v5, 2 }
0x2438   :  { %v2997_v34 = vsel %vm323_vm4, %v2989_v25, 0.0 }
0x2439   :  { %v2975_v19 = vadd.f32 %v2974_v1, %v2973_v5  ;;  %v2998_v44 = vrot.slane %v2997_v34, 4 }
0x243b   :  { %v2976_v20 = vrot.slane %v2975_v19, 1  ;;  %v2999_v45 = vadd.f32 %v2998_v44, %v2997_v34  ;;  %v2049_v34 = vsub.f32 %v4635_v51, %v4644_v46  ;;  %v529_v44 = vsub.f32 %v4348_v38, %v4357_v50 }
0x243d   :  { %v2977_v23 = vadd.f32 %v2976_v20, %v2975_v19  ;;  %v3000_v48 = vrot.slane %v2999_v45, 2  ;;  %v910_v20 = vmul.f32 1.442695, %v909_v55  ;;  %v2050_v31 = vmul.f32 1.442695, %v2049_v34 }
0x243f   :  { %4059 = vrcp.f32 %v2977_v23  ;;  %v3001_v61 = vadd.f32 %v3000_v48, %v2999_v45  ;;  %v1289_v23 = vsub.f32 %v4484_v56, %v4493_v6  ;;  %v530_v45 = vmul.f32 1.442695, %v529_v44 }
0x2441   :  { %v3002_v54 = vrot.slane %v3001_v61, 1  ;;  %v1290_v25 = vmul.f32 1.442695, %v1289_v23 }
0x2449   :  { %v4060_v28 = vpop.eup %4059 }
0x244a   :  { %v2986_v35 = vmul.f32 %v4060_v28, %v4056_v30 }
0x244c   :  { %v2988_v29 = vmul.f32 %v2986_v35, %v4278_v39  ;;  %v3323_v9 = vrot.slane %v2986_v35, %v3322_v12  ;;  %v3003_v39 = vadd.f32 %v3002_v54, %v3001_v61 }
0x244e   :  { %v2990_v49 = vsel %vm323_vm4, %v2988_v29, 0.0  ;;  %v3328_v43 = vsel %vm340_vm5, %v3327_v37, %v3323_v9  ;;  %vm3334_vm4 = vcmask 523264  }
0x244f   :  { %v2991_v58 = vrot.slane %v2990_v49, 4  ;;  %v4804_v59 = vsel %vm3351_vm11, %v4745_v10, %v3328_v43 }
0x2451   :  { %v2992_v18 = vadd.f32 %v2991_v58, %v2990_v49 }
0x2453   :  { %v2993_v26 = vrot.slane %v2992_v18, 2 }
0x2455   :  { %v2994_v36 = vadd.f32 %v2993_v26, %v2992_v18 }
0x2457   :  { %v2995_v62 = vrot.slane %v2994_v36, 1 }
0x2459   :  { %v2996_v63 = vadd.f32 %v2995_v62, %v2994_v36 }
0x245b   :  { %v3006_v2 = vsel %vm340_vm5, %v3003_v39, %v2996_v63  ;;  %vm3336_vm5 = vcmask 654336  }
0x245c   :  { %3007 = vrot.lane.b32.xlu0 %v3006_v2, %s4161_s23  ;;  %v1669_v2 = vsub.f32 %v4549_v40, %v4573_v57 }
0x24ce   :  { %v3008_v21 = vpop.permute.xlu0 %3007 }
0x24ed   :  { %v3079_v53 = vpop.f32.mrb[24].mxu1 }
0x24ee   :  { %v3080_v3 = vadd.f32 %v3079_v53, %v3008_v21  ;;  %v3766_v7 = vpop.f32.mrb[25].mxu1  ;;  %v1670_v21 = vmul.f32 1.442695, %v1669_v2  ;;  %v2429_v53 = vsub.f32 %v4700_v47, %v4714_v4 }
0x24f0   :  { %v3086_v22 = vadd.f32 %v3084_v0, %v3080_v3 }
0x24f2   :  { %v3422_v10 = vmul.f32 -1.442695, %v3086_v22 }
0x24f4   :  { %4061 = vpow2.f32 %v3422_v10 }
0x24fe   :  { %v4062_v27 = vpop.eup %4061 }
0x24ff   :  { %v3090_v33 = vadd.f32 1.0, %v4062_v27 }
0x2501   :  { %4063 = vrcp.f32 %v3090_v33 }
0x250b   :  { %v4064_v13 = vpop.eup %4063 }
0x250c   :  { %v3096_v15 = vmul.f32 %v4064_v13, %v3094_v41  ;;  %v3103_v42 = vsub.f32 1.0, %v4064_v13  ;;  %v3109_v17 = vmul.f32 %v4064_v13, %v4754_v60  ;;  %v2809_v60 = vsub.f32 %v4769_v52, %v4778_v11 }
0x250e   :  { %3098 = vrot.lane.b32.xlu0 %v3096_v15, %s4162_s24  ;;  %v2810_v12 = vmul.f32 1.442695, %v2809_v60 }
0x2580   :  { %v3099_v14 = vpop.permute.xlu0 %3098 }
0x2581   :  { %v3101_v16 = vadd.f32 %v3099_v14, %v3080_v3  ;;  %v2430_v3 = vmul.f32 1.442695, %v2429_v53 }
0x2583   :  { %4065 = vtanh.f32 %v3101_v16 }
0x2584   :  { %4067 = vpow2.f32 %v910_v20 }
0x2585   :  { %4069 = vpow2.f32 %v1290_v25 }
0x2586   :  { %4071 = vpow2.f32 %v2050_v31 }
0x2587   :  { %4073 = vpow2.f32 %v2810_v12 }
0x2588   :  { %4075 = vpow2.f32 %v530_v45 }
0x258d   :  { %v4066_v30 = vpop.eup %4065 }
0x258e   :  { %3105 = vrot.lane.b32.xlu1 %v4066_v30, %s4161_s23  ;;  %v4068_v28 = vpop.eup %4067 }
0x258f   :  { %v912_v35 = vsel %vm525_vm6, %v4068_v28, 0.0  ;;  %v4070_v29 = vpop.eup %4069 }
0x2590   :  { %v1292_v9 = vsel %vm525_vm6, %v4070_v29, 0.0  ;;  %v4072_v37 = vpop.eup %4071 }
0x2591   :  { %v2052_v48 = vsel %vm525_vm6, %v4072_v37, 0.0  ;;  %v4074_v49 = vpop.eup %4073 }
0x2592   :  { %v2812_v43 = vsel %vm525_vm6, %v4074_v49, 0.0  ;;  %v4076_v58 = vpop.eup %4075 }
0x2593   :  { %v532_v18 = vsel %vm525_vm6, %v4076_v58, 0.0 }
0x2600   :  { %v3106_v5 = vpop.permute.xlu1 %3105 }
0x2601   :  { %v3108_v1 = vmul.f32 %v3106_v5, %v3103_v42 }
0x2603   :  { %v3110_v19 = vadd.f32 %v3109_v17, %v3108_v1 }
0x2605   :  { %3112 = vrot.lane.b32.xlu0 %v3110_v19, %s4161_s23 }
0x2624   :  { %913 = vadd.xlane.f32.xlu0 %v912_v35 }
0x2628   :  { %1293 = vadd.xlane.f32.xlu0 %v1292_v9 }
0x262c   :  { %2053 = vadd.xlane.f32.xlu0 %v2052_v48 }
0x2630   :  { %2813 = vadd.xlane.f32.xlu0 %v2812_v43 }
0x2634   :  { %533 = vadd.xlane.f32.xlu0 %v532_v18 }
0x2677   :  { %v4827_v61 = vpop.permute.xlu0 %3112 }
0x2678   :  { %3776 = vmatmul.mubr.msk.f32.vlgmr.msra.gmra.mrb[22].mxu0 %vm82_vm1, %v4827_v61 }
0x26b1   :  { %v914_v26 = vpop.xlane.xlu0 %913 }
0x26b5   :  { %v1294_v36 = vpop.xlane.xlu0 %1293 }
0x26b6   :  { %4077 = vlog2.f32 %v1294_v36 }
0x26b7   :  { %4079 = vpow2.f32 %v1670_v21 }
0x26b8   :  { %4081 = vpow2.f32 %v2430_v3 }
0x26b9   :  { %v2054_v16 = vpop.xlane.xlu0 %2053 }
0x26bd   :  { %v2814_v17 = vpop.xlane.xlu0 %2813 }
0x26c0   :  { %v4078_v54 = vpop.eup %4077 }
0x26c1   :  { %v1296_v62 = vmul.f32 0.6931472, %v4078_v54 }
0x26c3   :  { %v1297_v63 = vadd.f32 %v1296_v62, %v4493_v6  ;;  %v4080_v6 = vpop.eup %4079 }
0x26c4   :  { %v1672_v10 = vsel %vm525_vm6, %v4080_v6, 0.0  ;;  %v4082_v27 = vpop.eup %4081 }
0x26c5   :  { %v1298_v39 = vsub.f32 %v4484_v56, %v1297_v63  ;;  %v2432_v33 = vsel %vm525_vm6, %v4082_v27, 0.0 }
0x26c7   :  { %3204 = vrot.lane.b32.xlu0 %v1298_v39, %s4160_s22 }
0x274b   :  { %v3182_v7 = vpop.f32.mrb[22].mxu0 }
0x274c   :  { %v4839_v0 = vadd.f32 %v4632_v32, %v3182_v7  ;;  %v3777_v22 = vpop.f32.mrb[23].mxu0 }
0x274e   :  { %v3186_v56 = vsel %vm525_vm6, %v4839_v0, -inf }
0x274f   :  { %3187 = vmax.xlane.f32.xlu1 %v3186_v56 }
0x2753   :  { %1673 = vadd.xlane.f32.xlu1 %v1672_v10 }
0x2757   :  { %2433 = vadd.xlane.f32.xlu1 %v2432_v33 }
0x27dc   :  { %v3188_v13 = vpop.xlane.xlu1 %3187 }
0x27dd   :  { %v3189_v41 = vsub.f32 %v4839_v0, %v3188_v13 }
0x27df   :  { %v3190_v15 = vmul.f32 1.442695, %v3189_v41 }
0x27e0   :  { %v1674_v14 = vpop.xlane.xlu1 %1673 }
0x27e1   :  { %4083 = vpow2.f32 %v3190_v15 }
0x27e4   :  { %v2434_v32 = vpop.xlane.xlu1 %2433 }
0x27e5   :  { %4085 = vlog2.f32 %v2434_v32 }
0x27e6   :  { %4087 = vlog2.f32 %v914_v26 }
0x27e7   :  { %4089 = vlog2.f32 %v1674_v14 }
0x27e8   :  { %4091 = vlog2.f32 %v2054_v16 }
0x27e9   :  { %4093 = vlog2.f32 %v2814_v17 }
0x27eb   :  { %v4084_v30 = vpop.eup %4083 }
0x27ec   :  { %v3192_v42 = vsel %vm525_vm6, %v4084_v30, 0.0  ;;  %vm3338_vm6 = vcmask 785408  }
0x27ed   :  { %3193 = vadd.xlane.f32.xlu1 %v3192_v42 }
0x27ef   :  { %v4086_v5 = vpop.eup %4085 }
0x27f0   :  { %v2436_v1 = vmul.f32 0.6931472, %v4086_v5  ;;  %v4088_v19 = vpop.eup %4087 }
0x27f1   :  { %v916_v20 = vmul.f32 0.6931472, %v4088_v19  ;;  %v4090_v25 = vpop.eup %4089 }
0x27f2   :  { %v2437_v55 = vadd.f32 %v2436_v1, %v4714_v4  ;;  %v1676_v31 = vmul.f32 0.6931472, %v4090_v25  ;;  %v4092_v60 = vpop.eup %4091 }
0x27f3   :  { %v917_v34 = vadd.f32 %v916_v20, %v4427_v24  ;;  %v2056_v12 = vmul.f32 0.6931472, %v4092_v60  ;;  %v4094_v45 = vpop.eup %4093 }
0x27f4   :  { %v2438_v23 = vsub.f32 %v4700_v47, %v2437_v55  ;;  %v1677_v28 = vadd.f32 %v1676_v31, %v4573_v57  ;;  %v2816_v35 = vmul.f32 0.6931472, %v4094_v45  ;;  %v3354_v57 = vsel %vm82_vm1, %v4827_v61, 0.0 }
0x27f5   :  { %v918_v44 = vsub.f32 %v4413_v8, %v917_v34  ;;  %v2057_v4 = vadd.f32 %v2056_v12, %v4644_v46 }
0x27f6   :  { %3216 = vrot.lane.b32.xlu0 %v2438_v23, %s4163_s3  ;;  %v1678_v47 = vsub.f32 %v4549_v40, %v1677_v28  ;;  %v2817_v24 = vadd.f32 %v2816_v35, %v4778_v11  ;;  %v534_v11 = vpop.xlane.xlu0 %533 }
0x27f7   :  { %v2058_v29 = vsub.f32 %v4635_v51, %v2057_v4 }
0x27f8   :  { %v2818_v8 = vsub.f32 %v4769_v52, %v2817_v24 }
0x27fa   :  { %v3205_v36 = vpop.permute.xlu0 %3204 }
0x27fe   :  { %3200 = vrot.lane.b32.xlu1 %v918_v44, %s4164_s7 }
0x2802   :  { %3208 = vrot.lane.b32.xlu1 %v1678_v47, %s4165_s8 }
0x2806   :  { %3212 = vrot.lane.b32.xlu1 %v2058_v29, %s4162_s24 }
0x280a   :  { %3220 = vrot.lane.b32.xlu1 %v2818_v8, %s4161_s23 }
0x280e   :  { %3356 = vrot.lane.b32.xlu1 %v3354_v57, %s4162_s24 }
0x2868   :  { %v3217_v39 = vpop.permute.xlu0 %3216 }
0x287a   :  { %v3194_v46 = vpop.xlane.xlu1 %3193 }
0x287b   :  { %4095 = vlog2.f32 %v3194_v46 }
0x287c   :  { %4097 = vlog2.f32 %v534_v11 }
0x287e   :  { %v3201_v48 = vpop.permute.xlu1 %3200 }
0x2882   :  { %v3209_v49 = vpop.permute.xlu1 %3208 }
0x2885   :  { %v4096_v40 = vpop.eup %4095 }
0x2886   :  { %v3196_v9 = vmul.f32 0.6931472, %v4096_v40  ;;  %v4098_v52 = vpop.eup %4097  ;;  %v3213_v18 = vpop.permute.xlu1 %3212 }
0x2887   :  { %v536_v43 = vmul.f32 0.6931472, %v4098_v52 }
0x2888   :  { %v3197_v37 = vadd.f32 %v3196_v9, %v3188_v13 }
0x2889   :  { %v537_v58 = vadd.f32 %v536_v43, %v4357_v50 }
0x288a   :  { %v3198_v51 = vsub.f32 %v4839_v0, %v3197_v37  ;;  %v3221_v54 = vpop.permute.xlu1 %3220 }
0x288b   :  { %v538_v61 = vsub.f32 %v4348_v38, %v537_v58 }
0x288c   :  { %3224 = vrot.lane.b32.xlu0 %v3198_v51, %s4166_s9 }
0x288d   :  { %v3330_v26 = vsel %vm345_vm3, %v538_v61, %v3201_v48 }
0x288e   :  { %v3331_v62 = vsel %vm82_vm1, %v3330_v26, %v3205_v36  ;;  %v3357_v21 = vpop.permute.xlu1 %3356 }
0x288f   :  { %v3333_v63 = vsel %vm3332_vm8, %v3331_v62, %v3209_v49  ;;  %v3359_v38 = vsel %vm3334_vm4, %v4804_v59, %v3357_v21 }
0x2890   :  { %v3335_v2 = vsel %vm3334_vm4, %v3333_v63, %v3213_v18 }
0x2891   :  { %v3337_v53 = vsel %vm3336_vm5, %v3335_v2, %v3217_v39 }
0x2892   :  { %v3339_v50 = vsel %vm3338_vm6, %v3337_v53, %v3221_v54 }
0x28fe   :  { %v3225_v3 = vpop.permute.xlu0 %3224 }
0x28ff   :  { %v3341_v7 = vsel %vm3340_vm12, %v3339_v50, %v3225_v3 }
0x2900   :  { %v3362_v0 = vcombine.low %v3341_v7, %v3359_v38 }
0x2902   :  { %3424 = vst.sshfl [vmem:[%s4876_s4] sm:$0x33 pattern:$0x76325410] %v3362_v0 }
0x2903   :  { %3376 = vsyncpa [#allocation3], 1 }
0x2904   :  { %3377 = vsyncpa [#allocation5], 1 }

</bundles_post_ra>
